<compile_context>
chip_gen: v7x
topology: tpu7x:2x2x1
jax: 0.10.0
libtpu: 0.0.40
codegen_flags: <defaults>
</compile_context>

<pallas_src>
import functools
import numpy as np

import jax
import jax.numpy as jnp
from jax.experimental import pallas as pl
from jax.experimental.pallas import tpu as pltpu

# Explicit scoped-VMEM budget (safe on v5e/v6e 128 MiB and v7x 64 MiB).
_VMEM_LIMIT = 32 * 1024 * 1024

# NOTE: for extra throughput on v5e/v6e, matmul operands could be cast to
# bf16 (f32 accumulation).  Kept f32 here to preserve the reference module's
# numerics exactly.
_MM_DTYPE = jnp.float32


# ----------------------------------------------------------------------------
# Pallas kernels
# ----------------------------------------------------------------------------

def _matmul_kernel(*refs, has_res):
    """Tiled matmul with f32 accumulator; bias (+ optional residual) fused on
    the last K step."""
    if has_res:
        x_ref, w_ref, b_ref, r_ref, o_ref, acc_ref = refs
    else:
        x_ref, w_ref, b_ref, o_ref, acc_ref = refs
        r_ref = None

    @pl.when(pl.program_id(2) == 0)
    def _():
        acc_ref[...] = jnp.zeros_like(acc_ref)

    acc_ref[...] += jnp.dot(x_ref[...], w_ref[...],
                            preferred_element_type=jnp.float32)

    @pl.when(pl.program_id(2) == pl.num_programs(2) - 1)
    def _():
        acc = acc_ref[...] + b_ref[...].astype(jnp.float32)
        if has_res:
            acc = acc + r_ref[...].astype(jnp.float32)
        o_ref[...] = acc.astype(o_ref.dtype)


def matmul(x2d, w, b, residual=None, *, tm=128, tn=128, tk=256):
    """x2d: (M, K) @ w: (K, N) + b (+ residual (M, N)) -> (M, N)."""
    M, K = x2d.shape
    K2, N = w.shape
    assert K == K2
    tm = tm if M % tm == 0 else M
    tn = tn if N % tn == 0 else N
    tk = tk if K % tk == 0 else K
    has_res = residual is not None

    in_specs = [
        pl.BlockSpec((tm, tk), lambda i, j, k: (i, k)),
        pl.BlockSpec((tk, tn), lambda i, j, k: (k, j)),
        pl.BlockSpec((1, tn), lambda i, j, k: (0, j)),
    ]
    args = [x2d.astype(_MM_DTYPE), w.astype(_MM_DTYPE), b.reshape(1, N)]
    if has_res:
        in_specs.append(pl.BlockSpec((tm, tn), lambda i, j, k: (i, j)))
        args.append(residual)

    return pl.pallas_call(
        functools.partial(_matmul_kernel, has_res=has_res),
        out_shape=jax.ShapeDtypeStruct((M, N), x2d.dtype),
        grid=(M // tm, N // tn, K // tk),
        in_specs=in_specs,
        out_specs=pl.BlockSpec((tm, tn), lambda i, j, k: (i, j)),
        scratch_shapes=[pltpu.VMEM((tm, tn), jnp.float32)],
        compiler_params=pltpu.CompilerParams(
            dimension_semantics=("parallel", "parallel", "arbitrary"),
            vmem_limit_bytes=_VMEM_LIMIT),
    )(*args)


def _ln_matmul_kernel(x_ref, g_ref, beta_ref, w_ref, *rest, has_bias, eps):
    """Fused LayerNorm (over last dim) -> matmul (+ optional bias)."""
    if has_bias:
        b_ref, o_ref = rest
    else:
        (o_ref,) = rest
    x = x_ref[...].astype(jnp.float32)
    mu = jnp.mean(x, axis=-1, keepdims=True)
    var = jnp.mean(jnp.square(x - mu), axis=-1, keepdims=True)
    h = (x - mu) * jax.lax.rsqrt(var + eps) * g_ref[...] + beta_ref[...]
    acc = jnp.dot(h, w_ref[...], preferred_element_type=jnp.float32)
    if has_bias:
        acc = acc + b_ref[...].astype(jnp.float32)
    o_ref[...] = acc.astype(o_ref.dtype)


def ln_matmul(x2d, gamma, beta, w, bias=None, *, eps=1e-5, tm=128):
    """LayerNorm(x2d) @ w (+ bias).  Grid over M tiles, full K/N per step."""
    M, D = x2d.shape
    D2, N = w.shape
    assert D == D2
    tm = tm if M % tm == 0 else M
    has_bias = bias is not None

    in_specs = [
        pl.BlockSpec((tm, D), lambda i: (i, 0)),
        pl.BlockSpec((1, D), lambda i: (0, 0)),
        pl.BlockSpec((1, D), lambda i: (0, 0)),
        pl.BlockSpec((D, N), lambda i: (0, 0)),
    ]
    args = [x2d, gamma.reshape(1, D), beta.reshape(1, D), w.astype(_MM_DTYPE)]
    if has_bias:
        in_specs.append(pl.BlockSpec((1, N), lambda i: (0, 0)))
        args.append(bias.reshape(1, N))

    return pl.pallas_call(
        functools.partial(_ln_matmul_kernel, has_bias=has_bias, eps=eps),
        out_shape=jax.ShapeDtypeStruct((M, N), x2d.dtype),
        grid=(M // tm,),
        in_specs=in_specs,
        out_specs=pl.BlockSpec((tm, N), lambda i: (i, 0)),
        compiler_params=pltpu.CompilerParams(
            dimension_semantics=("parallel",),
            vmem_limit_bytes=_VMEM_LIMIT),
    )(*args)


def _window_attn_kernel(q_ref, k_ref, v_ref, bias_ref, o_ref, *, scale):
    """All heads & windows of one batch element per grid step.
    q/k/v refs: (G, WS2, D) with G = heads * num_windows; bias: (G, WS2, WS2)."""
    q = q_ref[...].astype(jnp.float32)
    k = k_ref[...].astype(jnp.float32)
    v = v_ref[...].astype(jnp.float32)
    bias = bias_ref[...]                                    # may contain -inf

    dots = jnp.einsum('gqd,gkd->gqk', q, k,
                      preferred_element_type=jnp.float32) * scale + bias
    m = jnp.max(dots, axis=-1, keepdims=True)
    p = jnp.exp(dots - m)
    denom = jnp.sum(p, axis=-1, keepdims=True)
    p = p * pl.reciprocal(denom, approx=True)               # EUP slot, ~free
    out = jnp.einsum('gqk,gkd->gqd', p, v,
                     preferred_element_type=jnp.float32)
    o_ref[...] = out.astype(o_ref.dtype)


def window_attention_core(q, k, v, bias, scale):
    """q/k/v: (B, G, WS2, D); bias: (G, WS2, WS2) -> (B, G, WS2, D)."""
    B, G, WS2, D = q.shape
    qkv_spec = pl.BlockSpec((None, G, WS2, D), lambda b: (b, 0, 0, 0))
    return pl.pallas_call(
        functools.partial(_window_attn_kernel, scale=scale),
        out_shape=jax.ShapeDtypeStruct((B, G, WS2, D), q.dtype),
        grid=(B,),
        in_specs=[qkv_spec, qkv_spec, qkv_spec,
                  pl.BlockSpec((G, WS2, WS2), lambda b: (0, 0, 0))],
        out_specs=pl.BlockSpec((None, G, WS2, D), lambda b: (b, 0, 0, 0)),
        compiler_params=pltpu.CompilerParams(
            dimension_semantics=("parallel",),
            vmem_limit_bytes=_VMEM_LIMIT),
    )(q, k, v, bias)


def _conv_bn_ln_mm_kernel(x_ref, w_ref, g_ref, b_ref, lng_ref, lnb_ref,
                          w1_ref, b1_ref, y_ref, h_ref, *, bn_eps, ln_eps):
    """Depthwise 3x3 conv (stride 1, pad 1, pre-padded input) fused with
    training-mode BatchNorm (batch statistics computed in-kernel), followed by
    the MLP-block LayerNorm and fc1 matmul (+bias).

    Outputs:
      y_ref: conv+BN result (B, H, W, C)      -- also the fc2 residual
      h_ref: fc1 pre-activation (B*H*W, N1)
    """
    xp = x_ref[...]                      # (B, H+2, W+2, C)
    w = w_ref[...]                       # (3, 3, C)
    B, Hp, Wp, C = xp.shape
    H, W = Hp - 2, Wp - 2

    acc = jnp.zeros((B, H, W, C), jnp.float32)
    for di in range(3):
        for dj in range(3):
            acc = acc + xp[:, di:di + H, dj:dj + W, :].astype(jnp.float32) * w[di, dj]

    flat = acc.reshape(B * H * W, C)
    mean = jnp.mean(flat, axis=0, keepdims=True)
    var = jnp.mean(jnp.square(flat - mean), axis=0, keepdims=True)
    y = (flat - mean) * jax.lax.rsqrt(var + bn_eps) * g_ref[...] + b_ref[...]
    y_ref[...] = y.reshape(B, H, W, C).astype(y_ref.dtype)

    # PreNorm(FeedForward) first half: LayerNorm over features + fc1 (+bias).
    mu = jnp.mean(y, axis=-1, keepdims=True)
    v2 = jnp.mean(jnp.square(y - mu), axis=-1, keepdims=True)
    hn = (y - mu) * jax.lax.rsqrt(v2 + ln_eps) * lng_ref[...] + lnb_ref[...]
    h = jnp.dot(hn, w1_ref[...], preferred_element_type=jnp.float32)
    h = h + b1_ref[...].astype(jnp.float32)
    h_ref[...] = h.astype(h_ref.dtype)


def conv_bn_ln_mlp1(x_nhwc, w33c, bn_g, bn_b, ln_g, ln_b, w1, b1,
                    *, bn_eps=1e-5, ln_eps=1e-5):
    """Conv2d_BN (depthwise 3x3, batch stats) fused with LN2 + MLP fc1."""
    B, H, W, C = x_nhwc.shape
    N1 = w1.shape[1]
    M = B * H * W
    xp = jnp.pad(x_nhwc, ((0, 0), (1, 1), (1, 1), (0, 0)))
    return pl.pallas_call(
        functools.partial(_conv_bn_ln_mm_kernel, bn_eps=bn_eps, ln_eps=ln_eps),
        out_shape=(jax.ShapeDtypeStruct((B, H, W, C), x_nhwc.dtype),
                   jax.ShapeDtypeStruct((M, N1), x_nhwc.dtype)),
        grid=(1,),
        in_specs=[
            pl.BlockSpec((B, H + 2, W + 2, C), lambda i: (0, 0, 0, 0)),
            pl.BlockSpec((3, 3, C), lambda i: (0, 0, 0)),
            pl.BlockSpec((1, C), lambda i: (0, 0)),
            pl.BlockSpec((1, C), lambda i: (0, 0)),
            pl.BlockSpec((1, C), lambda i: (0, 0)),
            pl.BlockSpec((1, C), lambda i: (0, 0)),
            pl.BlockSpec((C, N1), lambda i: (0, 0)),
            pl.BlockSpec((1, N1), lambda i: (0, 0)),
        ],
        out_specs=[pl.BlockSpec((B, H, W, C), lambda i: (0, 0, 0, 0)),
                   pl.BlockSpec((M, N1), lambda i: (0, 0))],
        compiler_params=pltpu.CompilerParams(vmem_limit_bytes=_VMEM_LIMIT),
    )(xp, w33c, bn_g.reshape(1, C), bn_b.reshape(1, C),
      ln_g.reshape(1, C), ln_b.reshape(1, C),
      w1.astype(_MM_DTYPE), b1.reshape(1, N1))


# ----------------------------------------------------------------------------
# Static masks / indices (hoisted, computed once per config)
# ----------------------------------------------------------------------------

def create_mask_np(window_size, displacement, upper_lower, left_right):
    mask = np.zeros((window_size ** 2, window_size ** 2), dtype=np.float32)
    if upper_lower:
        mask[-displacement * window_size:, :-displacement * window_size] = -np.inf
        mask[:-displacement * window_size, -displacement * window_size:] = -np.inf
    if left_right:
        mask = mask.reshape(window_size, window_size, window_size, window_size)
        mask[:, -displacement:, :, :-displacement] = -np.inf
        mask[:, :-displacement, :, -displacement:] = -np.inf
        mask = mask.reshape(window_size ** 2, window_size ** 2)
    return mask


def get_relative_indices_np(window_size):
    coords = np.array([[x, y] for x in range(window_size) for y in range(window_size)])
    rel = coords[None, :, :] - coords[:, None, :]
    return rel + window_size - 1  # (ws^2, ws^2, 2)


def build_shift_mask_np(window_size, nw_h, nw_w):
    """Per-window additive shift masks, (nw_h*nw_w, ws^2, ws^2)."""
    disp = window_size // 2
    ws2 = window_size * window_size
    ul = create_mask_np(window_size, disp, True, False)
    lr = create_mask_np(window_size, disp, False, True)
    m = np.zeros((nw_h * nw_w, ws2, ws2), np.float32)
    m[-nw_w:] += ul
    m[nw_w - 1::nw_w] += lr
    return m


# ----------------------------------------------------------------------------
# Module composition
# ----------------------------------------------------------------------------

def attention_block(x, p, *, heads, head_dim, window_size, shifted,
                    relative_pos_embedding, rel_indices, shift_mask):
    """Residual(PreNorm(WindowAttention)): returns x + attn(LN(x))."""
    b, n_h, n_w, dim = x.shape
    ws = window_size
    disp = ws // 2
    inner = heads * head_dim
    scale = head_dim ** (-0.5)
    nw_h, nw_w = n_h // ws, n_w // ws
    nw = nw_h * nw_w
    ws2 = ws * ws

    x_sh = jnp.roll(x, shift=(-disp, -disp), axis=(1, 2)) if shifted else x
    x2d = x_sh.reshape(-1, dim)

    # Fused LayerNorm + bias-free qkv projection (one pallas_call).
    qkv = ln_matmul(x2d, p["ln1_g"], p["ln1_b"], p["w_qkv"], bias=None)

    # Window partition glue (XLA).
    qkv = qkv.reshape(b, nw_h, ws, nw_w, ws, 3, heads, head_dim)
    qkv = qkv.transpose(5, 0, 6, 1, 3, 2, 4, 7).reshape(3, b, heads * nw, ws2, head_dim)
    q, k, v = qkv[0], qkv[1], qkv[2]

    # Per-window additive bias: positional embedding (+ static shift masks).
    if relative_pos_embedding:
        pos = p["pos_embedding"][rel_indices[..., 0], rel_indices[..., 1]]
    else:
        pos = p["pos_embedding"]
    pos = pos.astype(jnp.float32)
    if shifted:
        bias = pos[None] + shift_mask                       # (nw, ws2, ws2)
    else:
        bias = jnp.broadcast_to(pos[None], (nw, ws2, ws2))
    bias = jnp.broadcast_to(bias[None], (heads, nw, ws2, ws2)).reshape(
        heads * nw, ws2, ws2)

    out = window_attention_core(q, k, v, bias, scale)       # (b, heads*nw, ws2, d)

    out = out.reshape(b, heads, nw_h, nw_w, ws, ws, head_dim)
    out = out.transpose(0, 2, 4, 3, 5, 1, 6).reshape(-1, inner)

    # Output projection with bias + residual fused (residual in shifted frame).
    y = matmul(out, p["w_out"], p["b_out"], residual=x2d)
    y = y.reshape(b, n_h, n_w, dim)
    if shifted:
        y = jnp.roll(y, shift=(disp, disp), axis=(1, 2))
    return y


def swin_block(x, p, *, heads, head_dim, window_size, shifted,
               relative_pos_embedding, rel_indices, shift_mask):
    b, n_h, n_w, dim = x.shape

    # Residual(PreNorm(WindowAttention)) -- LN1, out-proj bias and residual fused.
    x = attention_block(x, p, heads=heads, head_dim=head_dim,
                        window_size=window_size, shifted=shifted,
                        relative_pos_embedding=relative_pos_embedding,
                        rel_indices=rel_indices, shift_mask=shift_mask)

    # local_conv (depthwise 3x3 + training-mode BN) fused with LN2 + MLP fc1
    # in one kernel: saves a launch and an HBM round-trip of the conv output.
    x_conv, h = conv_bn_ln_mlp1(x, p["conv_w"], p["bn_g"], p["bn_b"],
                                p["ln2_g"], p["ln2_b"], p["w_mlp1"], p["b_mlp1"])

    # TODO(synk): exact erf-GELU kept in XLA (Mosaic erf lowering not relied on).
    h = jax.nn.gelu(h, approximate=False)

    # MLP fc2 with bias + residual (conv output) fused.
    x2d = matmul(h, p["w_mlp2"], p["b_mlp2"], residual=x_conv.reshape(-1, dim))
    return x2d.reshape(b, n_h, n_w, dim)


def patch_merging(x_nchw, w, bias, df):
    """nn.Unfold(k=df, s=df) + Linear. Feature order = c*df*df + ki*df + kj."""
    b, c, hh, ww = x_nchw.shape
    nh, nw = hh // df, ww // df
    xp = x_nchw.reshape(b, c, nh, df, nw, df)
    xp = xp.transpose(0, 2, 4, 1, 3, 5).reshape(b, nh, nw, c * df * df)
    y = matmul(xp.reshape(-1, c * df * df), w, bias)
    return y.reshape(b, nh, nw, -1)


def stage_module_forward(x_nchw, params, cfg):
    x = patch_merging(x_nchw, params["patch_w"], params["patch_b"],
                      cfg["downscaling_factor"])
    rel_indices = cfg["rel_indices"]
    shift_mask = cfg["shift_mask"]
    for blk_regular, blk_shifted in params["layers"]:
        x = swin_block(x, blk_regular, heads=cfg["num_heads"], head_dim=cfg["head_dim"],
                       window_size=cfg["window_size"], shifted=False,
                       relative_pos_embedding=cfg["relative_pos_embedding"],
                       rel_indices=rel_indices, shift_mask=shift_mask)
        x = swin_block(x, blk_shifted, heads=cfg["num_heads"], head_dim=cfg["head_dim"],
                       window_size=cfg["window_size"], shifted=True,
                       relative_pos_embedding=cfg["relative_pos_embedding"],
                       rel_indices=rel_indices, shift_mask=shift_mask)
    return x.transpose(0, 3, 1, 2)  # back to NCHW


# ----------------------------------------------------------------------------
# Deterministic parameter initialization (synthetic; shapes from __init__)
# ----------------------------------------------------------------------------

def init_params(key, *, in_channels, hidden, layers, df, heads, head_dim, ws,
                relative_pos_embedding):
    keys = iter(jax.random.split(key, 256))

    def nrm(shape, scale=0.02):
        return (scale * jax.random.normal(next(keys), shape)).astype(jnp.float32)

    inner = heads * head_dim
    params = {
        "patch_w": nrm((in_channels * df * df, hidden)),
        "patch_b": jnp.zeros((hidden,), jnp.float32),
        "layers": [],
    }
    for _ in range(layers // 2):
        pair = []
        for _ in range(2):  # regular block, shifted block
            pos_shape = ((2 * ws - 1, 2 * ws - 1) if relative_pos_embedding
                         else (ws * ws, ws * ws))
            blk = {
                "ln1_g": jnp.ones((hidden,), jnp.float32),
                "ln1_b": jnp.zeros((hidden,), jnp.float32),
                "w_qkv": nrm((hidden, 3 * inner)),
                "pos_embedding": jax.random.normal(next(keys), pos_shape, jnp.float32),
                "w_out": nrm((inner, hidden)),
                "b_out": jnp.zeros((hidden,), jnp.float32),
                "conv_w": nrm((3, 3, hidden)),               # depthwise (3,3,C)
                "bn_g": jnp.ones((hidden,), jnp.float32),    # bn_weight_init=1
                "bn_b": jnp.zeros((hidden,), jnp.float32),
                "ln2_g": jnp.ones((hidden,), jnp.float32),
                "ln2_b": jnp.zeros((hidden,), jnp.float32),
                "w_mlp1": nrm((hidden, 4 * hidden)),
                "b_mlp1": jnp.zeros((4 * hidden,), jnp.float32),
                "w_mlp2": nrm((4 * hidden, hidden)),
                "b_mlp2": jnp.zeros((hidden,), jnp.float32),
            }
            pair.append(blk)
        params["layers"].append(tuple(pair))
    return params


# ----------------------------------------------------------------------------
# Main
# ----------------------------------------------------------------------------

if __name__ == "__main__":
    # StageModule config (small): in_channels=4, hidden=32, layers=2, df=2,
    # heads=2, head_dim=16, window_size=4, relative_pos_embedding=True.
    B, C, H, W = 2, 4, 16, 16
    hidden, layers, df = 32, 2, 2
    heads, head_dim, ws = 2, 16, 4
    rel_pos = True

    key = jax.random.PRNGKey(0)
    kx, kp = jax.random.split(key)
    x = jax.random.normal(kx, (B, C, H, W), jnp.float32)   # NCHW input

    params = init_params(kp, in_channels=C, hidden=hidden, layers=layers, df=df,
                         heads=heads, head_dim=head_dim, ws=ws,
                         relative_pos_embedding=rel_pos)

    n_h, n_w = H // df, W // df
    nw_h, nw_w = n_h // ws, n_w // ws
    cfg = {
        "downscaling_factor": df,
        "num_heads": heads,
        "head_dim": head_dim,
        "window_size": ws,
        "relative_pos_embedding": rel_pos,
        "rel_indices": get_relative_indices_np(ws),
        "shift_mask": jnp.asarray(build_shift_mask_np(ws, nw_h, nw_w)),
    }

    fwd = jax.jit(lambda xx, pp: stage_module_forward(xx, pp, cfg))
    out = fwd(x, params)
    out = jax.block_until_ready(out)

    expected_shape = (B, hidden, H // df, W // df)
    assert out.shape == expected_shape, (out.shape, expected_shape)
    assert bool(jnp.all(jnp.isfinite(out)))
    print("KERNEL_OK")
</pallas_src>

<mosaic_0001>
module attributes {stable_mosaic.version = 11 : i64} {
  func.func @_ln_matmul_kernel(%arg0: i32, %arg1: memref<128x32xf32, #tpu.memory_space<vmem>>, %arg2: memref<1x32xf32, #tpu.memory_space<vmem>>, %arg3: memref<1x32xf32, #tpu.memory_space<vmem>>, %arg4: memref<32x96xf32, #tpu.memory_space<vmem>>, %arg5: memref<128x96xf32, #tpu.memory_space<vmem>>) attributes {dimension_semantics = [#tpu.dimension_semantics<parallel>], iteration_bounds = array<i64: 1>, scalar_prefetch = 0 : i64, scratch_operands = 0 : i64, tpu.core_type = #tpu.core_type<tc>, window_params = [{transform_indices = @transform_0, window_bounds = array<i64: 128, 32>}, {pipeline_mode = #tpu.pipeline_mode<synchronous>, transform_indices = @transform_1, window_bounds = array<i64: 1, 32>}, {pipeline_mode = #tpu.pipeline_mode<synchronous>, transform_indices = @transform_2, window_bounds = array<i64: 1, 32>}, {pipeline_mode = #tpu.pipeline_mode<synchronous>, transform_indices = @transform_3, window_bounds = array<i64: 32, 96>}, {transform_indices = @transform_4, window_bounds = array<i64: 128, 96>}]} {
    %c0 = arith.constant 0 : index
    %c0_0 = arith.constant 0 : index
    %0 = vector.load %arg1[%c0, %c0_0] : memref<128x32xf32, #tpu.memory_space<vmem>>, vector<128x32xf32>
    %cst = arith.constant dense<0.000000e+00> : vector<128xf32>
    %1 = vector.multi_reduction <add>, %0, %cst [1] : vector<128x32xf32> to vector<128xf32>
    %2 = vector.shape_cast %1 : vector<128xf32> to vector<128x1xf32>
    %cst_1 = arith.constant 3.200000e+01 : f32
    %3 = vector.broadcast %cst_1 : f32 to vector<128x1xf32>
    %4 = arith.divf %2, %3 : vector<128x1xf32>
    %5 = vector.broadcast %4 : vector<128x1xf32> to vector<128x32xf32>
    %6 = arith.subf %0, %5 : vector<128x32xf32>
    %7 = arith.mulf %6, %6 : vector<128x32xf32>
    %cst_2 = arith.constant dense<0.000000e+00> : vector<128xf32>
    %8 = vector.multi_reduction <add>, %7, %cst_2 [1] : vector<128x32xf32> to vector<128xf32>
    %9 = vector.shape_cast %8 : vector<128xf32> to vector<128x1xf32>
    %cst_3 = arith.constant 3.200000e+01 : f32
    %10 = vector.broadcast %cst_3 : f32 to vector<128x1xf32>
    %11 = arith.divf %9, %10 : vector<128x1xf32>
    %12 = vector.broadcast %4 : vector<128x1xf32> to vector<128x32xf32>
    %13 = arith.subf %0, %12 : vector<128x32xf32>
    %cst_4 = arith.constant 9.99999974E-6 : f32
    %14 = vector.broadcast %cst_4 : f32 to vector<128x1xf32>
    %15 = arith.addf %11, %14 : vector<128x1xf32>
    %16 = math.rsqrt %15 : vector<128x1xf32>
    %17 = vector.broadcast %16 : vector<128x1xf32> to vector<128x32xf32>
    %18 = arith.mulf %13, %17 : vector<128x32xf32>
    %c0_5 = arith.constant 0 : index
    %c0_6 = arith.constant 0 : index
    %19 = vector.load %arg2[%c0_5, %c0_6] : memref<1x32xf32, #tpu.memory_space<vmem>>, vector<1x32xf32>
    %20 = vector.broadcast %19 : vector<1x32xf32> to vector<128x32xf32>
    %21 = arith.mulf %18, %20 : vector<128x32xf32>
    %c0_7 = arith.constant 0 : index
    %c0_8 = arith.constant 0 : index
    %22 = vector.load %arg3[%c0_7, %c0_8] : memref<1x32xf32, #tpu.memory_space<vmem>>, vector<1x32xf32>
    %23 = vector.broadcast %22 : vector<1x32xf32> to vector<128x32xf32>
    %24 = arith.addf %21, %23 : vector<128x32xf32>
    %c0_9 = arith.constant 0 : index
    %c0_10 = arith.constant 0 : index
    %25 = vector.load %arg4[%c0_9, %c0_10] : memref<32x96xf32, #tpu.memory_space<vmem>>, vector<32x96xf32>
    %cst_11 = arith.constant dense<0.000000e+00> : vector<128x96xf32>
    %26 = tpu.matmul %24, %25, %cst_11 {dimension_numbers = #tpu.dot_dimension_numbers<[1], [0], [0], [1], [0, 0, 1, 1], [], []>} : vector<128x32xf32>, vector<32x96xf32>, vector<128x96xf32> -> vector<128x96xf32>
    %c0_12 = arith.constant 0 : index
    %c0_13 = arith.constant 0 : index
    %27 = vector.load %arg5[%c0_12, %c0_13] : memref<128x96xf32, #tpu.memory_space<vmem>>, vector<128x96xf32>
    tpu.vector_store %arg5[%c0_12, %c0_13], %26 {strides = array<i32>} : memref<128x96xf32, #tpu.memory_space<vmem>>, vector<128x96xf32>,
    return
  }
  func.func @transform_0(%arg0: i32) -> (i32, i32) {
    %c0_i32 = arith.constant 0 : i32
    %c0_i32_0 = arith.constant 0 : i32
    return %arg0, %c0_i32 : i32, i32
  }
  func.func @transform_1(%arg0: i32) -> (i32, i32) {
    %c0_i32 = arith.constant 0 : i32
    %c0_i32_0 = arith.constant 0 : i32
    %c0_i32_1 = arith.constant 0 : i32
    return %c0_i32, %c0_i32_0 : i32, i32
  }
  func.func @transform_2(%arg0: i32) -> (i32, i32) {
    %c0_i32 = arith.constant 0 : i32
    %c0_i32_0 = arith.constant 0 : i32
    %c0_i32_1 = arith.constant 0 : i32
    return %c0_i32, %c0_i32_0 : i32, i32
  }
  func.func @transform_3(%arg0: i32) -> (i32, i32) {
    %c0_i32 = arith.constant 0 : i32
    %c0_i32_0 = arith.constant 0 : i32
    %c0_i32_1 = arith.constant 0 : i32
    return %c0_i32, %c0_i32_0 : i32, i32
  }
  func.func @transform_4(%arg0: i32) -> (i32, i32) {
    %c0_i32 = arith.constant 0 : i32
    %c0_i32_0 = arith.constant 0 : i32
    return %arg0, %c0_i32 : i32, i32
  }
}

module attributes {stable_mosaic.version = 11 : i64} {
  func.func @_matmul_kernel(%arg0: i32, %arg1: i32, %arg2: i32, %arg3: memref<128x16xf32, #tpu.memory_space<vmem>>, %arg4: memref<16x32xf32, #tpu.memory_space<vmem>>, %arg5: memref<1x32xf32, #tpu.memory_space<vmem>>, %arg6: memref<128x32xf32, #tpu.memory_space<vmem>>, %arg7: memref<128x32xf32, #tpu.memory_space<vmem>>) attributes {dimension_semantics = [#tpu.dimension_semantics<parallel>, #tpu.dimension_semantics<parallel>, #tpu.dimension_semantics<arbitrary>], iteration_bounds = array<i64: 1, 1, 1>, scalar_prefetch = 0 : i64, scratch_operands = 1 : i64, tpu.core_type = #tpu.core_type<tc>, window_params = [{transform_indices = @transform_0, window_bounds = array<i64: 128, 16>}, {transform_indices = @transform_1, window_bounds = array<i64: 16, 32>}, {transform_indices = @transform_2, window_bounds = array<i64: 1, 32>}, {transform_indices = @transform_3, window_bounds = array<i64: 128, 32>}]} {
    %c0_i32 = arith.constant 0 : i32
    %0 = arith.cmpi eq, %arg2, %c0_i32 : i32
    %1 = arith.extui %0 : i1 to i32
    %c0_i32_0 = arith.constant 0 : i32
    %2 = arith.cmpi ne, %1, %c0_i32_0 : i32
    scf.if %2 {
      %cst_10 = arith.constant 0.000000e+00 : f32
      %12 = vector.broadcast %cst_10 : f32 to vector<128x32xf32>
      %c0_11 = arith.constant 0 : index
      %c0_12 = arith.constant 0 : index
      %13 = vector.load %arg7[%c0_11, %c0_12] : memref<128x32xf32, #tpu.memory_space<vmem>>, vector<128x32xf32>
      tpu.vector_store %arg7[%c0_11, %c0_12], %12 {strides = array<i32>} : memref<128x32xf32, #tpu.memory_space<vmem>>, vector<128x32xf32>,
    } else {
    }
    %c0 = arith.constant 0 : index
    %c0_1 = arith.constant 0 : index
    %3 = vector.load %arg7[%c0, %c0_1] : memref<128x32xf32, #tpu.memory_space<vmem>>, vector<128x32xf32>
    %c0_2 = arith.constant 0 : index
    %c0_3 = arith.constant 0 : index
    %4 = vector.load %arg3[%c0_2, %c0_3] : memref<128x16xf32, #tpu.memory_space<vmem>>, vector<128x16xf32>
    %c0_4 = arith.constant 0 : index
    %c0_5 = arith.constant 0 : index
    %5 = vector.load %arg4[%c0_4, %c0_5] : memref<16x32xf32, #tpu.memory_space<vmem>>, vector<16x32xf32>
    %cst = arith.constant dense<0.000000e+00> : vector<128x32xf32>
    %6 = tpu.matmul %4, %5, %cst {dimension_numbers = #tpu.dot_dimension_numbers<[1], [0], [0], [1], [0, 0, 1, 1], [], []>} : vector<128x16xf32>, vector<16x32xf32>, vector<128x32xf32> -> vector<128x32xf32>
    %7 = arith.addf %3, %6 : vector<128x32xf32>
    %c0_6 = arith.constant 0 : index
    %c0_7 = arith.constant 0 : index
    %8 = vector.load %arg7[%c0_6, %c0_7] : memref<128x32xf32, #tpu.memory_space<vmem>>, vector<128x32xf32>
    tpu.vector_store %arg7[%c0_6, %c0_7], %7 {strides = array<i32>} : memref<128x32xf32, #tpu.memory_space<vmem>>, vector<128x32xf32>,
    %c0_i32_8 = arith.constant 0 : i32
    %9 = arith.cmpi eq, %arg2, %c0_i32_8 : i32
    %10 = arith.extui %9 : i1 to i32
    %c0_i32_9 = arith.constant 0 : i32
    %11 = arith.cmpi ne, %10, %c0_i32_9 : i32
    scf.if %11 {
      %c0_10 = arith.constant 0 : index
      %c0_11 = arith.constant 0 : index
      %12 = vector.load %arg7[%c0_10, %c0_11] : memref<128x32xf32, #tpu.memory_space<vmem>>, vector<128x32xf32>
      %c0_12 = arith.constant 0 : index
      %c0_13 = arith.constant 0 : index
      %13 = vector.load %arg5[%c0_12, %c0_13] : memref<1x32xf32, #tpu.memory_space<vmem>>, vector<1x32xf32>
      %14 = vector.broadcast %13 : vector<1x32xf32> to vector<128x32xf32>
      %15 = arith.addf %12, %14 : vector<128x32xf32>
      %c0_14 = arith.constant 0 : index
      %c0_15 = arith.constant 0 : index
      %16 = vector.load %arg6[%c0_14, %c0_15] : memref<128x32xf32, #tpu.memory_space<vmem>>, vector<128x32xf32>
      tpu.vector_store %arg6[%c0_14, %c0_15], %15 {strides = array<i32>} : memref<128x32xf32, #tpu.memory_space<vmem>>, vector<128x32xf32>,
    } else {
    }
    return
  }
  func.func @transform_0(%arg0: i32, %arg1: i32, %arg2: i32) -> (i32, i32) {
    %c0_i32 = arith.constant 0 : i32
    return %arg0, %arg2 : i32, i32
  }
  func.func @transform_1(%arg0: i32, %arg1: i32, %arg2: i32) -> (i32, i32) {
    %c0_i32 = arith.constant 0 : i32
    return %arg2, %arg1 : i32, i32
  }
  func.func @transform_2(%arg0: i32, %arg1: i32, %arg2: i32) -> (i32, i32) {
    %c0_i32 = arith.constant 0 : i32
    %c0_i32_0 = arith.constant 0 : i32
    return %c0_i32, %arg1 : i32, i32
  }
  func.func @transform_3(%arg0: i32, %arg1: i32, %arg2: i32) -> (i32, i32) {
    %c0_i32 = arith.constant 0 : i32
    return %arg0, %arg1 : i32, i32
  }
}

module attributes {stable_mosaic.version = 11 : i64} {
  func.func @_window_attn_kernel(%arg0: i32, %arg1: memref<1x8x16x16xf32, #tpu.memory_space<vmem>>, %arg2: memref<1x8x16x16xf32, #tpu.memory_space<vmem>>, %arg3: memref<1x8x16x16xf32, #tpu.memory_space<vmem>>, %arg4: memref<8x16x16xf32, #tpu.memory_space<vmem>>, %arg5: memref<1x8x16x16xf32, #tpu.memory_space<vmem>>) attributes {dimension_semantics = [#tpu.dimension_semantics<parallel>], iteration_bounds = array<i64: 2>, scalar_prefetch = 0 : i64, scratch_operands = 0 : i64, tpu.core_type = #tpu.core_type<tc>, window_params = [{transform_indices = @transform_0, window_bounds = array<i64: 1, 8, 16, 16>}, {transform_indices = @transform_1, window_bounds = array<i64: 1, 8, 16, 16>}, {transform_indices = @transform_2, window_bounds = array<i64: 1, 8, 16, 16>}, {pipeline_mode = #tpu.pipeline_mode<synchronous>, transform_indices = @transform_3, window_bounds = array<i64: 8, 16, 16>}, {transform_indices = @transform_4, window_bounds = array<i64: 1, 8, 16, 16>}]} {
    %c0 = arith.constant 0 : index
    %c0_0 = arith.constant 0 : index
    %c0_1 = arith.constant 0 : index
    %c0_2 = arith.constant 0 : index
    %0 = vector.load %arg1[%c0, %c0_0, %c0_1, %c0_2] : memref<1x8x16x16xf32, #tpu.memory_space<vmem>>, vector<1x8x16x16xf32>
    %1 = vector.shape_cast %0 : vector<1x8x16x16xf32> to vector<8x16x16xf32>
    %c0_3 = arith.constant 0 : index
    %c0_4 = arith.constant 0 : index
    %c0_5 = arith.constant 0 : index
    %c0_6 = arith.constant 0 : index
    %2 = vector.load %arg2[%c0_3, %c0_4, %c0_5, %c0_6] : memref<1x8x16x16xf32, #tpu.memory_space<vmem>>, vector<1x8x16x16xf32>
    %3 = vector.shape_cast %2 : vector<1x8x16x16xf32> to vector<8x16x16xf32>
    %c0_7 = arith.constant 0 : index
    %c0_8 = arith.constant 0 : index
    %c0_9 = arith.constant 0 : index
    %c0_10 = arith.constant 0 : index
    %4 = vector.load %arg3[%c0_7, %c0_8, %c0_9, %c0_10] : memref<1x8x16x16xf32, #tpu.memory_space<vmem>>, vector<1x8x16x16xf32>
    %5 = vector.shape_cast %4 : vector<1x8x16x16xf32> to vector<8x16x16xf32>
    %c0_11 = arith.constant 0 : index
    %c0_12 = arith.constant 0 : index
    %c0_13 = arith.constant 0 : index
    %6 = vector.load %arg4[%c0_11, %c0_12, %c0_13] : memref<8x16x16xf32, #tpu.memory_space<vmem>>, vector<8x16x16xf32>
    "tpu.trace_start"() <{level = 10 : i32, message = "gqd,gkd->gqk"}> : () -> ()
    %cst = arith.constant dense<0.000000e+00> : vector<8x16x16xf32>
    %7 = tpu.matmul %1, %3, %cst {dimension_numbers = #tpu.dot_dimension_numbers<[2], [2], [1], [1], [0, 0, 0, 1, 1, 1], [0], [0]>} : vector<8x16x16xf32>, vector<8x16x16xf32>, vector<8x16x16xf32> -> vector<8x16x16xf32>
    "tpu.trace_stop"() : () -> ()
    %cst_14 = arith.constant 2.500000e-01 : f32
    %8 = vector.broadcast %cst_14 : f32 to vector<8x16x16xf32>
    %9 = arith.mulf %7, %8 : vector<8x16x16xf32>
    %10 = arith.addf %9, %6 : vector<8x16x16xf32>
    %cst_15 = arith.constant dense<0xFF800000> : vector<8x16xf32>
    %11 = vector.multi_reduction <maximumf>, %10, %cst_15 [2] : vector<8x16x16xf32> to vector<8x16xf32>
    %12 = vector.shape_cast %11 : vector<8x16xf32> to vector<8x16x1xf32>
    %13 = vector.broadcast %12 : vector<8x16x1xf32> to vector<8x16x16xf32>
    %14 = arith.subf %10, %13 : vector<8x16x16xf32>
    %15 = math.exp %14 : vector<8x16x16xf32>
    %cst_16 = arith.constant dense<0.000000e+00> : vector<8x16xf32>
    %16 = vector.multi_reduction <add>, %15, %cst_16 [2] : vector<8x16x16xf32> to vector<8x16xf32>
    %17 = vector.shape_cast %16 : vector<8x16xf32> to vector<8x16x1xf32>
    %18 = tpu.reciprocal %17 {approx = true} : vector<8x16x1xf32> -> vector<8x16x1xf32>
    %19 = vector.broadcast %18 : vector<8x16x1xf32> to vector<8x16x16xf32>
    %20 = arith.mulf %15, %19 : vector<8x16x16xf32>
    "tpu.trace_start"() <{level = 10 : i32, message = "gqk,gkd->gqd"}> : () -> ()
    %cst_17 = arith.constant dense<0.000000e+00> : vector<8x16x16xf32>
    %21 = tpu.matmul %20, %5, %cst_17 {dimension_numbers = #tpu.dot_dimension_numbers<[2], [1], [1], [2], [0, 0, 0, 1, 1, 2], [0], [0]>} : vector<8x16x16xf32>, vector<8x16x16xf32>, vector<8x16x16xf32> -> vector<8x16x16xf32>
    "tpu.trace_stop"() : () -> ()
    %c0_18 = arith.constant 0 : index
    %c0_19 = arith.constant 0 : index
    %c0_20 = arith.constant 0 : index
    %c0_21 = arith.constant 0 : index
    %22 = vector.load %arg5[%c0_18, %c0_19, %c0_20, %c0_21] : memref<1x8x16x16xf32, #tpu.memory_space<vmem>>, vector<1x8x16x16xf32>
    %23 = vector.shape_cast %22 : vector<1x8x16x16xf32> to vector<8x16x16xf32>
    %24 = vector.shape_cast %21 : vector<8x16x16xf32> to vector<1x8x16x16xf32>
    tpu.vector_store %arg5[%c0_18, %c0_19, %c0_20, %c0_21], %24 {strides = array<i32>} : memref<1x8x16x16xf32, #tpu.memory_space<vmem>>, vector<1x8x16x16xf32>,
    return
  }
  func.func @transform_0(%arg0: i32) -> (i32, i32, i32, i32) {
    %c0_i32 = arith.constant 0 : i32
    %c0_i32_0 = arith.constant 0 : i32
    %c0_i32_1 = arith.constant 0 : i32
    %c0_i32_2 = arith.constant 0 : i32
    return %arg0, %c0_i32, %c0_i32_0, %c0_i32_1 : i32, i32, i32, i32
  }
  func.func @transform_1(%arg0: i32) -> (i32, i32, i32, i32) {
    %c0_i32 = arith.constant 0 : i32
    %c0_i32_0 = arith.constant 0 : i32
    %c0_i32_1 = arith.constant 0 : i32
    %c0_i32_2 = arith.constant 0 : i32
    return %arg0, %c0_i32, %c0_i32_0, %c0_i32_1 : i32, i32, i32, i32
  }
  func.func @transform_2(%arg0: i32) -> (i32, i32, i32, i32) {
    %c0_i32 = arith.constant 0 : i32
    %c0_i32_0 = arith.constant 0 : i32
    %c0_i32_1 = arith.constant 0 : i32
    %c0_i32_2 = arith.constant 0 : i32
    return %arg0, %c0_i32, %c0_i32_0, %c0_i32_1 : i32, i32, i32, i32
  }
  func.func @transform_3(%arg0: i32) -> (i32, i32, i32) {
    %c0_i32 = arith.constant 0 : i32
    %c0_i32_0 = arith.constant 0 : i32
    %c0_i32_1 = arith.constant 0 : i32
    %c0_i32_2 = arith.constant 0 : i32
    return %c0_i32, %c0_i32_0, %c0_i32_1 : i32, i32, i32
  }
  func.func @transform_4(%arg0: i32) -> (i32, i32, i32, i32) {
    %c0_i32 = arith.constant 0 : i32
    %c0_i32_0 = arith.constant 0 : i32
    %c0_i32_1 = arith.constant 0 : i32
    %c0_i32_2 = arith.constant 0 : i32
    return %arg0, %c0_i32, %c0_i32_0, %c0_i32_1 : i32, i32, i32, i32
  }
}

module attributes {stable_mosaic.version = 11 : i64} {
  func.func @_matmul_kernel(%arg0: i32, %arg1: i32, %arg2: i32, %arg3: memref<128x32xf32, #tpu.memory_space<vmem>>, %arg4: memref<32x32xf32, #tpu.memory_space<vmem>>, %arg5: memref<1x32xf32, #tpu.memory_space<vmem>>, %arg6: memref<128x32xf32, #tpu.memory_space<vmem>>, %arg7: memref<128x32xf32, #tpu.memory_space<vmem>>, %arg8: memref<128x32xf32, #tpu.memory_space<vmem>>) attributes {dimension_semantics = [#tpu.dimension_semantics<parallel>, #tpu.dimension_semantics<parallel>, #tpu.dimension_semantics<arbitrary>], iteration_bounds = array<i64: 1, 1, 1>, scalar_prefetch = 0 : i64, scratch_operands = 1 : i64, tpu.core_type = #tpu.core_type<tc>, window_params = [{transform_indices = @transform_0, window_bounds = array<i64: 128, 32>}, {transform_indices = @transform_1, window_bounds = array<i64: 32, 32>}, {transform_indices = @transform_2, window_bounds = array<i64: 1, 32>}, {transform_indices = @transform_3, window_bounds = array<i64: 128, 32>}, {transform_indices = @transform_4, window_bounds = array<i64: 128, 32>}]} {
    %c0_i32 = arith.constant 0 : i32
    %0 = arith.cmpi eq, %arg2, %c0_i32 : i32
    %1 = arith.extui %0 : i1 to i32
    %c0_i32_0 = arith.constant 0 : i32
    %2 = arith.cmpi ne, %1, %c0_i32_0 : i32
    scf.if %2 {
      %cst_10 = arith.constant 0.000000e+00 : f32
      %12 = vector.broadcast %cst_10 : f32 to vector<128x32xf32>
      %c0_11 = arith.constant 0 : index
      %c0_12 = arith.constant 0 : index
      %13 = vector.load %arg8[%c0_11, %c0_12] : memref<128x32xf32, #tpu.memory_space<vmem>>, vector<128x32xf32>
      tpu.vector_store %arg8[%c0_11, %c0_12], %12 {strides = array<i32>} : memref<128x32xf32, #tpu.memory_space<vmem>>, vector<128x32xf32>,
    } else {
    }
    %c0 = arith.constant 0 : index
    %c0_1 = arith.constant 0 : index
    %3 = vector.load %arg8[%c0, %c0_1] : memref<128x32xf32, #tpu.memory_space<vmem>>, vector<128x32xf32>
    %c0_2 = arith.constant 0 : index
    %c0_3 = arith.constant 0 : index
    %4 = vector.load %arg3[%c0_2, %c0_3] : memref<128x32xf32, #tpu.memory_space<vmem>>, vector<128x32xf32>
    %c0_4 = arith.constant 0 : index
    %c0_5 = arith.constant 0 : index
    %5 = vector.load %arg4[%c0_4, %c0_5] : memref<32x32xf32, #tpu.memory_space<vmem>>, vector<32x32xf32>
    %cst = arith.constant dense<0.000000e+00> : vector<128x32xf32>
    %6 = tpu.matmul %4, %5, %cst {dimension_numbers = #tpu.dot_dimension_numbers<[1], [0], [0], [1], [0, 0, 1, 1], [], []>} : vector<128x32xf32>, vector<32x32xf32>, vector<128x32xf32> -> vector<128x32xf32>
    %7 = arith.addf %3, %6 : vector<128x32xf32>
    %c0_6 = arith.constant 0 : index
    %c0_7 = arith.constant 0 : index
    %8 = vector.load %arg8[%c0_6, %c0_7] : memref<128x32xf32, #tpu.memory_space<vmem>>, vector<128x32xf32>
    tpu.vector_store %arg8[%c0_6, %c0_7], %7 {strides = array<i32>} : memref<128x32xf32, #tpu.memory_space<vmem>>, vector<128x32xf32>,
    %c0_i32_8 = arith.constant 0 : i32
    %9 = arith.cmpi eq, %arg2, %c0_i32_8 : i32
    %10 = arith.extui %9 : i1 to i32
    %c0_i32_9 = arith.constant 0 : i32
    %11 = arith.cmpi ne, %10, %c0_i32_9 : i32
    scf.if %11 {
      %c0_10 = arith.constant 0 : index
      %c0_11 = arith.constant 0 : index
      %12 = vector.load %arg8[%c0_10, %c0_11] : memref<128x32xf32, #tpu.memory_space<vmem>>, vector<128x32xf32>
      %c0_12 = arith.constant 0 : index
      %c0_13 = arith.constant 0 : index
      %13 = vector.load %arg5[%c0_12, %c0_13] : memref<1x32xf32, #tpu.memory_space<vmem>>, vector<1x32xf32>
      %14 = vector.broadcast %13 : vector<1x32xf32> to vector<128x32xf32>
      %15 = arith.addf %12, %14 : vector<128x32xf32>
      %c0_14 = arith.constant 0 : index
      %c0_15 = arith.constant 0 : index
      %16 = vector.load %arg6[%c0_14, %c0_15] : memref<128x32xf32, #tpu.memory_space<vmem>>, vector<128x32xf32>
      %17 = arith.addf %15, %16 : vector<128x32xf32>
      %c0_16 = arith.constant 0 : index
      %c0_17 = arith.constant 0 : index
      %18 = vector.load %arg7[%c0_16, %c0_17] : memref<128x32xf32, #tpu.memory_space<vmem>>, vector<128x32xf32>
      tpu.vector_store %arg7[%c0_16, %c0_17], %17 {strides = array<i32>} : memref<128x32xf32, #tpu.memory_space<vmem>>, vector<128x32xf32>,
    } else {
    }
    return
  }
  func.func @transform_0(%arg0: i32, %arg1: i32, %arg2: i32) -> (i32, i32) {
    %c0_i32 = arith.constant 0 : i32
    return %arg0, %arg2 : i32, i32
  }
  func.func @transform_1(%arg0: i32, %arg1: i32, %arg2: i32) -> (i32, i32) {
    %c0_i32 = arith.constant 0 : i32
    return %arg2, %arg1 : i32, i32
  }
  func.func @transform_2(%arg0: i32, %arg1: i32, %arg2: i32) -> (i32, i32) {
    %c0_i32 = arith.constant 0 : i32
    %c0_i32_0 = arith.constant 0 : i32
    return %c0_i32, %arg1 : i32, i32
  }
  func.func @transform_3(%arg0: i32, %arg1: i32, %arg2: i32) -> (i32, i32) {
    %c0_i32 = arith.constant 0 : i32
    return %arg0, %arg1 : i32, i32
  }
  func.func @transform_4(%arg0: i32, %arg1: i32, %arg2: i32) -> (i32, i32) {
    %c0_i32 = arith.constant 0 : i32
    return %arg0, %arg1 : i32, i32
  }
}

module attributes {stable_mosaic.version = 11 : i64} {
  func.func @_conv_bn_ln_mm_kernel(%arg0: i32, %arg1: memref<2x10x10x32xf32, #tpu.memory_space<vmem>>, %arg2: memref<3x3x32xf32, #tpu.memory_space<vmem>>, %arg3: memref<1x32xf32, #tpu.memory_space<vmem>>, %arg4: memref<1x32xf32, #tpu.memory_space<vmem>>, %arg5: memref<1x32xf32, #tpu.memory_space<vmem>>, %arg6: memref<1x32xf32, #tpu.memory_space<vmem>>, %arg7: memref<32x128xf32, #tpu.memory_space<vmem>>, %arg8: memref<1x128xf32, #tpu.memory_space<vmem>>, %arg9: memref<2x8x8x32xf32, #tpu.memory_space<vmem>>, %arg10: memref<128x128xf32, #tpu.memory_space<vmem>>) attributes {dimension_semantics = [#tpu.dimension_semantics<arbitrary>], iteration_bounds = array<i64: 1>, scalar_prefetch = 0 : i64, scratch_operands = 0 : i64, tpu.core_type = #tpu.core_type<tc>, window_params = [{pipeline_mode = #tpu.pipeline_mode<synchronous>, transform_indices = @transform_0, window_bounds = array<i64: 2, 10, 10, 32>}, {pipeline_mode = #tpu.pipeline_mode<synchronous>, transform_indices = @transform_1, window_bounds = array<i64: 3, 3, 32>}, {pipeline_mode = #tpu.pipeline_mode<synchronous>, transform_indices = @transform_2, window_bounds = array<i64: 1, 32>}, {pipeline_mode = #tpu.pipeline_mode<synchronous>, transform_indices = @transform_3, window_bounds = array<i64: 1, 32>}, {pipeline_mode = #tpu.pipeline_mode<synchronous>, transform_indices = @transform_4, window_bounds = array<i64: 1, 32>}, {pipeline_mode = #tpu.pipeline_mode<synchronous>, transform_indices = @transform_5, window_bounds = array<i64: 1, 32>}, {pipeline_mode = #tpu.pipeline_mode<synchronous>, transform_indices = @transform_6, window_bounds = array<i64: 32, 128>}, {pipeline_mode = #tpu.pipeline_mode<synchronous>, transform_indices = @transform_7, window_bounds = array<i64: 1, 128>}, {pipeline_mode = #tpu.pipeline_mode<synchronous>, transform_indices = @transform_8, window_bounds = array<i64: 2, 8, 8, 32>}, {pipeline_mode = #tpu.pipeline_mode<synchronous>, transform_indices = @transform_9, window_bounds = array<i64: 128, 128>}]} {
    %c0 = arith.constant 0 : index
    %c0_0 = arith.constant 0 : index
    %c0_1 = arith.constant 0 : index
    %c0_2 = arith.constant 0 : index
    %0 = vector.load %arg1[%c0, %c0_0, %c0_1, %c0_2] : memref<2x10x10x32xf32, #tpu.memory_space<vmem>>, vector<2x10x10x32xf32>
    %c0_3 = arith.constant 0 : index
    %c0_4 = arith.constant 0 : index
    %c0_5 = arith.constant 0 : index
    %1 = vector.load %arg2[%c0_3, %c0_4, %c0_5] : memref<3x3x32xf32, #tpu.memory_space<vmem>>, vector<3x3x32xf32>
    %cst = arith.constant 0.000000e+00 : f32
    %2 = vector.broadcast %cst : f32 to vector<2x8x8x32xf32>
    %3 = vector.extract_strided_slice %0 {offsets = [0, 0, 0, 0], sizes = [2, 8, 8, 32], strides = [1, 1, 1, 1]} : vector<2x10x10x32xf32> to vector<2x8x8x32xf32>
    %4 = vector.extract_strided_slice %1 {offsets = [0, 0, 0], sizes = [1, 1, 32], strides = [1, 1, 1]} : vector<3x3x32xf32> to vector<1x1x32xf32>
    %5 = vector.shape_cast %4 : vector<1x1x32xf32> to vector<32xf32>
    %6 = vector.shape_cast %5 : vector<32xf32> to vector<1x1x1x32xf32>
    %7 = vector.broadcast %6 : vector<1x1x1x32xf32> to vector<2x8x8x32xf32>
    %8 = arith.mulf %3, %7 : vector<2x8x8x32xf32>
    %9 = arith.addf %2, %8 : vector<2x8x8x32xf32>
    %10 = vector.extract_strided_slice %0 {offsets = [0, 0, 1, 0], sizes = [2, 8, 8, 32], strides = [1, 1, 1, 1]} : vector<2x10x10x32xf32> to vector<2x8x8x32xf32>
    %11 = vector.extract_strided_slice %1 {offsets = [0, 1, 0], sizes = [1, 1, 32], strides = [1, 1, 1]} : vector<3x3x32xf32> to vector<1x1x32xf32>
    %12 = vector.shape_cast %11 : vector<1x1x32xf32> to vector<32xf32>
    %13 = vector.shape_cast %12 : vector<32xf32> to vector<1x1x1x32xf32>
    %14 = vector.broadcast %13 : vector<1x1x1x32xf32> to vector<2x8x8x32xf32>
    %15 = arith.mulf %10, %14 : vector<2x8x8x32xf32>
    %16 = arith.addf %9, %15 : vector<2x8x8x32xf32>
    %17 = vector.extract_strided_slice %0 {offsets = [0, 0, 2, 0], sizes = [2, 8, 8, 32], strides = [1, 1, 1, 1]} : vector<2x10x10x32xf32> to vector<2x8x8x32xf32>
    %18 = vector.extract_strided_slice %1 {offsets = [0, 2, 0], sizes = [1, 1, 32], strides = [1, 1, 1]} : vector<3x3x32xf32> to vector<1x1x32xf32>
    %19 = vector.shape_cast %18 : vector<1x1x32xf32> to vector<32xf32>
    %20 = vector.shape_cast %19 : vector<32xf32> to vector<1x1x1x32xf32>
    %21 = vector.broadcast %20 : vector<1x1x1x32xf32> to vector<2x8x8x32xf32>
    %22 = arith.mulf %17, %21 : vector<2x8x8x32xf32>
    %23 = arith.addf %16, %22 : vector<2x8x8x32xf32>
    %24 = vector.extract_strided_slice %0 {offsets = [0, 1, 0, 0], sizes = [2, 8, 8, 32], strides = [1, 1, 1, 1]} : vector<2x10x10x32xf32> to vector<2x8x8x32xf32>
    %25 = vector.extract_strided_slice %1 {offsets = [1, 0, 0], sizes = [1, 1, 32], strides = [1, 1, 1]} : vector<3x3x32xf32> to vector<1x1x32xf32>
    %26 = vector.shape_cast %25 : vector<1x1x32xf32> to vector<32xf32>
    %27 = vector.shape_cast %26 : vector<32xf32> to vector<1x1x1x32xf32>
    %28 = vector.broadcast %27 : vector<1x1x1x32xf32> to vector<2x8x8x32xf32>
    %29 = arith.mulf %24, %28 : vector<2x8x8x32xf32>
    %30 = arith.addf %23, %29 : vector<2x8x8x32xf32>
    %31 = vector.extract_strided_slice %0 {offsets = [0, 1, 1, 0], sizes = [2, 8, 8, 32], strides = [1, 1, 1, 1]} : vector<2x10x10x32xf32> to vector<2x8x8x32xf32>
    %32 = vector.extract_strided_slice %1 {offsets = [1, 1, 0], sizes = [1, 1, 32], strides = [1, 1, 1]} : vector<3x3x32xf32> to vector<1x1x32xf32>
    %33 = vector.shape_cast %32 : vector<1x1x32xf32> to vector<32xf32>
    %34 = vector.shape_cast %33 : vector<32xf32> to vector<1x1x1x32xf32>
    %35 = vector.broadcast %34 : vector<1x1x1x32xf32> to vector<2x8x8x32xf32>
    %36 = arith.mulf %31, %35 : vector<2x8x8x32xf32>
    %37 = arith.addf %30, %36 : vector<2x8x8x32xf32>
    %38 = vector.extract_strided_slice %0 {offsets = [0, 1, 2, 0], sizes = [2, 8, 8, 32], strides = [1, 1, 1, 1]} : vector<2x10x10x32xf32> to vector<2x8x8x32xf32>
    %39 = vector.extract_strided_slice %1 {offsets = [1, 2, 0], sizes = [1, 1, 32], strides = [1, 1, 1]} : vector<3x3x32xf32> to vector<1x1x32xf32>
    %40 = vector.shape_cast %39 : vector<1x1x32xf32> to vector<32xf32>
    %41 = vector.shape_cast %40 : vector<32xf32> to vector<1x1x1x32xf32>
    %42 = vector.broadcast %41 : vector<1x1x1x32xf32> to vector<2x8x8x32xf32>
    %43 = arith.mulf %38, %42 : vector<2x8x8x32xf32>
    %44 = arith.addf %37, %43 : vector<2x8x8x32xf32>
    %45 = vector.extract_strided_slice %0 {offsets = [0, 2, 0, 0], sizes = [2, 8, 8, 32], strides = [1, 1, 1, 1]} : vector<2x10x10x32xf32> to vector<2x8x8x32xf32>
    %46 = vector.extract_strided_slice %1 {offsets = [2, 0, 0], sizes = [1, 1, 32], strides = [1, 1, 1]} : vector<3x3x32xf32> to vector<1x1x32xf32>
    %47 = vector.shape_cast %46 : vector<1x1x32xf32> to vector<32xf32>
    %48 = vector.shape_cast %47 : vector<32xf32> to vector<1x1x1x32xf32>
    %49 = vector.broadcast %48 : vector<1x1x1x32xf32> to vector<2x8x8x32xf32>
    %50 = arith.mulf %45, %49 : vector<2x8x8x32xf32>
    %51 = arith.addf %44, %50 : vector<2x8x8x32xf32>
    %52 = vector.extract_strided_slice %0 {offsets = [0, 2, 1, 0], sizes = [2, 8, 8, 32], strides = [1, 1, 1, 1]} : vector<2x10x10x32xf32> to vector<2x8x8x32xf32>
    %53 = vector.extract_strided_slice %1 {offsets = [2, 1, 0], sizes = [1, 1, 32], strides = [1, 1, 1]} : vector<3x3x32xf32> to vector<1x1x32xf32>
    %54 = vector.shape_cast %53 : vector<1x1x32xf32> to vector<32xf32>
    %55 = vector.shape_cast %54 : vector<32xf32> to vector<1x1x1x32xf32>
    %56 = vector.broadcast %55 : vector<1x1x1x32xf32> to vector<2x8x8x32xf32>
    %57 = arith.mulf %52, %56 : vector<2x8x8x32xf32>
    %58 = arith.addf %51, %57 : vector<2x8x8x32xf32>
    %59 = vector.extract_strided_slice %0 {offsets = [0, 2, 2, 0], sizes = [2, 8, 8, 32], strides = [1, 1, 1, 1]} : vector<2x10x10x32xf32> to vector<2x8x8x32xf32>
    %60 = vector.extract_strided_slice %1 {offsets = [2, 2, 0], sizes = [1, 1, 32], strides = [1, 1, 1]} : vector<3x3x32xf32> to vector<1x1x32xf32>
    %61 = vector.shape_cast %60 : vector<1x1x32xf32> to vector<32xf32>
    %62 = vector.shape_cast %61 : vector<32xf32> to vector<1x1x1x32xf32>
    %63 = vector.broadcast %62 : vector<1x1x1x32xf32> to vector<2x8x8x32xf32>
    %64 = arith.mulf %59, %63 : vector<2x8x8x32xf32>
    %65 = arith.addf %58, %64 : vector<2x8x8x32xf32>
    %66 = vector.shape_cast %65 : vector<2x8x8x32xf32> to vector<128x32xf32>
    %cst_6 = arith.constant dense<0.000000e+00> : vector<32xf32>
    %67 = vector.multi_reduction <add>, %66, %cst_6 [0] : vector<128x32xf32> to vector<32xf32>
    %68 = vector.shape_cast %67 : vector<32xf32> to vector<1x32xf32>
    %cst_7 = arith.constant 1.280000e+02 : f32
    %69 = vector.broadcast %cst_7 : f32 to vector<1x32xf32>
    %70 = arith.divf %68, %69 : vector<1x32xf32>
    %71 = vector.broadcast %70 : vector<1x32xf32> to vector<128x32xf32>
    %72 = arith.subf %66, %71 : vector<128x32xf32>
    %73 = arith.mulf %72, %72 : vector<128x32xf32>
    %cst_8 = arith.constant dense<0.000000e+00> : vector<32xf32>
    %74 = vector.multi_reduction <add>, %73, %cst_8 [0] : vector<128x32xf32> to vector<32xf32>
    %75 = vector.shape_cast %74 : vector<32xf32> to vector<1x32xf32>
    %cst_9 = arith.constant 1.280000e+02 : f32
    %76 = vector.broadcast %cst_9 : f32 to vector<1x32xf32>
    %77 = arith.divf %75, %76 : vector<1x32xf32>
    %78 = vector.broadcast %70 : vector<1x32xf32> to vector<128x32xf32>
    %79 = arith.subf %66, %78 : vector<128x32xf32>
    %cst_10 = arith.constant 9.99999974E-6 : f32
    %80 = vector.broadcast %cst_10 : f32 to vector<1x32xf32>
    %81 = arith.addf %77, %80 : vector<1x32xf32>
    %82 = math.rsqrt %81 : vector<1x32xf32>
    %83 = vector.broadcast %82 : vector<1x32xf32> to vector<128x32xf32>
    %84 = arith.mulf %79, %83 : vector<128x32xf32>
    %c0_11 = arith.constant 0 : index
    %c0_12 = arith.constant 0 : index
    %85 = vector.load %arg3[%c0_11, %c0_12] : memref<1x32xf32, #tpu.memory_space<vmem>>, vector<1x32xf32>
    %86 = vector.broadcast %85 : vector<1x32xf32> to vector<128x32xf32>
    %87 = arith.mulf %84, %86 : vector<128x32xf32>
    %c0_13 = arith.constant 0 : index
    %c0_14 = arith.constant 0 : index
    %88 = vector.load %arg4[%c0_13, %c0_14] : memref<1x32xf32, #tpu.memory_space<vmem>>, vector<1x32xf32>
    %89 = vector.broadcast %88 : vector<1x32xf32> to vector<128x32xf32>
    %90 = arith.addf %87, %89 : vector<128x32xf32>
    %91 = vector.shape_cast %90 : vector<128x32xf32> to vector<2x8x8x32xf32>
    %c0_15 = arith.constant 0 : index
    %c0_16 = arith.constant 0 : index
    %c0_17 = arith.constant 0 : index
    %c0_18 = arith.constant 0 : index
    %92 = vector.load %arg9[%c0_15, %c0_16, %c0_17, %c0_18] : memref<2x8x8x32xf32, #tpu.memory_space<vmem>>, vector<2x8x8x32xf32>
    tpu.vector_store %arg9[%c0_15, %c0_16, %c0_17, %c0_18], %91 {strides = array<i32>} : memref<2x8x8x32xf32, #tpu.memory_space<vmem>>, vector<2x8x8x32xf32>,
    %cst_19 = arith.constant dense<0.000000e+00> : vector<128xf32>
    %93 = vector.multi_reduction <add>, %90, %cst_19 [1] : vector<128x32xf32> to vector<128xf32>
    %94 = vector.shape_cast %93 : vector<128xf32> to vector<128x1xf32>
    %cst_20 = arith.constant 3.200000e+01 : f32
    %95 = vector.broadcast %cst_20 : f32 to vector<128x1xf32>
    %96 = arith.divf %94, %95 : vector<128x1xf32>
    %97 = vector.broadcast %96 : vector<128x1xf32> to vector<128x32xf32>
    %98 = arith.subf %90, %97 : vector<128x32xf32>
    %99 = arith.mulf %98, %98 : vector<128x32xf32>
    %cst_21 = arith.constant dense<0.000000e+00> : vector<128xf32>
    %100 = vector.multi_reduction <add>, %99, %cst_21 [1] : vector<128x32xf32> to vector<128xf32>
    %101 = vector.shape_cast %100 : vector<128xf32> to vector<128x1xf32>
    %cst_22 = arith.constant 3.200000e+01 : f32
    %102 = vector.broadcast %cst_22 : f32 to vector<128x1xf32>
    %103 = arith.divf %101, %102 : vector<128x1xf32>
    %104 = vector.broadcast %96 : vector<128x1xf32> to vector<128x32xf32>
    %105 = arith.subf %90, %104 : vector<128x32xf32>
    %cst_23 = arith.constant 9.99999974E-6 : f32
    %106 = vector.broadcast %cst_23 : f32 to vector<128x1xf32>
    %107 = arith.addf %103, %106 : vector<128x1xf32>
    %108 = math.rsqrt %107 : vector<128x1xf32>
    %109 = vector.broadcast %108 : vector<128x1xf32> to vector<128x32xf32>
    %110 = arith.mulf %105, %109 : vector<128x32xf32>
    %c0_24 = arith.constant 0 : index
    %c0_25 = arith.constant 0 : index
    %111 = vector.load %arg5[%c0_24, %c0_25] : memref<1x32xf32, #tpu.memory_space<vmem>>, vector<1x32xf32>
    %112 = vector.broadcast %111 : vector<1x32xf32> to vector<128x32xf32>
    %113 = arith.mulf %110, %112 : vector<128x32xf32>
    %c0_26 = arith.constant 0 : index
    %c0_27 = arith.constant 0 : index
    %114 = vector.load %arg6[%c0_26, %c0_27] : memref<1x32xf32, #tpu.memory_space<vmem>>, vector<1x32xf32>
    %115 = vector.broadcast %114 : vector<1x32xf32> to vector<128x32xf32>
    %116 = arith.addf %113, %115 : vector<128x32xf32>
    %c0_28 = arith.constant 0 : index
    %c0_29 = arith.constant 0 : index
    %117 = vector.load %arg7[%c0_28, %c0_29] : memref<32x128xf32, #tpu.memory_space<vmem>>, vector<32x128xf32>
    %cst_30 = arith.constant dense<0.000000e+00> : vector<128x128xf32>
    %118 = tpu.matmul %116, %117, %cst_30 {dimension_numbers = #tpu.dot_dimension_numbers<[1], [0], [0], [1], [0, 0, 1, 1], [], []>} : vector<128x32xf32>, vector<32x128xf32>, vector<128x128xf32> -> vector<128x128xf32>
    %c0_31 = arith.constant 0 : index
    %c0_32 = arith.constant 0 : index
    %119 = vector.load %arg8[%c0_31, %c0_32] : memref<1x128xf32, #tpu.memory_space<vmem>>, vector<1x128xf32>
    %120 = vector.broadcast %119 : vector<1x128xf32> to vector<128x128xf32>
    %121 = arith.addf %118, %120 : vector<128x128xf32>
    %c0_33 = arith.constant 0 : index
    %c0_34 = arith.constant 0 : index
    %122 = vector.load %arg10[%c0_33, %c0_34] : memref<128x128xf32, #tpu.memory_space<vmem>>, vector<128x128xf32>
    tpu.vector_store %arg10[%c0_33, %c0_34], %121 {strides = array<i32>} : memref<128x128xf32, #tpu.memory_space<vmem>>, vector<128x128xf32>,
    return
  }
  func.func @transform_0(%arg0: i32) -> (i32, i32, i32, i32) {
    %c0_i32 = arith.constant 0 : i32
    %c0_i32_0 = arith.constant 0 : i32
    %c0_i32_1 = arith.constant 0 : i32
    %c0_i32_2 = arith.constant 0 : i32
    %c0_i32_3 = arith.constant 0 : i32
    return %c0_i32, %c0_i32_0, %c0_i32_1, %c0_i32_2 : i32, i32, i32, i32
  }
  func.func @transform_1(%arg0: i32) -> (i32, i32, i32) {
    %c0_i32 = arith.constant 0 : i32
    %c0_i32_0 = arith.constant 0 : i32
    %c0_i32_1 = arith.constant 0 : i32
    %c0_i32_2 = arith.constant 0 : i32
    return %c0_i32, %c0_i32_0, %c0_i32_1 : i32, i32, i32
  }
  func.func @transform_2(%arg0: i32) -> (i32, i32) {
    %c0_i32 = arith.constant 0 : i32
    %c0_i32_0 = arith.constant 0 : i32
    %c0_i32_1 = arith.constant 0 : i32
    return %c0_i32, %c0_i32_0 : i32, i32
  }
  func.func @transform_3(%arg0: i32) -> (i32, i32) {
    %c0_i32 = arith.constant 0 : i32
    %c0_i32_0 = arith.constant 0 : i32
    %c0_i32_1 = arith.constant 0 : i32
    return %c0_i32, %c0_i32_0 : i32, i32
  }
  func.func @transform_4(%arg0: i32) -> (i32, i32) {
    %c0_i32 = arith.constant 0 : i32
    %c0_i32_0 = arith.constant 0 : i32
    %c0_i32_1 = arith.constant 0 : i32
    return %c0_i32, %c0_i32_0 : i32, i32
  }
  func.func @transform_5(%arg0: i32) -> (i32, i32) {
    %c0_i32 = arith.constant 0 : i32
    %c0_i32_0 = arith.constant 0 : i32
    %c0_i32_1 = arith.constant 0 : i32
    return %c0_i32, %c0_i32_0 : i32, i32
  }
  func.func @transform_6(%arg0: i32) -> (i32, i32) {
    %c0_i32 = arith.constant 0 : i32
    %c0_i32_0 = arith.constant 0 : i32
    %c0_i32_1 = arith.constant 0 : i32
    return %c0_i32, %c0_i32_0 : i32, i32
  }
  func.func @transform_7(%arg0: i32) -> (i32, i32) {
    %c0_i32 = arith.constant 0 : i32
    %c0_i32_0 = arith.constant 0 : i32
    %c0_i32_1 = arith.constant 0 : i32
    return %c0_i32, %c0_i32_0 : i32, i32
  }
  func.func @transform_8(%arg0: i32) -> (i32, i32, i32, i32) {
    %c0_i32 = arith.constant 0 : i32
    %c0_i32_0 = arith.constant 0 : i32
    %c0_i32_1 = arith.constant 0 : i32
    %c0_i32_2 = arith.constant 0 : i32
    %c0_i32_3 = arith.constant 0 : i32
    return %c0_i32, %c0_i32_0, %c0_i32_1, %c0_i32_2 : i32, i32, i32, i32
  }
  func.func @transform_9(%arg0: i32) -> (i32, i32) {
    %c0_i32 = arith.constant 0 : i32
    %c0_i32_0 = arith.constant 0 : i32
    %c0_i32_1 = arith.constant 0 : i32
    return %c0_i32, %c0_i32_0 : i32, i32
  }
}

module attributes {stable_mosaic.version = 11 : i64} {
  func.func @_matmul_kernel(%arg0: i32, %arg1: i32, %arg2: i32, %arg3: memref<128x128xf32, #tpu.memory_space<vmem>>, %arg4: memref<128x32xf32, #tpu.memory_space<vmem>>, %arg5: memref<1x32xf32, #tpu.memory_space<vmem>>, %arg6: memref<128x32xf32, #tpu.memory_space<vmem>>, %arg7: memref<128x32xf32, #tpu.memory_space<vmem>>, %arg8: memref<128x32xf32, #tpu.memory_space<vmem>>) attributes {dimension_semantics = [#tpu.dimension_semantics<parallel>, #tpu.dimension_semantics<parallel>, #tpu.dimension_semantics<arbitrary>], iteration_bounds = array<i64: 1, 1, 1>, scalar_prefetch = 0 : i64, scratch_operands = 1 : i64, tpu.core_type = #tpu.core_type<tc>, window_params = [{transform_indices = @transform_0, window_bounds = array<i64: 128, 128>}, {transform_indices = @transform_1, window_bounds = array<i64: 128, 32>}, {transform_indices = @transform_2, window_bounds = array<i64: 1, 32>}, {transform_indices = @transform_3, window_bounds = array<i64: 128, 32>}, {transform_indices = @transform_4, window_bounds = array<i64: 128, 32>}]} {
    %c0_i32 = arith.constant 0 : i32
    %0 = arith.cmpi eq, %arg2, %c0_i32 : i32
    %1 = arith.extui %0 : i1 to i32
    %c0_i32_0 = arith.constant 0 : i32
    %2 = arith.cmpi ne, %1, %c0_i32_0 : i32
    scf.if %2 {
      %cst_10 = arith.constant 0.000000e+00 : f32
      %12 = vector.broadcast %cst_10 : f32 to vector<128x32xf32>
      %c0_11 = arith.constant 0 : index
      %c0_12 = arith.constant 0 : index
      %13 = vector.load %arg8[%c0_11, %c0_12] : memref<128x32xf32, #tpu.memory_space<vmem>>, vector<128x32xf32>
      tpu.vector_store %arg8[%c0_11, %c0_12], %12 {strides = array<i32>} : memref<128x32xf32, #tpu.memory_space<vmem>>, vector<128x32xf32>,
    } else {
    }
    %c0 = arith.constant 0 : index
    %c0_1 = arith.constant 0 : index
    %3 = vector.load %arg8[%c0, %c0_1] : memref<128x32xf32, #tpu.memory_space<vmem>>, vector<128x32xf32>
    %c0_2 = arith.constant 0 : index
    %c0_3 = arith.constant 0 : index
    %4 = vector.load %arg3[%c0_2, %c0_3] : memref<128x128xf32, #tpu.memory_space<vmem>>, vector<128x128xf32>
    %c0_4 = arith.constant 0 : index
    %c0_5 = arith.constant 0 : index
    %5 = vector.load %arg4[%c0_4, %c0_5] : memref<128x32xf32, #tpu.memory_space<vmem>>, vector<128x32xf32>
    %cst = arith.constant dense<0.000000e+00> : vector<128x32xf32>
    %6 = tpu.matmul %4, %5, %cst {dimension_numbers = #tpu.dot_dimension_numbers<[1], [0], [0], [1], [0, 0, 1, 1], [], []>} : vector<128x128xf32>, vector<128x32xf32>, vector<128x32xf32> -> vector<128x32xf32>
    %7 = arith.addf %3, %6 : vector<128x32xf32>
    %c0_6 = arith.constant 0 : index
    %c0_7 = arith.constant 0 : index
    %8 = vector.load %arg8[%c0_6, %c0_7] : memref<128x32xf32, #tpu.memory_space<vmem>>, vector<128x32xf32>
    tpu.vector_store %arg8[%c0_6, %c0_7], %7 {strides = array<i32>} : memref<128x32xf32, #tpu.memory_space<vmem>>, vector<128x32xf32>,
    %c0_i32_8 = arith.constant 0 : i32
    %9 = arith.cmpi eq, %arg2, %c0_i32_8 : i32
    %10 = arith.extui %9 : i1 to i32
    %c0_i32_9 = arith.constant 0 : i32
    %11 = arith.cmpi ne, %10, %c0_i32_9 : i32
    scf.if %11 {
      %c0_10 = arith.constant 0 : index
      %c0_11 = arith.constant 0 : index
      %12 = vector.load %arg8[%c0_10, %c0_11] : memref<128x32xf32, #tpu.memory_space<vmem>>, vector<128x32xf32>
      %c0_12 = arith.constant 0 : index
      %c0_13 = arith.constant 0 : index
      %13 = vector.load %arg5[%c0_12, %c0_13] : memref<1x32xf32, #tpu.memory_space<vmem>>, vector<1x32xf32>
      %14 = vector.broadcast %13 : vector<1x32xf32> to vector<128x32xf32>
      %15 = arith.addf %12, %14 : vector<128x32xf32>
      %c0_14 = arith.constant 0 : index
      %c0_15 = arith.constant 0 : index
      %16 = vector.load %arg6[%c0_14, %c0_15] : memref<128x32xf32, #tpu.memory_space<vmem>>, vector<128x32xf32>
      %17 = arith.addf %15, %16 : vector<128x32xf32>
      %c0_16 = arith.constant 0 : index
      %c0_17 = arith.constant 0 : index
      %18 = vector.load %arg7[%c0_16, %c0_17] : memref<128x32xf32, #tpu.memory_space<vmem>>, vector<128x32xf32>
      tpu.vector_store %arg7[%c0_16, %c0_17], %17 {strides = array<i32>} : memref<128x32xf32, #tpu.memory_space<vmem>>, vector<128x32xf32>,
    } else {
    }
    return
  }
  func.func @transform_0(%arg0: i32, %arg1: i32, %arg2: i32) -> (i32, i32) {
    %c0_i32 = arith.constant 0 : i32
    return %arg0, %arg2 : i32, i32
  }
  func.func @transform_1(%arg0: i32, %arg1: i32, %arg2: i32) -> (i32, i32) {
    %c0_i32 = arith.constant 0 : i32
    return %arg2, %arg1 : i32, i32
  }
  func.func @transform_2(%arg0: i32, %arg1: i32, %arg2: i32) -> (i32, i32) {
    %c0_i32 = arith.constant 0 : i32
    %c0_i32_0 = arith.constant 0 : i32
    return %c0_i32, %arg1 : i32, i32
  }
  func.func @transform_3(%arg0: i32, %arg1: i32, %arg2: i32) -> (i32, i32) {
    %c0_i32 = arith.constant 0 : i32
    return %arg0, %arg1 : i32, i32
  }
  func.func @transform_4(%arg0: i32, %arg1: i32, %arg2: i32) -> (i32, i32) {
    %c0_i32 = arith.constant 0 : i32
    return %arg0, %arg1 : i32, i32
  }
}

module attributes {stable_mosaic.version = 11 : i64} {
  func.func @_matmul_kernel(%arg0: i32, %arg1: i32, %arg2: i32, %arg3: memref<128x128xf32, #tpu.memory_space<vmem>>, %arg4: memref<128x32xf32, #tpu.memory_space<vmem>>, %arg5: memref<1x32xf32, #tpu.memory_space<vmem>>, %arg6: memref<128x32xf32, #tpu.memory_space<vmem>>, %arg7: memref<128x32xf32, #tpu.memory_space<vmem>>, %arg8: memref<128x32xf32, #tpu.memory_space<vmem>>) attributes {dimension_semantics = [#tpu.dimension_semantics<parallel>, #tpu.dimension_semantics<parallel>, #tpu.dimension_semantics<arbitrary>], iteration_bounds = array<i64: 1, 1, 1>, scalar_prefetch = 0 : i64, scratch_operands = 1 : i64, tpu.core_type = #tpu.core_type<tc>, window_params = [{transform_indices = @transform_0, window_bounds = array<i64: 128, 128>}, {transform_indices = @transform_1, window_bounds = array<i64: 128, 32>}, {transform_indices = @transform_2, window_bounds = array<i64: 1, 32>}, {transform_indices = @transform_3, window_bounds = array<i64: 128, 32>}, {transform_indices = @transform_4, window_bounds = array<i64: 128, 32>}]} {
    %c0_i32 = arith.constant 0 : i32
    %0 = arith.cmpi eq, %arg2, %c0_i32 : i32
    %1 = arith.extui %0 : i1 to i32
    %c0_i32_0 = arith.constant 0 : i32
    %2 = arith.cmpi ne, %1, %c0_i32_0 : i32
    scf.if %2 {
      %cst_10 = arith.constant 0.000000e+00 : f32
      %12 = vector.broadcast %cst_10 : f32 to vector<128x32xf32>
      %c0_11 = arith.constant 0 : index
      %c0_12 = arith.constant 0 : index
      %13 = vector.load %arg8[%c0_11, %c0_12] : memref<128x32xf32, #tpu.memory_space<vmem>>, vector<128x32xf32>
      tpu.vector_store %arg8[%c0_11, %c0_12], %12 {strides = array<i32>} : memref<128x32xf32, #tpu.memory_space<vmem>>, vector<128x32xf32>,
    } else {
    }
    %c0 = arith.constant 0 : index
    %c0_1 = arith.constant 0 : index
    %3 = vector.load %arg8[%c0, %c0_1] : memref<128x32xf32, #tpu.memory_space<vmem>>, vector<128x32xf32>
    %c0_2 = arith.constant 0 : index
    %c0_3 = arith.constant 0 : index
    %4 = vector.load %arg3[%c0_2, %c0_3] : memref<128x128xf32, #tpu.memory_space<vmem>>, vector<128x128xf32>
    %c0_4 = arith.constant 0 : index
    %c0_5 = arith.constant 0 : index
    %5 = vector.load %arg4[%c0_4, %c0_5] : memref<128x32xf32, #tpu.memory_space<vmem>>, vector<128x32xf32>
    %cst = arith.constant dense<0.000000e+00> : vector<128x32xf32>
    %6 = tpu.matmul %4, %5, %cst {dimension_numbers = #tpu.dot_dimension_numbers<[1], [0], [0], [1], [0, 0, 1, 1], [], []>} : vector<128x128xf32>, vector<128x32xf32>, vector<128x32xf32> -> vector<128x32xf32>
    %7 = arith.addf %3, %6 : vector<128x32xf32>
    %c0_6 = arith.constant 0 : index
    %c0_7 = arith.constant 0 : index
    %8 = vector.load %arg8[%c0_6, %c0_7] : memref<128x32xf32, #tpu.memory_space<vmem>>, vector<128x32xf32>
    tpu.vector_store %arg8[%c0_6, %c0_7], %7 {strides = array<i32>} : memref<128x32xf32, #tpu.memory_space<vmem>>, vector<128x32xf32>,
    %c0_i32_8 = arith.constant 0 : i32
    %9 = arith.cmpi eq, %arg2, %c0_i32_8 : i32
    %10 = arith.extui %9 : i1 to i32
    %c0_i32_9 = arith.constant 0 : i32
    %11 = arith.cmpi ne, %10, %c0_i32_9 : i32
    scf.if %11 {
      %c0_10 = arith.constant 0 : index
      %c0_11 = arith.constant 0 : index
      %12 = vector.load %arg8[%c0_10, %c0_11] : memref<128x32xf32, #tpu.memory_space<vmem>>, vector<128x32xf32>
      %c0_12 = arith.constant 0 : index
      %c0_13 = arith.constant 0 : index
      %13 = vector.load %arg5[%c0_12, %c0_13] : memref<1x32xf32, #tpu.memory_space<vmem>>, vector<1x32xf32>
      %14 = vector.broadcast %13 : vector<1x32xf32> to vector<128x32xf32>
      %15 = arith.addf %12, %14 : vector<128x32xf32>
      %c0_14 = arith.constant 0 : index
      %c0_15 = arith.constant 0 : index
      %16 = vector.load %arg6[%c0_14, %c0_15] : memref<128x32xf32, #tpu.memory_space<vmem>>, vector<128x32xf32>
      %17 = arith.addf %15, %16 : vector<128x32xf32>
      %c0_16 = arith.constant 0 : index
      %c0_17 = arith.constant 0 : index
      %18 = vector.load %arg7[%c0_16, %c0_17] : memref<128x32xf32, #tpu.memory_space<vmem>>, vector<128x32xf32>
      tpu.vector_store %arg7[%c0_16, %c0_17], %17 {strides = array<i32>} : memref<128x32xf32, #tpu.memory_space<vmem>>, vector<128x32xf32>,
    } else {
    }
    return
  }
  func.func @transform_0(%arg0: i32, %arg1: i32, %arg2: i32) -> (i32, i32) {
    %c0_i32 = arith.constant 0 : i32
    return %arg0, %arg2 : i32, i32
  }
  func.func @transform_1(%arg0: i32, %arg1: i32, %arg2: i32) -> (i32, i32) {
    %c0_i32 = arith.constant 0 : i32
    return %arg2, %arg1 : i32, i32
  }
  func.func @transform_2(%arg0: i32, %arg1: i32, %arg2: i32) -> (i32, i32) {
    %c0_i32 = arith.constant 0 : i32
    %c0_i32_0 = arith.constant 0 : i32
    return %c0_i32, %arg1 : i32, i32
  }
  func.func @transform_3(%arg0: i32, %arg1: i32, %arg2: i32) -> (i32, i32) {
    %c0_i32 = arith.constant 0 : i32
    return %arg0, %arg1 : i32, i32
  }
  func.func @transform_4(%arg0: i32, %arg1: i32, %arg2: i32) -> (i32, i32) {
    %c0_i32 = arith.constant 0 : i32
    return %arg0, %arg1 : i32, i32
  }
}

</mosaic_0001>

<bundles_post_ra>
// kernel: _lambda_.11
= control target key start
LH: loop header
LB: loop body
LE: loop exit
PB: predicated region body
PF: predicated region fallthrough
CT: control target
= control target key end

     0   :  { %vm69_vm0 = vcmask 130048   ;;  %vm18_vm1 = vcmask 261120   ;;  %v428_v3 = vmov 0.0   ;;  %s636_s1 = inlined_call_operand.vmem [shape: f32[16,32], index: 1, kind: input, shape index: {}]   ;;  %s637_s0 = inlined_call_operand.vmem [shape: f32[128,16], index: 0, kind: input, shape index: {}]   ;;  %s638_s2 = inlined_call_operand.vmem [shape: f32[1,32], index: 2, kind: input, shape index: {}]   ;;  %s639_s3 = inlined_call_operand.vmem [shape: f32[128,32], index: 3, kind: output, shape index: {}]  }
   0x1   :  { %v67_v0 = vld [vmem:[%s636_s1] sm:$0xff]  ;;  %v68_v1 = vld [vmem:[%s636_s1 + $0x8] sm:$0xff]  ;;  %20 = vst.msk [vmem:[#allocation2 + $0x8] sm:$0xff] %vm18_vm1, %v428_v3  ;;  %19 = vst.msk [vmem:[#allocation2] sm:$0xff] %vm18_vm1, %v428_v3 }
   0x2   :  { %v51_v2 = vld [vmem:[%s637_s0] sm:$0xff]  ;;  %21 = vst.msk [vmem:[#allocation2 + $0x10] sm:$0xff] %vm18_vm1, %v428_v3  ;;  %22 = vst.msk [vmem:[#allocation2 + $0x18] sm:$0xff] %vm18_vm1, %v428_v3  ;;  %v421_v4 = vpack.c.bf16 %v68_v1, %v67_v0  ;;  %v52_v6 = vld [vmem:[%s637_s0 + $0x8] sm:$0xff] }
   0x3   :  { %23 = vst.msk [vmem:[#allocation2 + $0x20] sm:$0xff] %vm18_vm1, %v428_v3  ;;  %24 = vst.msk [vmem:[#allocation2 + $0x28] sm:$0xff] %vm18_vm1, %v428_v3  ;;  %397 = vmatprep.mubr.msk.f32.mxu0 %vm69_vm0, %v51_v2  ;;  %v59_v5 = vld [vmem:[%s637_s0 + $0x40] sm:$0xff]  ;;  %v60_v7 = vld [vmem:[%s637_s0 + $0x48] sm:$0xff] }
   0x4   :  { %25 = vst.msk [vmem:[#allocation2 + $0x30] sm:$0xff] %vm18_vm1, %v428_v3  ;;  %26 = vst.msk [vmem:[#allocation2 + $0x38] sm:$0xff] %vm18_vm1, %v428_v3  ;;  %409 = vmatprep.mubr.msk.f32.mxu1 %vm69_vm0, %v59_v5  ;;  %422 = vmatprep.subr.bf16.mxu0 %v421_v4  ;;  %v53_v8 = vld [vmem:[%s637_s0 + $0x10] sm:$0xff]  ;;  %v54_v10 = vld [vmem:[%s637_s0 + $0x18] sm:$0xff] }
   0x5   :  { %27 = vst.msk [vmem:[#allocation2 + $0x40] sm:$0xff] %vm18_vm1, %v428_v3  ;;  %28 = vst.msk [vmem:[#allocation2 + $0x48] sm:$0xff] %vm18_vm1, %v428_v3  ;;  %425 = vmatprep.subr.bf16.mxu1 %v421_v4  ;;  %424 = vmatpush3.bf16.msra.mxu0 %v421_v4  ;;  %v61_v9 = vld [vmem:[%s637_s0 + $0x50] sm:$0xff]  ;;  %v62_v11 = vld [vmem:[%s637_s0 + $0x58] sm:$0xff] }
   0x6   :  { %29 = vst.msk [vmem:[#allocation2 + $0x50] sm:$0xff] %vm18_vm1, %v428_v3  ;;  %30 = vst.msk [vmem:[#allocation2 + $0x58] sm:$0xff] %vm18_vm1, %v428_v3  ;;  %426 = vmatpush3.bf16.msra.mxu1 %v421_v4  ;;  %v55_v12 = vld [vmem:[%s637_s0 + $0x20] sm:$0xff]  ;;  %v56_v14 = vld [vmem:[%s637_s0 + $0x28] sm:$0xff] }
   0x7   :  { %31 = vst.msk [vmem:[#allocation2 + $0x60] sm:$0xff] %vm18_vm1, %v428_v3  ;;  %32 = vst.msk [vmem:[#allocation2 + $0x68] sm:$0xff] %vm18_vm1, %v428_v3  ;;  %v63_v13 = vld [vmem:[%s637_s0 + $0x60] sm:$0xff]  ;;  %v64_v15 = vld [vmem:[%s637_s0 + $0x68] sm:$0xff] }
   0x8   :  { %33 = vst.msk [vmem:[#allocation2 + $0x70] sm:$0xff] %vm18_vm1, %v428_v3  ;;  %34 = vst.msk [vmem:[#allocation2 + $0x78] sm:$0xff] %vm18_vm1, %v428_v3  ;;  %398 = vmatmul.mubr.msk.f32.vlgmr.msra.gmra.mrb[0].mxu0 %vm69_vm0, %v52_v6  ;;  %v57_v16 = vld [vmem:[%s637_s0 + $0x30] sm:$0xff]  ;;  %v58_v18 = vld [vmem:[%s637_s0 + $0x38] sm:$0xff] }
   0x9   :  { %410 = vmatmul.mubr.msk.f32.vlgmr.msra.gmra.mrb[0].mxu1 %vm69_vm0, %v60_v7  ;;  %400 = vmatprep.mubr.msk.f32.mxu0 %vm69_vm0, %v53_v8  ;;  %v65_v17 = vld [vmem:[%s637_s0 + $0x70] sm:$0xff]  ;;  %v66_v19 = vld [vmem:[%s637_s0 + $0x78] sm:$0xff]  ;;  %v36_v20 = vld [vmem:[#allocation2 + $0x8] sm:$0xff] }
   0xa   :  { %412 = vmatprep.mubr.msk.f32.mxu1 %vm69_vm0, %v61_v9  ;;  %v35_v22 = vld [vmem:[#allocation2] sm:$0xff]  ;;  %v38_v32 = vld [vmem:[#allocation2 + $0x18] sm:$0xff]  ;;  %v37_v34 = vld [vmem:[#allocation2 + $0x10] sm:$0xff] }
   0xb   :  { %v40_v44 = vld [vmem:[#allocation2 + $0x28] sm:$0xff]  ;;  %v39_v46 = vld [vmem:[#allocation2 + $0x20] sm:$0xff]  ;;  %v42_v55 = vld [vmem:[#allocation2 + $0x38] sm:$0xff] }
   0xc   :  { %401 = vmatmul.mubr.msk.f32.gmra.mrb[2].mxu0 %vm69_vm0, %v54_v10  ;;  %v44_v21 = vld [vmem:[#allocation2 + $0x48] sm:$0xff]  ;;  %v43_v23 = vld [vmem:[#allocation2 + $0x40] sm:$0xff]  ;;  %v41_v61 = vld [vmem:[#allocation2 + $0x30] sm:$0xff] }
   0xd   :  { %413 = vmatmul.mubr.msk.f32.gmra.mrb[2].mxu1 %vm69_vm0, %v62_v11  ;;  %403 = vmatprep.mubr.msk.f32.mxu0 %vm69_vm0, %v55_v12  ;;  %v46_v33 = vld [vmem:[#allocation2 + $0x58] sm:$0xff]  ;;  %v45_v35 = vld [vmem:[#allocation2 + $0x50] sm:$0xff]  ;;  %v544_v48 = vld [vmem:[%s638_s2] ss:$0 sm:$0xff] }
   0xe   :  { %415 = vmatprep.mubr.msk.f32.mxu1 %vm69_vm0, %v63_v13  ;;  %v48_v45 = vld [vmem:[#allocation2 + $0x68] sm:$0xff]  ;;  %v47_v47 = vld [vmem:[#allocation2 + $0x60] sm:$0xff] }
   0xf   :  { %v50_v56 = vld [vmem:[#allocation2 + $0x78] sm:$0xff]  ;;  %v49_v2 = vld [vmem:[#allocation2 + $0x70] sm:$0xff] }
  0x10   :  { %404 = vmatmul.mubr.msk.f32.gmra.mrb[4].mxu0 %vm69_vm0, %v56_v14 }
  0x11   :  { %416 = vmatmul.mubr.msk.f32.gmra.mrb[4].mxu1 %vm69_vm0, %v64_v15  ;;  %406 = vmatprep.mubr.msk.f32.mxu0 %vm69_vm0, %v57_v16 }
  0x12   :  { %418 = vmatprep.mubr.msk.f32.mxu1 %vm69_vm0, %v65_v17 }
  0x14   :  { %407 = vmatmul.mubr.msk.f32.gmra.mrb[6].mxu0 %vm69_vm0, %v58_v18 }
  0x15   :  { %419 = vmatmul.mubr.msk.f32.gmra.mrb[6].mxu1 %vm69_vm0, %v66_v19 }
  0xdb   :  { %v399_v24 = vpop.f32.mrb[0].mxu0 }
  0xdc   :  { %v411_v25 = vpop.f32.mrb[0].mxu1  ;;  %v264_v26 = vadd.f32 %v399_v24, %v36_v20  ;;  %v184_v28 = vpop.f32.mrb[1].mxu0 }
  0xdd   :  { %v272_v27 = vadd.f32 %v411_v25, %v44_v21  ;;  %v224_v29 = vpop.f32.mrb[1].mxu1  ;;  %v263_v30 = vadd.f32 %v184_v28, %v35_v22 }
  0xde   :  { %v271_v31 = vadd.f32 %v224_v29, %v43_v23  ;;  %281 = vst.msk [vmem:[#allocation2 + $0x8] sm:$0xff] %vm18_vm1, %v264_v26 }
  0xdf   :  { %289 = vst.msk [vmem:[#allocation2 + $0x48] sm:$0xff] %vm18_vm1, %v272_v27  ;;  %280 = vst.msk [vmem:[#allocation2] sm:$0xff] %vm18_vm1, %v263_v30  ;;  %v402_v36 = vpop.f32.mrb[2].mxu0 }
  0xe0   :  { %288 = vst.msk [vmem:[#allocation2 + $0x40] sm:$0xff] %vm18_vm1, %v271_v31  ;;  %v414_v37 = vpop.f32.mrb[2].mxu1  ;;  %v266_v38 = vadd.f32 %v402_v36, %v38_v32  ;;  %v194_v40 = vpop.f32.mrb[3].mxu0 }
  0xe1   :  { %v274_v39 = vadd.f32 %v414_v37, %v46_v33  ;;  %v234_v41 = vpop.f32.mrb[3].mxu1  ;;  %v265_v42 = vadd.f32 %v194_v40, %v37_v34 }
  0xe2   :  { %v273_v43 = vadd.f32 %v234_v41, %v45_v35  ;;  %283 = vst.msk [vmem:[#allocation2 + $0x18] sm:$0xff] %vm18_vm1, %v266_v38 }
  0xe3   :  { %291 = vst.msk [vmem:[#allocation2 + $0x58] sm:$0xff] %vm18_vm1, %v274_v39  ;;  %282 = vst.msk [vmem:[#allocation2 + $0x10] sm:$0xff] %vm18_vm1, %v265_v42  ;;  %v405_v49 = vpop.f32.mrb[4].mxu0 }
  0xe4   :  { %290 = vst.msk [vmem:[#allocation2 + $0x50] sm:$0xff] %vm18_vm1, %v273_v43  ;;  %v417_v50 = vpop.f32.mrb[4].mxu1  ;;  %v268_v51 = vadd.f32 %v405_v49, %v40_v44  ;;  %v204_v53 = vpop.f32.mrb[5].mxu0 }
  0xe5   :  { %v276_v52 = vadd.f32 %v417_v50, %v48_v45  ;;  %v244_v54 = vpop.f32.mrb[5].mxu1  ;;  %v300_v57 = vld [vmem:[#allocation2 + $0x8] sm:$0xff]  ;;  %v267_v59 = vadd.f32 %v204_v53, %v39_v46 }
  0xe6   :  { %v308_v58 = vld [vmem:[#allocation2 + $0x48] sm:$0xff]  ;;  %v275_v60 = vadd.f32 %v244_v54, %v47_v47  ;;  %v323_v62 = vadd.f32 %v544_v48, %v300_v57  ;;  %v299_v0 = vld [vmem:[#allocation2] sm:$0xff]  ;;  %285 = vst.msk [vmem:[#allocation2 + $0x28] sm:$0xff] %vm18_vm1, %v268_v51 }
  0xe7   :  { %v331_v63 = vadd.f32 %v544_v48, %v308_v58  ;;  %v307_v1 = vld [vmem:[#allocation2 + $0x40] sm:$0xff]  ;;  %293 = vst.msk [vmem:[#allocation2 + $0x68] sm:$0xff] %vm18_vm1, %v276_v52  ;;  %v322_v3 = vadd.f32 %v544_v48, %v299_v0  ;;  %284 = vst.msk [vmem:[#allocation2 + $0x20] sm:$0xff] %vm18_vm1, %v267_v59  ;;  %v408_v5 = vpop.f32.mrb[6].mxu0 }
  0xe8   :  { %v330_v4 = vadd.f32 %v544_v48, %v307_v1  ;;  %292 = vst.msk [vmem:[#allocation2 + $0x60] sm:$0xff] %vm18_vm1, %v275_v60  ;;  %v420_v6 = vpop.f32.mrb[6].mxu1  ;;  %339 = vst.msk [vmem:[%s639_s3 + $0x8] sm:$0xff] %vm18_vm1, %v323_v62  ;;  %v270_v7 = vadd.f32 %v408_v5, %v42_v55  ;;  %v214_v9 = vpop.f32.mrb[7].mxu0 }
  0xe9   :  { %347 = vst.msk [vmem:[%s639_s3 + $0x48] sm:$0xff] %vm18_vm1, %v331_v63  ;;  %v278_v8 = vadd.f32 %v420_v6, %v50_v56  ;;  %v254_v10 = vpop.f32.mrb[7].mxu1  ;;  %338 = vst.msk [vmem:[%s639_s3] sm:$0xff] %vm18_vm1, %v322_v3  ;;  %v302_v11 = vld [vmem:[#allocation2 + $0x18] sm:$0xff]  ;;  %v269_v13 = vadd.f32 %v214_v9, %v41_v61 }
  0xea   :  { %346 = vst.msk [vmem:[%s639_s3 + $0x40] sm:$0xff] %vm18_vm1, %v330_v4  ;;  %v310_v12 = vld [vmem:[#allocation2 + $0x58] sm:$0xff]  ;;  %v277_v14 = vadd.f32 %v254_v10, %v49_v2  ;;  %v325_v15 = vadd.f32 %v544_v48, %v302_v11  ;;  %v301_v17 = vld [vmem:[#allocation2 + $0x10] sm:$0xff]  ;;  %287 = vst.msk [vmem:[#allocation2 + $0x38] sm:$0xff] %vm18_vm1, %v270_v7 }
  0xeb   :  { %v333_v16 = vadd.f32 %v544_v48, %v310_v12  ;;  %v309_v18 = vld [vmem:[#allocation2 + $0x50] sm:$0xff]  ;;  %295 = vst.msk [vmem:[#allocation2 + $0x78] sm:$0xff] %vm18_vm1, %v278_v8  ;;  %v324_v19 = vadd.f32 %v544_v48, %v301_v17  ;;  %286 = vst.msk [vmem:[#allocation2 + $0x30] sm:$0xff] %vm18_vm1, %v269_v13 }
  0xec   :  { %v332_v20 = vadd.f32 %v544_v48, %v309_v18  ;;  %294 = vst.msk [vmem:[#allocation2 + $0x70] sm:$0xff] %vm18_vm1, %v277_v14  ;;  %341 = vst.msk [vmem:[%s639_s3 + $0x18] sm:$0xff] %vm18_vm1, %v325_v15 }
  0xed   :  { %349 = vst.msk [vmem:[%s639_s3 + $0x58] sm:$0xff] %vm18_vm1, %v333_v16  ;;  %340 = vst.msk [vmem:[%s639_s3 + $0x10] sm:$0xff] %vm18_vm1, %v324_v19  ;;  %v304_v21 = vld [vmem:[#allocation2 + $0x28] sm:$0xff] }
  0xee   :  { %348 = vst.msk [vmem:[%s639_s3 + $0x50] sm:$0xff] %vm18_vm1, %v332_v20  ;;  %v312_v22 = vld [vmem:[#allocation2 + $0x68] sm:$0xff]  ;;  %v327_v23 = vadd.f32 %v544_v48, %v304_v21  ;;  %v303_v25 = vld [vmem:[#allocation2 + $0x20] sm:$0xff] }
  0xef   :  { %v335_v24 = vadd.f32 %v544_v48, %v312_v22  ;;  %v311_v26 = vld [vmem:[#allocation2 + $0x60] sm:$0xff]  ;;  %v326_v27 = vadd.f32 %v544_v48, %v303_v25 }
  0xf0   :  { %v334_v28 = vadd.f32 %v544_v48, %v311_v26  ;;  %343 = vst.msk [vmem:[%s639_s3 + $0x28] sm:$0xff] %vm18_vm1, %v327_v23 }
  0xf1   :  { %351 = vst.msk [vmem:[%s639_s3 + $0x68] sm:$0xff] %vm18_vm1, %v335_v24  ;;  %342 = vst.msk [vmem:[%s639_s3 + $0x20] sm:$0xff] %vm18_vm1, %v326_v27  ;;  %v306_v29 = vld [vmem:[#allocation2 + $0x38] sm:$0xff] }
  0xf2   :  { %350 = vst.msk [vmem:[%s639_s3 + $0x60] sm:$0xff] %vm18_vm1, %v334_v28  ;;  %v314_v30 = vld [vmem:[#allocation2 + $0x78] sm:$0xff]  ;;  %v329_v31 = vadd.f32 %v544_v48, %v306_v29  ;;  %v305_v33 = vld [vmem:[#allocation2 + $0x30] sm:$0xff] }
  0xf3   :  { %v337_v32 = vadd.f32 %v544_v48, %v314_v30  ;;  %v313_v34 = vld [vmem:[#allocation2 + $0x70] sm:$0xff]  ;;  %v328_v35 = vadd.f32 %v544_v48, %v305_v33 }
  0xf4   :  { %v336_v36 = vadd.f32 %v544_v48, %v313_v34  ;;  %345 = vst.msk [vmem:[%s639_s3 + $0x38] sm:$0xff] %vm18_vm1, %v329_v31 }
  0xf5   :  { %353 = vst.msk [vmem:[%s639_s3 + $0x78] sm:$0xff] %vm18_vm1, %v337_v32  ;;  %344 = vst.msk [vmem:[%s639_s3 + $0x30] sm:$0xff] %vm18_vm1, %v328_v35 }
  0xf6   :  { %352 = vst.msk [vmem:[%s639_s3 + $0x70] sm:$0xff] %vm18_vm1, %v336_v36 }

// kernel: _lambda_.12
= control target key start
LH: loop header
LB: loop body
LE: loop exit
PB: predicated region body
PF: predicated region fallthrough
CT: control target
= control target key end

     0   :  { %vm33_vm0 = vcmask 261120   ;;  %vm486_vm1 = vcmask 785408   ;;  %s980_s0 = inlined_call_operand.vmem [shape: f32[128,32], index: 0, kind: input, shape index: {}]   ;;  %s981_s3 = inlined_call_operand.vmem [shape: f32[32,96], index: 3, kind: input, shape index: {}]   ;;  %s982_s1 = inlined_call_operand.vmem [shape: f32[1,32], index: 1, kind: input, shape index: {}]   ;;  %s983_s2 = inlined_call_operand.vmem [shape: f32[1,32], index: 2, kind: input, shape index: {}]   ;;  %s984_s4 = inlined_call_operand.vmem [shape: f32[128,96], index: 4, kind: output, shape index: {}]  }
   0x1   :  { %v17_v0 = vld [vmem:[%s980_s0] sm:$0xff]  ;;  %v18_v1 = vld [vmem:[%s980_s0 + $0x8] sm:$0xff]  ;;  %v19_v8 = vld [vmem:[%s980_s0 + $0x10] sm:$0xff] }
   0x2   :  { %v25_v2 = vld [vmem:[%s980_s0 + $0x40] sm:$0xff]  ;;  %v34_v3 = vsel %vm33_vm0, %v17_v0, 0.0  ;;  %v37_v4 = vsel %vm33_vm0, %v18_v1, 0.0  ;;  %v26_v5 = vld [vmem:[%s980_s0 + $0x48] sm:$0xff]  ;;  %v27_v9 = vld [vmem:[%s980_s0 + $0x50] sm:$0xff]  ;;  %v40_v10 = vsel %vm33_vm0, %v19_v8, 0.0 }
   0x3   :  { %35 = vadd.xlane.f32.xlu0 %v34_v3  ;;  %38 = vadd.xlane.f32.xlu1 %v37_v4  ;;  %v58_v6 = vsel %vm33_vm0, %v25_v2, 0.0  ;;  %v61_v7 = vsel %vm33_vm0, %v26_v5, 0.0  ;;  %v64_v11 = vsel %vm33_vm0, %v27_v9, 0.0  ;;  %v673_v12 = vld [vmem:[%s980_s0 + $0x18] sm:$0xff]  ;;  %v687_v16 = vld [vmem:[%s980_s0 + $0x20] sm:$0xff]  ;;  %v701_v20 = vld [vmem:[%s980_s0 + $0x28] sm:$0xff] }
   0x4   :  { %v678_v13 = vld [vmem:[%s980_s0 + $0x58] sm:$0xff]  ;;  %v43_v14 = vsel %vm33_vm0, %v673_v12, 0.0  ;;  %v692_v17 = vld [vmem:[%s980_s0 + $0x60] sm:$0xff]  ;;  %v46_v18 = vsel %vm33_vm0, %v687_v16, 0.0  ;;  %v706_v21 = vld [vmem:[%s980_s0 + $0x68] sm:$0xff]  ;;  %v49_v22 = vsel %vm33_vm0, %v701_v20, 0.0 }
   0x5   :  { %v67_v15 = vsel %vm33_vm0, %v678_v13, 0.0  ;;  %v70_v19 = vsel %vm33_vm0, %v692_v17, 0.0  ;;  %v73_v23 = vsel %vm33_vm0, %v706_v21, 0.0  ;;  %v715_v24 = vld [vmem:[%s980_s0 + $0x30] sm:$0xff]  ;;  %v729_v28 = vld [vmem:[%s980_s0 + $0x38] sm:$0xff] }
   0x6   :  { %v720_v25 = vld [vmem:[%s980_s0 + $0x70] sm:$0xff]  ;;  %v52_v26 = vsel %vm33_vm0, %v715_v24, 0.0  ;;  %v734_v29 = vld [vmem:[%s980_s0 + $0x78] sm:$0xff]  ;;  %v55_v30 = vsel %vm33_vm0, %v729_v28, 0.0 }
   0x7   :  { %59 = vadd.xlane.f32.xlu0 %v58_v6  ;;  %62 = vadd.xlane.f32.xlu1 %v61_v7  ;;  %v76_v27 = vsel %vm33_vm0, %v720_v25, 0.0  ;;  %v79_v31 = vsel %vm33_vm0, %v734_v29, 0.0 }
   0xb   :  { %41 = vadd.xlane.f32.xlu0 %v40_v10  ;;  %65 = vadd.xlane.f32.xlu1 %v64_v11 }
   0xf   :  { %44 = vadd.xlane.f32.xlu0 %v43_v14  ;;  %68 = vadd.xlane.f32.xlu1 %v67_v15 }
  0x13   :  { %47 = vadd.xlane.f32.xlu0 %v46_v18  ;;  %71 = vadd.xlane.f32.xlu1 %v70_v19 }
  0x17   :  { %50 = vadd.xlane.f32.xlu0 %v49_v22  ;;  %74 = vadd.xlane.f32.xlu1 %v73_v23 }
  0x1b   :  { %53 = vadd.xlane.f32.xlu0 %v52_v26  ;;  %77 = vadd.xlane.f32.xlu1 %v76_v27 }
  0x1f   :  { %56 = vadd.xlane.f32.xlu0 %v55_v30  ;;  %80 = vadd.xlane.f32.xlu1 %v79_v31 }
  0x90   :  { %v36_v32 = vpop.xlane.xlu0 %35  ;;  %v39_v33 = vpop.xlane.xlu1 %38 }
  0x91   :  { %v83_v34 = vmul.f32 0.03125, %v36_v32  ;;  %v84_v35 = vmul.f32 0.03125, %v39_v33 }
  0x93   :  { %v740_v36 = vsub.f32 %v17_v0, %v83_v34  ;;  %v742_v37 = vsub.f32 %v18_v1, %v84_v35 }
  0x94   :  { %v60_v38 = vpop.xlane.xlu0 %59  ;;  %v63_v39 = vpop.xlane.xlu1 %62 }
  0x95   :  { %v91_v40 = vmul.f32 0.03125, %v60_v38  ;;  %v92_v41 = vmul.f32 0.03125, %v63_v39  ;;  %v115_v42 = vmul.f32 %v740_v36, %v740_v36  ;;  %v116_v43 = vmul.f32 %v742_v37, %v742_v37 }
  0x97   :  { %v748_v44 = vsub.f32 %v25_v2, %v91_v40  ;;  %v750_v45 = vsub.f32 %v26_v5, %v92_v41  ;;  %v131_v46 = vsel %vm33_vm0, %v115_v42, 0.0  ;;  %v134_v49 = vsel %vm33_vm0, %v116_v43, 0.0 }
  0x98   :  { %132 = vadd.xlane.f32.xlu0 %v131_v46  ;;  %v42_v47 = vpop.xlane.xlu0 %41  ;;  %v66_v48 = vpop.xlane.xlu1 %65 }
  0x99   :  { %v85_v50 = vmul.f32 0.03125, %v42_v47  ;;  %v93_v51 = vmul.f32 0.03125, %v66_v48  ;;  %v123_v52 = vmul.f32 %v748_v44, %v748_v44  ;;  %v124_v53 = vmul.f32 %v750_v45, %v750_v45 }
  0x9b   :  { %v758_v54 = vsub.f32 %v19_v8, %v85_v50  ;;  %v760_v55 = vsub.f32 %v27_v9, %v93_v51  ;;  %v155_v56 = vsel %vm33_vm0, %v123_v52, 0.0  ;;  %v158_v59 = vsel %vm33_vm0, %v124_v53, 0.0  ;;  %v290_v53 = vld [vmem:[%s981_s3 + $0x8] sm:$0xff] }
  0x9c   :  { %135 = vadd.xlane.f32.xlu0 %v134_v49  ;;  %156 = vadd.xlane.f32.xlu1 %v155_v56  ;;  %v45_v57 = vpop.xlane.xlu0 %44  ;;  %v69_v58 = vpop.xlane.xlu1 %68 }
  0x9d   :  { %v86_v60 = vmul.f32 0.03125, %v45_v57  ;;  %v94_v61 = vmul.f32 0.03125, %v69_v58  ;;  %v117_v62 = vmul.f32 %v758_v54, %v758_v54  ;;  %v125_v63 = vmul.f32 %v760_v55, %v760_v55  ;;  %v291_v57 = vld [vmem:[%s981_s3 + $0x10] sm:$0xff]  ;;  %v292_v58 = vld [vmem:[%s981_s3 + $0x18] sm:$0xff] }
  0x9f   :  { %v769_v0 = vsub.f32 %v673_v12, %v86_v60  ;;  %v772_v1 = vsub.f32 %v678_v13, %v94_v61  ;;  %v137_v2 = vsel %vm33_vm0, %v117_v62, 0.0  ;;  %v161_v5 = vsel %vm33_vm0, %v125_v63, 0.0 }
  0xa0   :  { %159 = vadd.xlane.f32.xlu1 %v158_v59  ;;  %138 = vadd.xlane.f32.xlu0 %v137_v2  ;;  %v48_v3 = vpop.xlane.xlu0 %47  ;;  %v72_v4 = vpop.xlane.xlu1 %71  ;;  %v581_v59 = vpack.c.bf16 %v292_v58, %v291_v57 }
  0xa1   :  { %v87_v6 = vmul.f32 0.03125, %v48_v3  ;;  %v95_v7 = vmul.f32 0.03125, %v72_v4  ;;  %v118_v8 = vmul.f32 %v769_v0, %v769_v0  ;;  %v126_v9 = vmul.f32 %v772_v1, %v772_v1 }
  0xa3   :  { %v781_v10 = vsub.f32 %v687_v16, %v87_v6  ;;  %v784_v11 = vsub.f32 %v692_v17, %v95_v7  ;;  %v140_v12 = vsel %vm33_vm0, %v118_v8, 0.0  ;;  %v164_v15 = vsel %vm33_vm0, %v126_v9, 0.0 }
  0xa4   :  { %162 = vadd.xlane.f32.xlu1 %v161_v5  ;;  %141 = vadd.xlane.f32.xlu0 %v140_v12  ;;  %v51_v13 = vpop.xlane.xlu0 %50  ;;  %v75_v14 = vpop.xlane.xlu1 %74 }
  0xa5   :  { %v88_v18 = vmul.f32 0.03125, %v51_v13  ;;  %v96_v19 = vmul.f32 0.03125, %v75_v14  ;;  %v119_v22 = vmul.f32 %v781_v10, %v781_v10  ;;  %v127_v16 = vmul.f32 %v784_v11, %v784_v11 }
  0xa7   :  { %v793_v23 = vsub.f32 %v701_v20, %v88_v18  ;;  %v796_v17 = vsub.f32 %v706_v21, %v96_v19  ;;  %v143_v26 = vsel %vm33_vm0, %v119_v22, 0.0  ;;  %v167_v31 = vsel %vm33_vm0, %v127_v16, 0.0 }
  0xa8   :  { %165 = vadd.xlane.f32.xlu1 %v164_v15  ;;  %144 = vadd.xlane.f32.xlu0 %v143_v26  ;;  %v54_v27 = vpop.xlane.xlu0 %53  ;;  %v78_v30 = vpop.xlane.xlu1 %77 }
  0xa9   :  { %v89_v32 = vmul.f32 0.03125, %v54_v27  ;;  %v97_v33 = vmul.f32 0.03125, %v78_v30  ;;  %v120_v34 = vmul.f32 %v793_v23, %v793_v23  ;;  %v128_v20 = vmul.f32 %v796_v17, %v796_v17  ;;  %v845_v30 = vld [vmem:[%s982_s1] ss:$0 sm:$0xff] }
  0xab   :  { %v805_v35 = vsub.f32 %v715_v24, %v89_v32  ;;  %v808_v21 = vsub.f32 %v720_v25, %v97_v33  ;;  %v146_v38 = vsel %vm33_vm0, %v120_v34, 0.0  ;;  %v170_v41 = vsel %vm33_vm0, %v128_v20, 0.0 }
  0xac   :  { %168 = vadd.xlane.f32.xlu1 %v167_v31  ;;  %147 = vadd.xlane.f32.xlu0 %v146_v38  ;;  %v57_v39 = vpop.xlane.xlu0 %56  ;;  %v81_v40 = vpop.xlane.xlu1 %80  ;;  %v851_v38 = vld [vmem:[%s983_s2] ss:$0 sm:$0xff] }
  0xad   :  { %v90_v42 = vmul.f32 0.03125, %v57_v39  ;;  %v98_v43 = vmul.f32 0.03125, %v81_v40  ;;  %v121_v46 = vmul.f32 %v805_v35, %v805_v35  ;;  %v129_v24 = vmul.f32 %v808_v21, %v808_v21 }
  0xaf   :  { %v817_v47 = vsub.f32 %v729_v28, %v90_v42  ;;  %v820_v25 = vsub.f32 %v734_v29, %v98_v43  ;;  %v149_v48 = vsel %vm33_vm0, %v121_v46, 0.0  ;;  %v173_v49 = vsel %vm33_vm0, %v129_v24, 0.0  ;;  %v289_v29 = vld [vmem:[%s981_s3] sm:$0xff] }
  0xb0   :  { %171 = vadd.xlane.f32.xlu1 %v170_v41  ;;  %150 = vadd.xlane.f32.xlu0 %v149_v48  ;;  %v577_v56 = vpack.c.bf16 %v290_v53, %v289_v29 }
  0xb1   :  { %v122_v50 = vmul.f32 %v817_v47, %v817_v47  ;;  %v130_v51 = vmul.f32 %v820_v25, %v820_v25 }
  0xb2   :  { %578 = vmatprep.subr.bf16.mxu0 %v577_v56  ;;  %585 = vmatprep.subr.bf16.mxu1 %v577_v56 }
  0xb3   :  { %v152_v52 = vsel %vm33_vm0, %v122_v50, 0.0  ;;  %v176_v28 = vsel %vm33_vm0, %v130_v51, 0.0  ;;  %580 = vmatpush3.bf16.msra.mxu0 %v577_v56  ;;  %587 = vmatpush3.bf16.msra.mxu1 %v577_v56 }
  0xb4   :  { %174 = vadd.xlane.f32.xlu1 %v173_v49  ;;  %153 = vadd.xlane.f32.xlu0 %v152_v52 }
  0xb5   :  { %582 = vmatprep.subr.bf16.mxu0 %v581_v59  ;;  %586 = vmatprep.subr.bf16.mxu1 %v581_v59 }
  0xb7   :  { %584 = vmatpush3.bf16.msra.mxu0 %v581_v59  ;;  %588 = vmatpush3.bf16.msra.mxu1 %v581_v59 }
  0xb8   :  { %177 = vadd.xlane.f32.xlu1 %v176_v28 }
 0x125   :  { %v133_v60 = vpop.xlane.xlu0 %132 }
 0x126   :  { %v179_v61 = vmul.f32 0.03125, %v133_v60 }
 0x128   :  { %v195_v62 = vadd.f32 1e-05, %v179_v61 }
 0x129   :  { %v157_v63 = vpop.xlane.xlu1 %156  ;;  %v136_v2 = vpop.xlane.xlu0 %135 }
 0x12a   :  { %589 = vrsqrt.f32 %v195_v62  ;;  %v187_v3 = vmul.f32 0.03125, %v157_v63  ;;  %v180_v4 = vmul.f32 0.03125, %v136_v2 }
 0x12c   :  { %v203_v5 = vadd.f32 1e-05, %v187_v3  ;;  %v196_v6 = vadd.f32 1e-05, %v180_v4 }
 0x12d   :  { %v160_v7 = vpop.xlane.xlu1 %159  ;;  %v139_v8 = vpop.xlane.xlu0 %138 }
 0x12e   :  { %591 = vrsqrt.f32 %v203_v5  ;;  %v188_v9 = vmul.f32 0.03125, %v160_v7  ;;  %v181_v12 = vmul.f32 0.03125, %v139_v8 }
 0x12f   :  { %593 = vrsqrt.f32 %v196_v6 }
 0x130   :  { %v204_v13 = vadd.f32 1e-05, %v188_v9  ;;  %v197_v14 = vadd.f32 1e-05, %v181_v12 }
 0x131   :  { %v163_v15 = vpop.xlane.xlu1 %162  ;;  %v142_v18 = vpop.xlane.xlu0 %141 }
 0x132   :  { %595 = vrsqrt.f32 %v204_v13  ;;  %v189_v19 = vmul.f32 0.03125, %v163_v15  ;;  %v182_v22 = vmul.f32 0.03125, %v142_v18 }
 0x133   :  { %597 = vrsqrt.f32 %v197_v14 }
 0x134   :  { %v590_v16 = vpop.eup %589  ;;  %v205_v26 = vadd.f32 1e-05, %v189_v19  ;;  %v198_v27 = vadd.f32 1e-05, %v182_v22 }
 0x135   :  { %v166_v31 = vpop.xlane.xlu1 %165  ;;  %v145_v32 = vpop.xlane.xlu0 %144  ;;  %v227_v33 = vmul.f32 %v590_v16, %v740_v36 }
 0x136   :  { %599 = vrsqrt.f32 %v205_v26  ;;  %v190_v34 = vmul.f32 0.03125, %v166_v31  ;;  %v183_v20 = vmul.f32 0.03125, %v145_v32 }
 0x137   :  { %601 = vrsqrt.f32 %v198_v27  ;;  %v250_v39 = vmul.f32 %v845_v30, %v227_v33 }
 0x138   :  { %v592_v40 = vpop.eup %591  ;;  %v206_v41 = vadd.f32 1e-05, %v190_v34  ;;  %v199_v42 = vadd.f32 1e-05, %v183_v20 }
 0x139   :  { %v594_v43 = vpop.eup %593  ;;  %v169_v46 = vpop.xlane.xlu1 %168  ;;  %v273_v48 = vadd.f32 %v851_v38, %v250_v39  ;;  %v235_v36 = vmul.f32 %v592_v40, %v748_v44 }
 0x13a   :  { %v148_v24 = vpop.xlane.xlu0 %147  ;;  %603 = vrsqrt.f32 %v206_v41  ;;  %v191_v49 = vmul.f32 0.03125, %v169_v46  ;;  %v228_v51 = vmul.f32 %v594_v43, %v742_v37 }
 0x13b   :  { %v184_v50 = vmul.f32 0.03125, %v148_v24  ;;  %605 = vrsqrt.f32 %v199_v42  ;;  %553 = vmatprep.mubr.msk.f32.mxu0 %vm33_vm0, %v273_v48  ;;  %v258_v52 = vmul.f32 %v845_v30, %v235_v36 }
 0x13c   :  { %v596_v28 = vpop.eup %595  ;;  %v207_v29 = vadd.f32 1e-05, %v191_v49  ;;  %v251_v56 = vmul.f32 %v845_v30, %v228_v51 }
 0x13d   :  { %v200_v53 = vadd.f32 1e-05, %v184_v50  ;;  %v598_v57 = vpop.eup %597  ;;  %v172_v58 = vpop.xlane.xlu1 %171  ;;  %v281_v44 = vadd.f32 %v851_v38, %v258_v52  ;;  %v236_v60 = vmul.f32 %v596_v28, %v750_v45 }
 0x13e   :  { %v151_v59 = vpop.xlane.xlu0 %150  ;;  %607 = vrsqrt.f32 %v207_v29  ;;  %v192_v61 = vmul.f32 0.03125, %v172_v58  ;;  %v274_v62 = vadd.f32 %v851_v38, %v251_v56  ;;  %v229_v63 = vmul.f32 %v598_v57, %v758_v54 }
 0x13f   :  { %v185_v37 = vmul.f32 0.03125, %v151_v59  ;;  %609 = vrsqrt.f32 %v200_v53  ;;  %565 = vmatprep.mubr.msk.f32.mxu1 %vm33_vm0, %v281_v44  ;;  %v259_v2 = vmul.f32 %v845_v30, %v236_v60 }
 0x140   :  { %v600_v3 = vpop.eup %599  ;;  %v208_v4 = vadd.f32 1e-05, %v192_v61  ;;  %554 = vmatmul.mubr.msk.f32.vlgmr.msra.gmra.mrb[0].mxu0 %vm33_vm0, %v274_v62  ;;  %v252_v8 = vmul.f32 %v845_v30, %v229_v63 }
 0x141   :  { %v201_v5 = vadd.f32 1e-05, %v185_v37  ;;  %v602_v6 = vpop.eup %601  ;;  %v175_v7 = vpop.xlane.xlu1 %174  ;;  %v282_v9 = vadd.f32 %v851_v38, %v259_v2  ;;  %v237_v12 = vmul.f32 %v600_v3, %v760_v55 }
 0x142   :  { %v154_v45 = vpop.xlane.xlu0 %153  ;;  %611 = vrsqrt.f32 %v208_v4  ;;  %v193_v13 = vmul.f32 0.03125, %v175_v7  ;;  %v230_v54 = vmul.f32 %v602_v6, %v769_v0  ;;  %v275_v15 = vadd.f32 %v851_v38, %v252_v8 }
 0x143   :  { %v186_v14 = vmul.f32 0.03125, %v154_v45  ;;  %613 = vrsqrt.f32 %v201_v5  ;;  %566 = vmatmul.mubr.msk.f32.vlgmr.msra.gmra.mrb[0].mxu1 %vm33_vm0, %v282_v9  ;;  %v260_v18 = vmul.f32 %v845_v30, %v237_v12 }
 0x144   :  { %v604_v19 = vpop.eup %603  ;;  %v209_v22 = vadd.f32 1e-05, %v193_v13  ;;  %v253_v26 = vmul.f32 %v845_v30, %v230_v54  ;;  %556 = vmatprep.mubr.msk.f32.mxu0 %vm33_vm0, %v275_v15 }
 0x145   :  { %v202_v16 = vadd.f32 1e-05, %v186_v14  ;;  %v606_v27 = vpop.eup %605  ;;  %v178_v55 = vpop.xlane.xlu1 %177  ;;  %v283_v31 = vadd.f32 %v851_v38, %v260_v18  ;;  %v238_v0 = vmul.f32 %v604_v19, %v772_v1 }
 0x146   :  { %615 = vrsqrt.f32 %v209_v22  ;;  %v194_v32 = vmul.f32 0.03125, %v178_v55  ;;  %v276_v33 = vadd.f32 %v851_v38, %v253_v26  ;;  %v231_v34 = vmul.f32 %v606_v27, %v781_v10 }
 0x147   :  { %617 = vrsqrt.f32 %v202_v16  ;;  %568 = vmatprep.mubr.msk.f32.mxu1 %vm33_vm0, %v283_v31  ;;  %v261_v20 = vmul.f32 %v845_v30, %v238_v0 }
 0x148   :  { %v608_v39 = vpop.eup %607  ;;  %v210_v40 = vadd.f32 1e-05, %v194_v32  ;;  %557 = vmatmul.mubr.msk.f32.gmra.mrb[2].mxu0 %vm33_vm0, %v276_v33  ;;  %v254_v41 = vmul.f32 %v845_v30, %v231_v34 }
 0x149   :  { %v610_v42 = vpop.eup %609  ;;  %v284_v1 = vadd.f32 %v851_v38, %v261_v20  ;;  %v239_v43 = vmul.f32 %v608_v39, %v784_v11 }
 0x14a   :  { %619 = vrsqrt.f32 %v210_v40  ;;  %v277_v46 = vadd.f32 %v851_v38, %v254_v41  ;;  %v232_v10 = vmul.f32 %v610_v42, %v793_v23 }
 0x14b   :  { %569 = vmatmul.mubr.msk.f32.gmra.mrb[2].mxu1 %vm33_vm0, %v284_v1  ;;  %v262_v24 = vmul.f32 %v845_v30, %v239_v43 }
 0x14c   :  { %v612_v48 = vpop.eup %611  ;;  %559 = vmatprep.mubr.msk.f32.mxu0 %vm33_vm0, %v277_v46  ;;  %v255_v36 = vmul.f32 %v845_v30, %v232_v10 }
 0x14d   :  { %v614_v49 = vpop.eup %613  ;;  %v285_v50 = vadd.f32 %v851_v38, %v262_v24  ;;  %v240_v51 = vmul.f32 %v612_v48, %v796_v17 }
 0x14e   :  { %v278_v11 = vadd.f32 %v851_v38, %v255_v36  ;;  %v233_v52 = vmul.f32 %v614_v49, %v805_v35 }
 0x14f   :  { %571 = vmatprep.mubr.msk.f32.mxu1 %vm33_vm0, %v285_v50  ;;  %v263_v23 = vmul.f32 %v845_v30, %v240_v51 }
 0x150   :  { %v616_v28 = vpop.eup %615  ;;  %560 = vmatmul.mubr.msk.f32.gmra.mrb[4].mxu0 %vm33_vm0, %v278_v11  ;;  %v256_v29 = vmul.f32 %v845_v30, %v233_v52 }
 0x151   :  { %v618_v53 = vpop.eup %617  ;;  %v286_v56 = vadd.f32 %v851_v38, %v263_v23  ;;  %v241_v57 = vmul.f32 %v616_v28, %v808_v21 }
 0x152   :  { %v279_v17 = vadd.f32 %v851_v38, %v256_v29  ;;  %v234_v58 = vmul.f32 %v618_v53, %v817_v47 }
 0x153   :  { %572 = vmatmul.mubr.msk.f32.gmra.mrb[4].mxu1 %vm33_vm0, %v286_v56  ;;  %v264_v35 = vmul.f32 %v845_v30, %v241_v57 }
 0x154   :  { %v620_v59 = vpop.eup %619  ;;  %562 = vmatprep.mubr.msk.f32.mxu0 %vm33_vm0, %v279_v17  ;;  %v257_v44 = vmul.f32 %v845_v30, %v234_v58 }
 0x155   :  { %v287_v60 = vadd.f32 %v851_v38, %v264_v35  ;;  %v242_v61 = vmul.f32 %v620_v59, %v820_v25 }
 0x156   :  { %v280_v37 = vadd.f32 %v851_v38, %v257_v44 }
 0x157   :  { %574 = vmatprep.mubr.msk.f32.mxu1 %vm33_vm0, %v287_v60  ;;  %v265_v21 = vmul.f32 %v845_v30, %v242_v61 }
 0x158   :  { %563 = vmatmul.mubr.msk.f32.gmra.mrb[6].mxu0 %vm33_vm0, %v280_v37 }
 0x159   :  { %v288_v47 = vadd.f32 %v851_v38, %v265_v21 }
 0x15b   :  { %575 = vmatmul.mubr.msk.f32.gmra.mrb[6].mxu1 %vm33_vm0, %v288_v47 }
 0x213   :  { %v555_v62 = vpop.f32.mrb[0].mxu0 }
 0x214   :  { %488 = vst.msk [vmem:[%s984_s4 + $0x8] sm:$0xff] %vm486_vm1, %v555_v62  ;;  %v407_v25 = vpop.f32.mrb[1].mxu0 }
 0x215   :  { %487 = vst.msk [vmem:[%s984_s4] sm:$0xff] %vm486_vm1, %v407_v25 }
 0x216   :  { %v567_v30 = vpop.f32.mrb[0].mxu1 }
 0x217   :  { %496 = vst.msk [vmem:[%s984_s4 + $0x48] sm:$0xff] %vm486_vm1, %v567_v30  ;;  %v447_v38 = vpop.f32.mrb[1].mxu1 }
 0x218   :  { %495 = vst.msk [vmem:[%s984_s4 + $0x40] sm:$0xff] %vm486_vm1, %v447_v38 }
 0x21b   :  { %v558_v63 = vpop.f32.mrb[2].mxu0 }
 0x21c   :  { %490 = vst.msk [vmem:[%s984_s4 + $0x18] sm:$0xff] %vm486_vm1, %v558_v63  ;;  %v417_v2 = vpop.f32.mrb[3].mxu0 }
 0x21d   :  { %489 = vst.msk [vmem:[%s984_s4 + $0x10] sm:$0xff] %vm486_vm1, %v417_v2 }
 0x21e   :  { %v570_v3 = vpop.f32.mrb[2].mxu1 }
 0x21f   :  { %498 = vst.msk [vmem:[%s984_s4 + $0x58] sm:$0xff] %vm486_vm1, %v570_v3  ;;  %v457_v4 = vpop.f32.mrb[3].mxu1 }
 0x220   :  { %497 = vst.msk [vmem:[%s984_s4 + $0x50] sm:$0xff] %vm486_vm1, %v457_v4 }
 0x223   :  { %v561_v5 = vpop.f32.mrb[4].mxu0 }
 0x224   :  { %492 = vst.msk [vmem:[%s984_s4 + $0x28] sm:$0xff] %vm486_vm1, %v561_v5  ;;  %v427_v6 = vpop.f32.mrb[5].mxu0 }
 0x225   :  { %491 = vst.msk [vmem:[%s984_s4 + $0x20] sm:$0xff] %vm486_vm1, %v427_v6 }
 0x226   :  { %v573_v7 = vpop.f32.mrb[4].mxu1 }
 0x227   :  { %500 = vst.msk [vmem:[%s984_s4 + $0x68] sm:$0xff] %vm486_vm1, %v573_v7  ;;  %v467_v45 = vpop.f32.mrb[5].mxu1 }
 0x228   :  { %499 = vst.msk [vmem:[%s984_s4 + $0x60] sm:$0xff] %vm486_vm1, %v467_v45 }
 0x22b   :  { %v564_v8 = vpop.f32.mrb[6].mxu0 }
 0x22c   :  { %494 = vst.msk [vmem:[%s984_s4 + $0x38] sm:$0xff] %vm486_vm1, %v564_v8  ;;  %v437_v9 = vpop.f32.mrb[7].mxu0 }
 0x22d   :  { %493 = vst.msk [vmem:[%s984_s4 + $0x30] sm:$0xff] %vm486_vm1, %v437_v9 }
 0x22e   :  { %v576_v12 = vpop.f32.mrb[6].mxu1 }
 0x22f   :  { %502 = vst.msk [vmem:[%s984_s4 + $0x78] sm:$0xff] %vm486_vm1, %v576_v12  ;;  %v477_v13 = vpop.f32.mrb[7].mxu1 }
 0x230   :  { %501 = vst.msk [vmem:[%s984_s4 + $0x70] sm:$0xff] %vm486_vm1, %v477_v13 }

// kernel: _lambda_.13
= control target key start
LH: loop header
LB: loop body
LE: loop exit
PB: predicated region body
PF: predicated region fallthrough
CT: control target
= control target key end

     0   :  { %s2378_s15 = smov 0   ;;  %s2773_s0 = inlined_call_operand.vmem [shape: f32[2,8,16,16], index: 0, kind: input, shape index: {}]   ;;  %s2774_s1 = inlined_call_operand.vmem [shape: f32[2,8,16,16], index: 1, kind: input, shape index: {}]   ;;  %s2775_s2 = inlined_call_operand.vmem [shape: f32[2,8,16,16], index: 2, kind: input, shape index: {}]   ;;  %s2776_s3 = inlined_call_operand.vmem [shape: f32[8,16,16], index: 3, kind: input, shape index: {}]   ;;  %s2777_s4 = inlined_call_operand.vmem [shape: f32[2,8,16,16], index: 4, kind: output, shape index: {}]  }
   0x1 LB: > { %s1950_s16 = sadd.s32 4294967295, %s2351_s15   ;;  %p1954_p0 = scmp.ge.s32.totalorder %s2351_s15, 1  ;;  %s2351_s15 = sphi %s2378_s15, %s14_s15  }
   0x2   : > { %p182_p1 = scmp.lt.s32.totalorder %s2351_s15, 3 }
   0x4   : > { %p183_p2 = pnand %p1954_p0, %p182_p1 }
   0x5   : > { %p218_p3 = scmp.lt.s32.totalorder (!%p183_p2), %s1950_s16, 1  ;;  %vm302_vm0 = vcmask (!%p183_p2), 130048   ;;  %v287_v42 = vld [vmem:[%s2776_s3 + $0x8] sm:$0xff] (!%p183_p2)  ;;  %v286_v46 = vld [vmem:[%s2776_s3] sm:$0xff] (!%p183_p2)  ;;  %v289_v47 = vld [vmem:[%s2776_s3 + $0x18] sm:$0xff] (!%p183_p2) }
   0x6   : > { %186 = sbr.rel (%p183_p2) target bundleno = 803 (0x323), region = 36  ;;  %vm2396_vm1 = vmpackc.low (!%p183_p2), %vm302_vm0, %vm302_vm0  ;;  %v288_v51 = vld [vmem:[%s2776_s3 + $0x10] sm:$0xff] (!%p183_p2)  ;;  %v291_v62 = vld [vmem:[%s2776_s3 + $0x28] sm:$0xff] (!%p183_p2) }
   0xd   : > { %s2781_s16 = smov (!%p218_p3, %s1950_s16), 1 }
   0xe   : > { %s2386_s17 = sshll.u32 %s2781_s16, 7 }
   0xf   : > { %s2392_s20 = scalar_lea.vmem %s2774_s1, %s2386_s17  ;;  %s2404_s23 = scalar_lea.vmem %s2773_s0, %s2386_s17 }
  0x10   : > { %v254_v1 = vld [vmem:[%s2392_s20] sm:$0xff]  ;;  %v255_v2 = vld [vmem:[%s2392_s20 + $0x8] sm:$0xff]  ;;  %v256_v3 = vld [vmem:[%s2392_s20 + $0x10] sm:$0xff]  ;;  %s2672_s8 = scalar_lea.vmem %s2775_s2, %s2386_s17  ;;  %s2736_s11 = scalar_lea.vmem %s2777_s4, %s2386_s17 }
  0x11   : > { %v2193_v4 = vpack.c.bf16 %v255_v2, %v254_v1  ;;  %v257_v5 = vld [vmem:[%s2392_s20 + $0x18] sm:$0xff]  ;;  %v238_v6 = vld [vmem:[%s2404_s23] sm:$0xff]  ;;  %v240_v8 = vld [vmem:[%s2404_s23 + $0x10] sm:$0xff] }
  0x12   : > { %v2199_v7 = vpack.c.bf16 %v257_v5, %v256_v3  ;;  %2085 = vmatprep.mubr.msk.f32.mxu0 %vm302_vm0, %v238_v6  ;;  %v258_v9 = vld [vmem:[%s2392_s20 + $0x20] sm:$0xff]  ;;  %v259_v10 = vld [vmem:[%s2392_s20 + $0x28] sm:$0xff]  ;;  %2092 = vmatprep.mubr.msk.f32.mxu1 %vm302_vm0, %v240_v8  ;;  %v260_v12 = vld [vmem:[%s2392_s20 + $0x30] sm:$0xff] }
  0x13   : > { %2195 = vmatprep.subr.msk.bf16.mxu0 %vm2396_vm1, %v2193_v4  ;;  %v2205_v11 = vpack.c.bf16 %v259_v10, %v258_v9  ;;  %v261_v13 = vld [vmem:[%s2392_s20 + $0x38] sm:$0xff]  ;;  %v262_v15 = vld [vmem:[%s2392_s20 + $0x40] sm:$0xff]  ;;  %v263_v16 = vld [vmem:[%s2392_s20 + $0x48] sm:$0xff] }
  0x14   : > { %2201 = vmatprep.subr.msk.bf16.mxu1 %vm2396_vm1, %v2199_v7  ;;  %2198 = vmatpush3.bf16.xpose.msk.msra.mxu0 %vm2396_vm1, %v2193_v4  ;;  %v2211_v14 = vpack.c.bf16 %v261_v13, %v260_v12  ;;  %v239_v17 = vld [vmem:[%s2404_s23 + $0x8] sm:$0xff]  ;;  %v264_v18 = vld [vmem:[%s2392_s20 + $0x50] sm:$0xff]  ;;  %v265_v19 = vld [vmem:[%s2392_s20 + $0x58] sm:$0xff]  ;;  %v2217_v22 = vpack.c.bf16 %v263_v16, %v262_v15 }
  0x15   : > { %2204 = vmatpush3.bf16.xpose.msk.msra.mxu1 %vm2396_vm1, %v2199_v7  ;;  %2207 = vmatprep.subr.msk.bf16.mxu0 %vm2396_vm1, %v2205_v11  ;;  %v241_v20 = vld [vmem:[%s2404_s23 + $0x18] sm:$0xff]  ;;  %v244_v21 = vld [vmem:[%s2404_s23 + $0x30] sm:$0xff]  ;;  %v242_v23 = vld [vmem:[%s2404_s23 + $0x20] sm:$0xff]  ;;  %v2223_v24 = vpack.c.bf16 %v265_v19, %v264_v18 }
  0x16   : > { %2213 = vmatprep.subr.msk.bf16.mxu1 %vm2396_vm1, %v2211_v14  ;;  %v266_v25 = vld [vmem:[%s2392_s20 + $0x60] sm:$0xff]  ;;  %v267_v26 = vld [vmem:[%s2392_s20 + $0x68] sm:$0xff]  ;;  %v268_v28 = vld [vmem:[%s2392_s20 + $0x70] sm:$0xff] }
  0x17   : > { %v243_v27 = vld [vmem:[%s2404_s23 + $0x28] sm:$0xff]  ;;  %v269_v29 = vld [vmem:[%s2392_s20 + $0x78] sm:$0xff]  ;;  %v248_v31 = vld [vmem:[%s2404_s23 + $0x50] sm:$0xff]  ;;  %v2229_v32 = vpack.c.bf16 %v267_v26, %v266_v25 }
  0x18   : > { %v245_v30 = vld [vmem:[%s2404_s23 + $0x38] sm:$0xff]  ;;  %v246_v33 = vld [vmem:[%s2404_s23 + $0x40] sm:$0xff]  ;;  %v2235_v34 = vpack.c.bf16 %v269_v29, %v268_v28  ;;  %v247_v35 = vld [vmem:[%s2404_s23 + $0x48] sm:$0xff] }
  0x19   : > { %v249_v36 = vld [vmem:[%s2404_s23 + $0x58] sm:$0xff]  ;;  %v250_v37 = vld [vmem:[%s2404_s23 + $0x60] sm:$0xff]  ;;  %v252_v38 = vld [vmem:[%s2404_s23 + $0x70] sm:$0xff] }
  0x1a   : > { %v251_v39 = vld [vmem:[%s2404_s23 + $0x68] sm:$0xff]  ;;  %v253_v40 = vld [vmem:[%s2404_s23 + $0x78] sm:$0xff]  ;;  %v290_v3 = vld [vmem:[%s2776_s3 + $0x20] sm:$0xff] }
  0x1b   : > { %2086 = vmatmul.mubr.msk.f32.vlgmr.msra.gmra.mrb[0].mxu0 %vm302_vm0, %v239_v17  ;;  %v293_v2 = vld [vmem:[%s2776_s3 + $0x38] sm:$0xff]  ;;  %v292_v7 = vld [vmem:[%s2776_s3 + $0x30] sm:$0xff]  ;;  %v295_v18 = vld [vmem:[%s2776_s3 + $0x48] sm:$0xff] }
  0x1c   : > { %2093 = vmatmul.mubr.msk.f32.vlgmr.msra.gmra.mrb[0].mxu1 %vm302_vm0, %v241_v20  ;;  %2210 = vmatpush3.bf16.xpose.msk.msra.mxu0 %vm2396_vm1, %v2205_v11 }
  0x1d   : > { %2216 = vmatpush3.bf16.xpose.msk.msra.mxu1 %vm2396_vm1, %v2211_v14  ;;  %2106 = vmatprep.mubr.msk.f32.mxu1 %vm302_vm0, %v244_v21 }
  0x1e   : > { %2099 = vmatprep.mubr.msk.f32.mxu0 %vm302_vm0, %v242_v23  ;;  %2219 = vmatprep.subr.msk.bf16.mxu0 %vm2396_vm1, %v2217_v22  ;;  %v294_v23 = vld [vmem:[%s2776_s3 + $0x40] sm:$0xff] }
  0x1f   : > { %2225 = vmatprep.subr.msk.bf16.mxu1 %vm2396_vm1, %v2223_v24 }
  0x23   : > { %2100 = vmatmul.mubr.msk.f32.vlgmr.msra.gmra.mrb[2].mxu0 %vm302_vm0, %v243_v27  ;;  %v296_v27 = vld [vmem:[%s2776_s3 + $0x50] sm:$0xff] }
  0x24   : > { %2107 = vmatmul.mubr.msk.f32.vlgmr.msra.gmra.mrb[2].mxu1 %vm302_vm0, %v245_v30  ;;  %2222 = vmatpush3.bf16.xpose.msk.msra.mxu0 %vm2396_vm1, %v2217_v22  ;;  %v297_v22 = vld [vmem:[%s2776_s3 + $0x58] sm:$0xff] }
  0x25   : > { %2228 = vmatpush3.bf16.xpose.msk.msra.mxu1 %vm2396_vm1, %v2223_v24  ;;  %2120 = vmatprep.mubr.msk.f32.mxu1 %vm302_vm0, %v248_v31 }
  0x26   : > { %2113 = vmatprep.mubr.msk.f32.mxu0 %vm302_vm0, %v246_v33  ;;  %2231 = vmatprep.subr.msk.bf16.mxu0 %vm2396_vm1, %v2229_v32 }
  0x27   : > { %2237 = vmatprep.subr.msk.bf16.mxu1 %vm2396_vm1, %v2235_v34 }
  0x2b   : > { %2114 = vmatmul.mubr.msk.f32.vlgmr.msra.gmra.mrb[4].mxu0 %vm302_vm0, %v247_v35 }
  0x2c   : > { %2121 = vmatmul.mubr.msk.f32.vlgmr.msra.gmra.mrb[4].mxu1 %vm302_vm0, %v249_v36  ;;  %2234 = vmatpush3.bf16.xpose.msk.msra.mxu0 %vm2396_vm1, %v2229_v32 }
  0x2d   : > { %2240 = vmatpush3.bf16.xpose.msk.msra.mxu1 %vm2396_vm1, %v2235_v34  ;;  %2127 = vmatprep.mubr.msk.f32.mxu0 %vm302_vm0, %v250_v37 }
  0x2e   : > { %2134 = vmatprep.mubr.msk.f32.mxu1 %vm302_vm0, %v252_v38 }
  0x33   : > { %2128 = vmatmul.mubr.msk.f32.vlgmr.msra.gmra.mrb[6].mxu0 %vm302_vm0, %v251_v39 }
  0x34   : > { %2135 = vmatmul.mubr.msk.f32.vlgmr.msra.gmra.mrb[6].mxu1 %vm302_vm0, %v253_v40  ;;  %v298_v40 = vld [vmem:[%s2776_s3 + $0x60] sm:$0xff] }
  0xee   : > { %v2087_v41 = vpop.f32.mrb[0].mxu0 }
  0xef   : > { %v1000_v43 = vmul.f32 0.25, %v2087_v41  ;;  %v381_v44 = vpop.f32.mrb[1].mxu0  ;;  %v2094_v45 = vpop.f32.mrb[0].mxu1 }
  0xf0   : > { %v999_v48 = vmul.f32 0.25, %v381_v44  ;;  %v1002_v49 = vmul.f32 0.25, %v2094_v45  ;;  %v468_v50 = vpop.f32.mrb[1].mxu1  ;;  %v300_v44 = vld [vmem:[%s2776_s3 + $0x70] sm:$0xff] }
  0xf1   : > { %v1001_v52 = vmul.f32 0.25, %v468_v50  ;;  %v2498_v53 = vadd.f32 %v1000_v43, %v287_v42 }
  0xf2   : > { %v2500_v54 = vadd.f32 %v999_v48, %v286_v46  ;;  %v2502_v55 = vadd.f32 %v1002_v49, %v289_v47  ;;  %v299_v47 = vld [vmem:[%s2776_s3 + $0x68] sm:$0xff]  ;;  %v301_v49 = vld [vmem:[%s2776_s3 + $0x78] sm:$0xff] }
  0xf3   : > { %v1034_v56 = vsel %vm302_vm0, %v2498_v53, -inf  ;;  %v2506_v57 = vadd.f32 %v1001_v52, %v288_v51 }
  0xf4   : > { %1035 = vmax.xlane.f32.xlu1 %v1034_v56  ;;  %v1031_v58 = vsel %vm302_vm0, %v2500_v54, -inf  ;;  %v1040_v59 = vsel %vm302_vm0, %v2502_v55, -inf }
  0xf5   : > { %1032 = vmax.xlane.f32.xlu0 %v1031_v58  ;;  %v1037_v61 = vsel %vm302_vm0, %v2506_v57, -inf }
  0xf6   : > { %v2101_v60 = vpop.f32.mrb[2].mxu0 }
  0xf7   : > { %v2108_v63 = vpop.f32.mrb[2].mxu1  ;;  %v1004_v0 = vmul.f32 0.25, %v2101_v60  ;;  %v555_v1 = vpop.f32.mrb[3].mxu0 }
  0xf8   : > { %v1006_v4 = vmul.f32 0.25, %v2108_v63  ;;  %1041 = vmax.xlane.f32.xlu1 %v1040_v59  ;;  %v1003_v5 = vmul.f32 0.25, %v555_v1  ;;  %v642_v6 = vpop.f32.mrb[3].mxu1 }
  0xf9   : > { %1038 = vmax.xlane.f32.xlu0 %v1037_v61  ;;  %v1005_v8 = vmul.f32 0.25, %v642_v6  ;;  %v2526_v9 = vadd.f32 %v1004_v0, %v291_v62 }
  0xfa   : > { %v2528_v10 = vadd.f32 %v1006_v4, %v293_v2  ;;  %v2530_v11 = vadd.f32 %v1003_v5, %v290_v3 }
  0xfb   : > { %v1046_v12 = vsel %vm302_vm0, %v2526_v9, -inf  ;;  %v2534_v13 = vadd.f32 %v1005_v8, %v292_v7 }
  0xfc   : > { %v1052_v14 = vsel %vm302_vm0, %v2528_v10, -inf  ;;  %v1043_v17 = vsel %vm302_vm0, %v2530_v11, -inf }
  0xfd   : > { %1053 = vmax.xlane.f32.xlu1 %v1052_v14  ;;  %1047 = vmax.xlane.f32.xlu0 %v1046_v12  ;;  %v1049_v16 = vsel %vm302_vm0, %v2534_v13, -inf }
  0xfe   : > { %v2115_v15 = vpop.f32.mrb[4].mxu0 }
  0xff   : > { %v2122_v19 = vpop.f32.mrb[4].mxu1  ;;  %v1008_v20 = vmul.f32 0.25, %v2115_v15  ;;  %v729_v21 = vpop.f32.mrb[5].mxu0 }
 0x100   : > { %v1010_v24 = vmul.f32 0.25, %v2122_v19  ;;  %v1007_v25 = vmul.f32 0.25, %v729_v21  ;;  %v816_v26 = vpop.f32.mrb[5].mxu1 }
 0x101   : > { %1050 = vmax.xlane.f32.xlu1 %v1049_v16  ;;  %1044 = vmax.xlane.f32.xlu0 %v1043_v17  ;;  %v1009_v28 = vmul.f32 0.25, %v816_v26  ;;  %v2554_v29 = vadd.f32 %v1008_v20, %v295_v18 }
 0x102   : > { %v2556_v30 = vadd.f32 %v1010_v24, %v297_v22  ;;  %v2558_v31 = vadd.f32 %v1007_v25, %v294_v23 }
 0x103   : > { %v1058_v32 = vsel %vm302_vm0, %v2554_v29, -inf  ;;  %v2562_v33 = vadd.f32 %v1009_v28, %v296_v27 }
 0x104   : > { %v1064_v34 = vsel %vm302_vm0, %v2556_v30, -inf  ;;  %v1055_v37 = vsel %vm302_vm0, %v2558_v31, -inf }
 0x105   : > { %1065 = vmax.xlane.f32.xlu1 %v1064_v34  ;;  %1059 = vmax.xlane.f32.xlu0 %v1058_v32  ;;  %v1061_v36 = vsel %vm302_vm0, %v2562_v33, -inf }
 0x106   : > { %v2129_v35 = vpop.f32.mrb[6].mxu0 }
 0x107   : > { %v2136_v38 = vpop.f32.mrb[6].mxu1  ;;  %v903_v39 = vpop.f32.mrb[7].mxu0  ;;  %v1012_v41 = vmul.f32 0.25, %v2129_v35 }
 0x108   : > { %v1011_v42 = vmul.f32 0.25, %v903_v39  ;;  %v990_v43 = vpop.f32.mrb[7].mxu1  ;;  %v1014_v45 = vmul.f32 0.25, %v2136_v38 }
 0x109   : > { %v1013_v46 = vmul.f32 0.25, %v990_v43  ;;  %1062 = vmax.xlane.f32.xlu1 %v1061_v36  ;;  %1056 = vmax.xlane.f32.xlu0 %v1055_v37  ;;  %v2588_v52 = vadd.f32 %v1012_v41, %v299_v47 }
 0x10a   : > { %v2579_v48 = vadd.f32 %v1011_v42, %v298_v40  ;;  %v2592_v58 = vadd.f32 %v1014_v45, %v301_v49 }
 0x10b   : > { %v2584_v50 = vadd.f32 %v1013_v46, %v300_v44  ;;  %v1070_v59 = vsel %vm302_vm0, %v2588_v52, -inf }
 0x10c   : > { %v1067_v51 = vsel %vm302_vm0, %v2579_v48, -inf  ;;  %v1076_v60 = vsel %vm302_vm0, %v2592_v58, -inf }
 0x10d   : > { %v1073_v56 = vsel %vm302_vm0, %v2584_v50, -inf  ;;  %1068 = vmax.xlane.f32.xlu0 %v1067_v51 }
 0x10e   : > { %1074 = vmax.xlane.f32.xlu1 %v1073_v56 }
 0x111   : > { %1071 = vmax.xlane.f32.xlu0 %v1070_v59 }
 0x112   : > { %1077 = vmax.xlane.f32.xlu1 %v1076_v60 }
 0x181   : > { %v1036_v61 = vpop.xlane.xlu1 %1035 }
 0x182   : > { %v1080_v62 = vsub.f32 %v2498_v53, %v1036_v61  ;;  %v1033_v63 = vpop.xlane.xlu0 %1032 }
 0x183   : > { %v1079_v0 = vsub.f32 %v2500_v54, %v1033_v63 }
 0x184   : > { %v1097_v1 = vmul.f32 1.442695, %v1080_v62 }
 0x185   : > { %v1095_v2 = vmul.f32 1.442695, %v1079_v0  ;;  %v1042_v3 = vpop.xlane.xlu1 %1041 }
 0x186   : > { %2281 = vpow2.f32 %v1097_v1  ;;  %v1082_v4 = vsub.f32 %v2502_v55, %v1042_v3  ;;  %v1039_v5 = vpop.xlane.xlu0 %1038 }
 0x187   : > { %v1081_v6 = vsub.f32 %v2506_v57, %v1039_v5  ;;  %2283 = vpow2.f32 %v1095_v2 }
 0x188   : > { %v1101_v7 = vmul.f32 1.442695, %v1082_v4 }
 0x189   : > { %v1099_v8 = vmul.f32 1.442695, %v1081_v6 }
 0x18a   : > { %2285 = vpow2.f32 %v1101_v7  ;;  %v1054_v12 = vpop.xlane.xlu1 %1053  ;;  %v1048_v14 = vpop.xlane.xlu0 %1047 }
 0x18b   : > { %v1086_v53 = vsub.f32 %v2528_v10, %v1054_v12  ;;  %v1084_v15 = vsub.f32 %v2526_v9, %v1048_v14  ;;  %2287 = vpow2.f32 %v1099_v8  ;;  %v270_v8 = vld [vmem:[%s2672_s8] sm:$0xff]  ;;  %v271_v12 = vld [vmem:[%s2672_s8 + $0x8] sm:$0xff] }
 0x18d   : > { %v1109_v54 = vmul.f32 1.442695, %v1086_v53  ;;  %v1105_v16 = vmul.f32 1.442695, %v1084_v15  ;;  %v2241_v15 = vpack.c.bf16 %v271_v12, %v270_v8 }
 0x18e   : > { %v1051_v17 = vpop.xlane.xlu1 %1050  ;;  %v1045_v18 = vpop.xlane.xlu0 %1044 }
 0x18f   : > { %2289 = vpow2.f32 %v1109_v54  ;;  %v1085_v55 = vsub.f32 %v2534_v13, %v1051_v17  ;;  %v1083_v57 = vsub.f32 %v2530_v11, %v1045_v18  ;;  %2242 = vmatprep.subr.bf16.mxu0 %v2241_v15  ;;  %v272_v17 = vld [vmem:[%s2672_s8 + $0x10] sm:$0xff]  ;;  %v273_v18 = vld [vmem:[%s2672_s8 + $0x18] sm:$0xff] }
 0x190   : > { %v2606_v19 = vpop.eup %2281  ;;  %2291 = vpow2.f32 %v1105_v16  ;;  %2244 = vmatpush3.bf16.msra.mxu0 %v2241_v15 }
 0x191   : > { %v1107_v20 = vmul.f32 1.442695, %v1085_v55  ;;  %v1103_v21 = vmul.f32 1.442695, %v1083_v57  ;;  %v1130_v10 = vsel %vm302_vm0, %v2606_v19, 0.0  ;;  %v2610_v22 = vpop.eup %2283  ;;  %v2245_v57 = vpack.c.bf16 %v273_v18, %v272_v17 }
 0x192   : > { %v1066_v9 = vpop.xlane.xlu1 %1065  ;;  %v1060_v23 = vpop.xlane.xlu0 %1059  ;;  %1131 = vadd.xlane.f32.xlu0 %v1130_v10  ;;  %v1127_v28 = vsel %vm302_vm0, %v2610_v22, 0.0 }
 0x193   : > { %2293 = vpow2.f32 %v1107_v20  ;;  %v1090_v24 = vsub.f32 %v2556_v30, %v1066_v9  ;;  %v1088_v13 = vsub.f32 %v2554_v29, %v1060_v23  ;;  %2246 = vmatprep.subr.bf16.mxu1 %v2245_v57  ;;  %v274_v20 = vld [vmem:[%s2672_s8 + $0x20] sm:$0xff]  ;;  %v276_v9 = vld [vmem:[%s2672_s8 + $0x30] sm:$0xff]  ;;  %v277_v23 = vld [vmem:[%s2672_s8 + $0x38] sm:$0xff] }
 0x194   : > { %v2614_v25 = vpop.eup %2285  ;;  %2295 = vpow2.f32 %v1103_v21  ;;  %2248 = vmatpush3.bf16.msra.mxu1 %v2245_v57  ;;  %v275_v21 = vld [vmem:[%s2672_s8 + $0x28] sm:$0xff] }
 0x195   : > { %v1117_v11 = vmul.f32 1.442695, %v1090_v24  ;;  %v1113_v26 = vmul.f32 1.442695, %v1088_v13  ;;  %v1136_v27 = vsel %vm302_vm0, %v2614_v25, 0.0  ;;  %v2620_v32 = vpop.eup %2287  ;;  %v2249_v10 = vpack.c.bf16 %v275_v21, %v274_v20 }
 0x196   : > { %v1063_v34 = vpop.xlane.xlu1 %1062  ;;  %1137 = vadd.xlane.f32.xlu1 %v1136_v27  ;;  %v1057_v35 = vpop.xlane.xlu0 %1056  ;;  %1128 = vadd.xlane.f32.xlu0 %v1127_v28  ;;  %v1133_v39 = vsel %vm302_vm0, %v2620_v32, 0.0  ;;  %v2253_v24 = vpack.c.bf16 %v277_v23, %v276_v9 }
 0x197   : > { %2297 = vpow2.f32 %v1117_v11  ;;  %v1089_v29 = vsub.f32 %v2562_v33, %v1063_v34  ;;  %v1087_v30 = vsub.f32 %v2558_v31, %v1057_v35  ;;  %2250 = vmatprep.subr.bf16.mxu0 %v2249_v10 }
 0x198   : > { %2299 = vpow2.f32 %v1113_v26  ;;  %2254 = vmatprep.subr.bf16.mxu1 %v2253_v24 }
 0x199   : > { %v2624_v36 = vpop.eup %2289  ;;  %v1115_v37 = vmul.f32 1.442695, %v1089_v29  ;;  %v1111_v38 = vmul.f32 1.442695, %v1087_v30  ;;  %v278_v30 = vld [vmem:[%s2672_s8 + $0x40] sm:$0xff] }
 0x19a   : > { %v2628_v40 = vpop.eup %2291  ;;  %1134 = vadd.xlane.f32.xlu1 %v1133_v39  ;;  %v1069_v41 = vpop.xlane.xlu0 %1068  ;;  %v1148_v46 = vsel %vm302_vm0, %v2624_v36, 0.0 }
 0x19b   : > { %2301 = vpow2.f32 %v1115_v37  ;;  %v1075_v42 = vpop.xlane.xlu1 %1074  ;;  %v1091_v43 = vsub.f32 %v2579_v48, %v1069_v41  ;;  %v1142_v33 = vsel %vm302_vm0, %v2628_v40, 0.0  ;;  %v279_v37 = vld [vmem:[%s2672_s8 + $0x48] sm:$0xff] }
 0x19c   : > { %2303 = vpow2.f32 %v1111_v38  ;;  %v1093_v31 = vsub.f32 %v2584_v50, %v1075_v42  ;;  %1143 = vadd.xlane.f32.xlu0 %v1142_v33 }
 0x19d   : > { %v2634_v44 = vpop.eup %2293  ;;  %v1119_v45 = vmul.f32 1.442695, %v1091_v43 }
 0x19e   : > { %v2638_v47 = vpop.eup %2295  ;;  %v1123_v49 = vmul.f32 1.442695, %v1093_v31  ;;  %1149 = vadd.xlane.f32.xlu1 %v1148_v46  ;;  %v1072_v51 = vpop.xlane.xlu0 %1071  ;;  %v1145_v62 = vsel %vm302_vm0, %v2634_v44, 0.0  ;;  %v2257_v31 = vpack.c.bf16 %v279_v37, %v278_v30  ;;  %v281_v46 = vld [vmem:[%s2672_s8 + $0x58] sm:$0xff] }
 0x19f   : > { %2305 = vpow2.f32 %v1119_v45  ;;  %v1078_v48 = vpop.xlane.xlu1 %1077  ;;  %v1092_v56 = vsub.f32 %v2588_v52, %v1072_v51  ;;  %v1139_v59 = vsel %vm302_vm0, %v2638_v47, 0.0  ;;  %v280_v45 = vld [vmem:[%s2672_s8 + $0x50] sm:$0xff] }
 0x1a0   : > { %2307 = vpow2.f32 %v1123_v49  ;;  %v1094_v50 = vsub.f32 %v2592_v58, %v1078_v48  ;;  %1140 = vadd.xlane.f32.xlu0 %v1139_v59 }
 0x1a1   : > { %v2644_v60 = vpop.eup %2297  ;;  %v1121_v61 = vmul.f32 1.442695, %v1092_v56 }
 0x1a2   : > { %v2648_v63 = vpop.eup %2299  ;;  %v1125_v0 = vmul.f32 1.442695, %v1094_v50  ;;  %1146 = vadd.xlane.f32.xlu1 %v1145_v62  ;;  %v1160_v58 = vsel %vm302_vm0, %v2644_v60, 0.0 }
 0x1a3   : > { %2309 = vpow2.f32 %v1121_v61  ;;  %v1154_v52 = vsel %vm302_vm0, %v2648_v63, 0.0  ;;  %v282_v61 = vld [vmem:[%s2672_s8 + $0x60] sm:$0xff] }
 0x1a4   : > { %2311 = vpow2.f32 %v1125_v0  ;;  %1155 = vadd.xlane.f32.xlu0 %v1154_v52 }
 0x1a5   : > { %v2652_v1 = vpop.eup %2301 }
 0x1a6   : > { %v2656_v2 = vpop.eup %2303  ;;  %1161 = vadd.xlane.f32.xlu1 %v1160_v58  ;;  %v1157_v5 = vsel %vm302_vm0, %v2652_v1, 0.0  ;;  %v284_v58 = vld [vmem:[%s2672_s8 + $0x70] sm:$0xff] }
 0x1a7   : > { %v1151_v3 = vsel %vm302_vm0, %v2656_v2, 0.0 }
 0x1a8   : > { %1152 = vadd.xlane.f32.xlu0 %v1151_v3  ;;  %v285_v3 = vld [vmem:[%s2672_s8 + $0x78] sm:$0xff] }
 0x1a9   : > { %v2660_v4 = vpop.eup %2305 }
 0x1aa   : > { %v2664_v6 = vpop.eup %2307  ;;  %1158 = vadd.xlane.f32.xlu1 %v1157_v5  ;;  %v1163_v7 = vsel %vm302_vm0, %v2660_v4, 0.0 }
 0x1ab   : > { %v1169_v53 = vsel %vm302_vm0, %v2664_v6, 0.0 }
 0x1ac   : > { %1164 = vadd.xlane.f32.xlu0 %v1163_v7 }
 0x1ad   : > { %v2676_v14 = vpop.eup %2309 }
 0x1ae   : > { %v2680_v54 = vpop.eup %2311  ;;  %1170 = vadd.xlane.f32.xlu1 %v1169_v53  ;;  %v1166_v16 = vsel %vm302_vm0, %v2676_v14, 0.0 }
 0x1af   : > { %v1172_v55 = vsel %vm302_vm0, %v2680_v54, 0.0 }
 0x1b0   : > { %1167 = vadd.xlane.f32.xlu0 %v1166_v16  ;;  %v2269_v16 = vpack.c.bf16 %v285_v3, %v284_v58 }
 0x1b2   : > { %1173 = vadd.xlane.f32.xlu1 %v1172_v55 }
 0x21f   : > { %v1132_v13 = vpop.xlane.xlu0 %1131 }
 0x220   : > { %2313 = vrcp.f32 %v1132_v13 }
 0x223   : > { %v1138_v11 = vpop.xlane.xlu1 %1137  ;;  %v1129_v26 = vpop.xlane.xlu0 %1128 }
 0x224   : > { %2315 = vrcp.f32 %v1129_v26 }
 0x225   : > { %2317 = vrcp.f32 %v1138_v11 }
 0x227   : > { %v1135_v27 = vpop.xlane.xlu1 %1134 }
 0x228   : > { %2319 = vrcp.f32 %v1135_v27 }
 0x229   : > { %v1144_v28 = vpop.xlane.xlu0 %1143 }
 0x22a   : > { %2321 = vrcp.f32 %v1144_v28  ;;  %v2314_v29 = vpop.eup %2313 }
 0x22b   : > { %v1150_v34 = vpop.xlane.xlu1 %1149  ;;  %v1192_v43 = vmul.f32 %v2314_v29, %v2606_v19 }
 0x22d   : > { %v1141_v35 = vpop.xlane.xlu0 %1140 }
 0x22e   : > { %2323 = vrcp.f32 %v1141_v35  ;;  %v2316_v38 = vpop.eup %2315 }
 0x22f   : > { %2325 = vrcp.f32 %v1150_v34  ;;  %v1147_v39 = vpop.xlane.xlu1 %1146  ;;  %v1191_v41 = vmul.f32 %v2316_v38, %v2610_v22  ;;  %v2318_v42 = vpop.eup %2317  ;;  %v2261_v22 = vpack.c.bf16 %v281_v46, %v280_v45 }
 0x230   : > { %2327 = vrcp.f32 %v1147_v39  ;;  %v1194_v56 = vmul.f32 %v2318_v42, %v2614_v25 }
 0x231   : > { %v1156_v33 = vpop.xlane.xlu0 %1155  ;;  %2141 = vmatprep.mubr.msk.f32.mxu0 %vm302_vm0, %v1191_v41 }
 0x232   : > { %v2320_v49 = vpop.eup %2319  ;;  %2142 = vmatmul.mubr.msk.f32.vlgmr.msra.gmra.mrb[8].mxu0 %vm302_vm0, %v1192_v43  ;;  %2329 = vrcp.f32 %v1156_v33 }
 0x233   : > { %v1162_v51 = vpop.xlane.xlu1 %1161  ;;  %v1193_v48 = vmul.f32 %v2320_v49, %v2620_v32  ;;  %2252 = vmatpush3.bf16.msra.mxu0 %v2249_v10  ;;  %v283_v32 = vld [vmem:[%s2672_s8 + $0x68] sm:$0xff] }
 0x234   : > { %2258 = vmatprep.subr.bf16.mxu0 %v2257_v31  ;;  %v2322_v59 = vpop.eup %2321  ;;  %v2265_v8 = vpack.c.bf16 %v283_v32, %v282_v61 }
 0x235   : > { %v1153_v19 = vpop.xlane.xlu0 %1152  ;;  %2148 = vmatprep.mubr.msk.f32.mxu1 %vm302_vm0, %v1193_v48  ;;  %v1196_v7 = vmul.f32 %v2322_v59, %v2628_v40 }
 0x236   : > { %2331 = vrcp.f32 %v1153_v19  ;;  %2149 = vmatmul.mubr.msk.f32.vlgmr.msra.gmra.mrb[8].mxu1 %vm302_vm0, %v1194_v56 }
 0x237   : > { %2333 = vrcp.f32 %v1162_v51  ;;  %v1159_v50 = vpop.xlane.xlu1 %1158  ;;  %2256 = vmatpush3.bf16.msra.mxu1 %v2253_v24 }
 0x238   : > { %v2324_v62 = vpop.eup %2323  ;;  %2335 = vrcp.f32 %v1159_v50  ;;  %2262 = vmatprep.subr.bf16.mxu1 %v2261_v22 }
 0x239   : > { %v2326_v25 = vpop.eup %2325  ;;  %v1165_v0 = vpop.xlane.xlu0 %1164  ;;  %v1195_v52 = vmul.f32 %v2324_v62, %v2638_v47 }
 0x23a   : > { %v2328_v5 = vpop.eup %2327  ;;  %2337 = vrcp.f32 %v1165_v0  ;;  %v1198_v15 = vmul.f32 %v2326_v25, %v2624_v36 }
 0x23b   : > { %2155 = vmatprep.mubr.msk.f32.mxu0 %vm302_vm0, %v1195_v52  ;;  %v1171_v12 = vpop.xlane.xlu1 %1170  ;;  %v1197_v53 = vmul.f32 %v2328_v5, %v2634_v44 }
 0x23c   : > { %2339 = vrcp.f32 %v1171_v12  ;;  %2156 = vmatmul.mubr.msk.f32.vlgmr.msra.gmra.mrb[10].mxu0 %vm302_vm0, %v1196_v7  ;;  %v2330_v40 = vpop.eup %2329 }
 0x23d   : > { %v1168_v17 = vpop.xlane.xlu0 %1167  ;;  %2162 = vmatprep.mubr.msk.f32.mxu1 %vm302_vm0, %v1197_v53  ;;  %2260 = vmatpush3.bf16.msra.mxu0 %v2257_v31  ;;  %v1200_v57 = vmul.f32 %v2330_v40, %v2648_v63 }
 0x23e   : > { %2341 = vrcp.f32 %v1168_v17  ;;  %2163 = vmatmul.mubr.msk.f32.vlgmr.msra.gmra.mrb[10].mxu1 %vm302_vm0, %v1198_v15  ;;  %2266 = vmatprep.subr.bf16.mxu0 %v2265_v8 }
 0x23f   : > { %v1174_v47 = vpop.xlane.xlu1 %1173  ;;  %2264 = vmatpush3.bf16.msra.mxu1 %v2261_v22 }
 0x240   : > { %v2332_v18 = vpop.eup %2331  ;;  %2343 = vrcp.f32 %v1174_v47  ;;  %2270 = vmatprep.subr.bf16.mxu1 %v2269_v16 }
 0x241   : > { %v2334_v44 = vpop.eup %2333  ;;  %v1199_v36 = vmul.f32 %v2332_v18, %v2656_v2 }
 0x242   : > { %v2336_v55 = vpop.eup %2335  ;;  %v1202_v10 = vmul.f32 %v2334_v44, %v2644_v60 }
 0x243   : > { %2169 = vmatprep.mubr.msk.f32.mxu0 %vm302_vm0, %v1199_v36  ;;  %v1201_v20 = vmul.f32 %v2336_v55, %v2652_v1 }
 0x244   : > { %v2338_v21 = vpop.eup %2337  ;;  %2170 = vmatmul.mubr.msk.f32.vlgmr.msra.gmra.mrb[12].mxu0 %vm302_vm0, %v1200_v57 }
 0x245   : > { %2176 = vmatprep.mubr.msk.f32.mxu1 %vm302_vm0, %v1201_v20  ;;  %v1203_v9 = vmul.f32 %v2338_v21, %v2660_v4  ;;  %2268 = vmatpush3.bf16.msra.mxu0 %v2265_v8 }
 0x246   : > { %v2340_v23 = vpop.eup %2339  ;;  %2177 = vmatmul.mubr.msk.f32.vlgmr.msra.gmra.mrb[12].mxu1 %vm302_vm0, %v1202_v10 }
 0x247   : > { %2183 = vmatprep.mubr.msk.f32.mxu0 %vm302_vm0, %v1203_v9  ;;  %2272 = vmatpush3.bf16.msra.mxu1 %v2269_v16  ;;  %v1205_v63 = vmul.f32 %v2340_v23, %v2664_v6 }
 0x248   : > { %v2342_v1 = vpop.eup %2341 }
 0x249   : > { %v1204_v2 = vmul.f32 %v2342_v1, %v2676_v14  ;;  %2190 = vmatprep.mubr.msk.f32.mxu1 %vm302_vm0, %v1205_v63 }
 0x24a   : > { %v2344_v60 = vpop.eup %2343 }
 0x24b   : > { %v1206_v24 = vmul.f32 %v2344_v60, %v2680_v54  ;;  %2184 = vmatmul.mubr.msk.f32.vlgmr.msra.gmra.mrb[14].mxu0 %vm302_vm0, %v1204_v2 }
 0x24d   : > { %2191 = vmatmul.mubr.msk.f32.vlgmr.msra.gmra.mrb[14].mxu1 %vm302_vm0, %v1206_v24 }
 0x305   : > { %v2143_v4 = vpop.f32.mrb[8].mxu0 }
 0x306   : > { %1856 = vst.msk [vmem:[%s2736_s11 + $0x8] sm:$0xff] %vm302_vm0, %v2143_v4  ;;  %v1279_v6 = vpop.f32.mrb[9].mxu0 }
 0x307   : > { %1855 = vst.msk [vmem:[%s2736_s11] sm:$0xff] %vm302_vm0, %v1279_v6 }
 0x309   : > { %v2150_v14 = vpop.f32.mrb[8].mxu1 }
 0x30a   : > { %1858 = vst.msk [vmem:[%s2736_s11 + $0x18] sm:$0xff] %vm302_vm0, %v2150_v14  ;;  %v1360_v54 = vpop.f32.mrb[9].mxu1 }
 0x30b   : > { %1857 = vst.msk [vmem:[%s2736_s11 + $0x10] sm:$0xff] %vm302_vm0, %v1360_v54 }
 0x30f   : > { %v2157_v13 = vpop.f32.mrb[10].mxu0 }
 0x310   : > { %1860 = vst.msk [vmem:[%s2736_s11 + $0x28] sm:$0xff] %vm302_vm0, %v2157_v13  ;;  %v1441_v11 = vpop.f32.mrb[11].mxu0 }
 0x311   : > { %1859 = vst.msk [vmem:[%s2736_s11 + $0x20] sm:$0xff] %vm302_vm0, %v1441_v11  ;;  %v2164_v26 = vpop.f32.mrb[10].mxu1 }
 0x312   : > { %1862 = vst.msk [vmem:[%s2736_s11 + $0x38] sm:$0xff] %vm302_vm0, %v2164_v26  ;;  %v1522_v27 = vpop.f32.mrb[11].mxu1 }
 0x313   : > { %1861 = vst.msk [vmem:[%s2736_s11 + $0x30] sm:$0xff] %vm302_vm0, %v1522_v27 }
 0x317   : > { %v2171_v28 = vpop.f32.mrb[12].mxu0 }
 0x318   : > { %1864 = vst.msk [vmem:[%s2736_s11 + $0x48] sm:$0xff] %vm302_vm0, %v2171_v28  ;;  %v1603_v34 = vpop.f32.mrb[13].mxu0 }
 0x319   : > { %1863 = vst.msk [vmem:[%s2736_s11 + $0x40] sm:$0xff] %vm302_vm0, %v1603_v34  ;;  %v2178_v35 = vpop.f32.mrb[12].mxu1 }
 0x31a   : > { %1866 = vst.msk [vmem:[%s2736_s11 + $0x58] sm:$0xff] %vm302_vm0, %v2178_v35  ;;  %v1684_v29 = vpop.f32.mrb[13].mxu1 }
 0x31b   : > { %1865 = vst.msk [vmem:[%s2736_s11 + $0x50] sm:$0xff] %vm302_vm0, %v1684_v29 }
 0x31e   : > { %v2185_v30 = vpop.f32.mrb[14].mxu0 }
 0x31f   : > { %1868 = vst.msk [vmem:[%s2736_s11 + $0x68] sm:$0xff] %vm302_vm0, %v2185_v30  ;;  %v1765_v37 = vpop.f32.mrb[15].mxu0 }
 0x320   : > { %1867 = vst.msk [vmem:[%s2736_s11 + $0x60] sm:$0xff] %vm302_vm0, %v1765_v37  ;;  %v2192_v38 = vpop.f32.mrb[14].mxu1 }
 0x321   : > { %1870 = vst.msk [vmem:[%s2736_s11 + $0x78] sm:$0xff] %vm302_vm0, %v2192_v38  ;;  %v1846_v39 = vpop.f32.mrb[15].mxu1 }
 0x322   : > { %1869 = vst.msk [vmem:[%s2736_s11 + $0x70] sm:$0xff] %vm302_vm0, %v1846_v39 }
 0x323 PF: > { %s14_s15 = sadd.s32 1, %s2351_s15  }
 0x324   : > { %p11_p4 = scmp.ge.s32.totalorder %s14_s15, 4  }
 0x326   :  { %13 = sbr.rel (!%p11_p4) target bundleno = 1 (0x1), region = 72 }

// kernel: _lambda_.14
= control target key start
LH: loop header
LB: loop body
LE: loop exit
PB: predicated region body
PF: predicated region fallthrough
CT: control target
= control target key end

     0   :  { %vm21_vm0 = vcmask 261120   ;;  %v476_v3 = vmov 0.0   ;;  %s743_s1 = inlined_call_operand.vmem [shape: f32[32,32], index: 1, kind: input, shape index: {}]   ;;  %s744_s0 = inlined_call_operand.vmem [shape: f32[128,32], index: 0, kind: input, shape index: {}]   ;;  %s745_s2 = inlined_call_operand.vmem [shape: f32[1,32], index: 2, kind: input, shape index: {}]   ;;  %s746_s3 = inlined_call_operand.vmem [shape: f32[128,32], index: 3, kind: input, shape index: {}]   ;;  %s747_s4 = inlined_call_operand.vmem [shape: f32[128,32], index: 4, kind: output, shape index: {}]  }
   0x1   :  { %v70_v0 = vld [vmem:[%s743_s1] sm:$0xff]  ;;  %v71_v1 = vld [vmem:[%s743_s1 + $0x8] sm:$0xff]  ;;  %v72_v2 = vld [vmem:[%s743_s1 + $0x10] sm:$0xff]  ;;  %23 = vst.msk [vmem:[#allocation2 + $0x8] sm:$0xff] %vm21_vm0, %v476_v3 }
   0x2   :  { %22 = vst.msk [vmem:[#allocation2] sm:$0xff] %vm21_vm0, %v476_v3  ;;  %24 = vst.msk [vmem:[#allocation2 + $0x10] sm:$0xff] %vm21_vm0, %v476_v3  ;;  %v463_v4 = vpack.c.bf16 %v71_v1, %v70_v0  ;;  %v73_v5 = vld [vmem:[%s743_s1 + $0x18] sm:$0xff]  ;;  %v54_v6 = vld [vmem:[%s744_s0] sm:$0xff] }
   0x3   :  { %25 = vst.msk [vmem:[#allocation2 + $0x18] sm:$0xff] %vm21_vm0, %v476_v3  ;;  %26 = vst.msk [vmem:[#allocation2 + $0x20] sm:$0xff] %vm21_vm0, %v476_v3  ;;  %v62_v7 = vld [vmem:[%s744_s0 + $0x40] sm:$0xff]  ;;  %v467_v8 = vpack.c.bf16 %v73_v5, %v72_v2  ;;  %439 = vmatprep.mubr.msk.f32.mxu0 %vm21_vm0, %v54_v6  ;;  %v55_v9 = vld [vmem:[%s744_s0 + $0x8] sm:$0xff] }
   0x4   :  { %27 = vst.msk [vmem:[#allocation2 + $0x28] sm:$0xff] %vm21_vm0, %v476_v3  ;;  %28 = vst.msk [vmem:[#allocation2 + $0x30] sm:$0xff] %vm21_vm0, %v476_v3  ;;  %451 = vmatprep.mubr.msk.f32.mxu1 %vm21_vm0, %v62_v7  ;;  %464 = vmatprep.subr.bf16.mxu0 %v463_v4  ;;  %v63_v10 = vld [vmem:[%s744_s0 + $0x48] sm:$0xff]  ;;  %v56_v11 = vld [vmem:[%s744_s0 + $0x10] sm:$0xff] }
   0x5   :  { %29 = vst.msk [vmem:[#allocation2 + $0x38] sm:$0xff] %vm21_vm0, %v476_v3  ;;  %30 = vst.msk [vmem:[#allocation2 + $0x40] sm:$0xff] %vm21_vm0, %v476_v3  ;;  %471 = vmatprep.subr.bf16.mxu1 %v463_v4  ;;  %466 = vmatpush3.bf16.msra.mxu0 %v463_v4  ;;  %v64_v12 = vld [vmem:[%s744_s0 + $0x50] sm:$0xff]  ;;  %v57_v13 = vld [vmem:[%s744_s0 + $0x18] sm:$0xff] }
   0x6   :  { %31 = vst.msk [vmem:[#allocation2 + $0x48] sm:$0xff] %vm21_vm0, %v476_v3  ;;  %32 = vst.msk [vmem:[#allocation2 + $0x50] sm:$0xff] %vm21_vm0, %v476_v3  ;;  %473 = vmatpush3.bf16.msra.mxu1 %v463_v4  ;;  %468 = vmatprep.subr.bf16.mxu0 %v467_v8  ;;  %v65_v14 = vld [vmem:[%s744_s0 + $0x58] sm:$0xff]  ;;  %v58_v15 = vld [vmem:[%s744_s0 + $0x20] sm:$0xff] }
   0x7   :  { %33 = vst.msk [vmem:[#allocation2 + $0x58] sm:$0xff] %vm21_vm0, %v476_v3  ;;  %34 = vst.msk [vmem:[#allocation2 + $0x60] sm:$0xff] %vm21_vm0, %v476_v3  ;;  %472 = vmatprep.subr.bf16.mxu1 %v467_v8  ;;  %v66_v16 = vld [vmem:[%s744_s0 + $0x60] sm:$0xff]  ;;  %v59_v17 = vld [vmem:[%s744_s0 + $0x28] sm:$0xff] }
   0x8   :  { %35 = vst.msk [vmem:[#allocation2 + $0x68] sm:$0xff] %vm21_vm0, %v476_v3  ;;  %36 = vst.msk [vmem:[#allocation2 + $0x70] sm:$0xff] %vm21_vm0, %v476_v3  ;;  %v67_v18 = vld [vmem:[%s744_s0 + $0x68] sm:$0xff]  ;;  %v60_v19 = vld [vmem:[%s744_s0 + $0x30] sm:$0xff] }
   0x9   :  { %37 = vst.msk [vmem:[#allocation2 + $0x78] sm:$0xff] %vm21_vm0, %v476_v3  ;;  %470 = vmatpush3.bf16.msra.mxu0 %v467_v8  ;;  %v68_v20 = vld [vmem:[%s744_s0 + $0x70] sm:$0xff]  ;;  %v61_v21 = vld [vmem:[%s744_s0 + $0x38] sm:$0xff]  ;;  %v39_v23 = vld [vmem:[#allocation2 + $0x8] sm:$0xff] }
   0xa   :  { %474 = vmatpush3.bf16.msra.mxu1 %v467_v8  ;;  %v69_v22 = vld [vmem:[%s744_s0 + $0x78] sm:$0xff]  ;;  %v38_v25 = vld [vmem:[#allocation2] sm:$0xff]  ;;  %v40_v37 = vld [vmem:[#allocation2 + $0x10] sm:$0xff] }
   0xb   :  { %v41_v35 = vld [vmem:[#allocation2 + $0x18] sm:$0xff]  ;;  %v43_v47 = vld [vmem:[#allocation2 + $0x28] sm:$0xff]  ;;  %v601_v49 = vld [vmem:[%s745_s2] ss:$0 sm:$0xff] }
   0xc   :  { %440 = vmatmul.mubr.msk.f32.vlgmr.msra.gmra.mrb[0].mxu0 %vm21_vm0, %v55_v9  ;;  %v46_v26 = vld [vmem:[#allocation2 + $0x40] sm:$0xff]  ;;  %v343_v52 = vld [vmem:[%s746_s3 + $0x8] sm:$0xff]  ;;  %v45_v56 = vld [vmem:[#allocation2 + $0x38] sm:$0xff] }
   0xd   :  { %452 = vmatmul.mubr.msk.f32.vlgmr.msra.gmra.mrb[0].mxu1 %vm21_vm0, %v63_v10  ;;  %442 = vmatprep.mubr.msk.f32.mxu0 %vm21_vm0, %v56_v11  ;;  %v47_v24 = vld [vmem:[#allocation2 + $0x48] sm:$0xff]  ;;  %v48_v38 = vld [vmem:[#allocation2 + $0x50] sm:$0xff]  ;;  %v42_v50 = vld [vmem:[#allocation2 + $0x20] sm:$0xff] }
   0xe   :  { %454 = vmatprep.mubr.msk.f32.mxu1 %vm21_vm0, %v64_v12  ;;  %v49_v36 = vld [vmem:[#allocation2 + $0x58] sm:$0xff]  ;;  %v50_v51 = vld [vmem:[#allocation2 + $0x60] sm:$0xff]  ;;  %v351_v53 = vld [vmem:[%s746_s3 + $0x48] sm:$0xff] }
   0xf   :  { %v51_v48 = vld [vmem:[#allocation2 + $0x68] sm:$0xff]  ;;  %v342_v57 = vld [vmem:[%s746_s3] sm:$0xff]  ;;  %v44_v4 = vld [vmem:[#allocation2 + $0x30] sm:$0xff] }
  0x10   :  { %443 = vmatmul.mubr.msk.f32.gmra.mrb[2].mxu0 %vm21_vm0, %v57_v13  ;;  %v350_v58 = vld [vmem:[%s746_s3 + $0x40] sm:$0xff]  ;;  %v53_v63 = vld [vmem:[#allocation2 + $0x78] sm:$0xff]  ;;  %v52_v9 = vld [vmem:[#allocation2 + $0x70] sm:$0xff] }
  0x11   :  { %455 = vmatmul.mubr.msk.f32.gmra.mrb[2].mxu1 %vm21_vm0, %v65_v14  ;;  %445 = vmatprep.mubr.msk.f32.mxu0 %vm21_vm0, %v58_v15 }
  0x12   :  { %457 = vmatprep.mubr.msk.f32.mxu1 %vm21_vm0, %v66_v16  ;;  %v345_v16 = vld [vmem:[%s746_s3 + $0x18] sm:$0xff] }
  0x14   :  { %446 = vmatmul.mubr.msk.f32.gmra.mrb[4].mxu0 %vm21_vm0, %v59_v17  ;;  %v353_v17 = vld [vmem:[%s746_s3 + $0x58] sm:$0xff] }
  0x15   :  { %458 = vmatmul.mubr.msk.f32.gmra.mrb[4].mxu1 %vm21_vm0, %v67_v18  ;;  %448 = vmatprep.mubr.msk.f32.mxu0 %vm21_vm0, %v60_v19 }
  0x16   :  { %460 = vmatprep.mubr.msk.f32.mxu1 %vm21_vm0, %v68_v20 }
  0x18   :  { %449 = vmatmul.mubr.msk.f32.gmra.mrb[6].mxu0 %vm21_vm0, %v61_v21 }
  0x19   :  { %461 = vmatmul.mubr.msk.f32.gmra.mrb[6].mxu1 %vm21_vm0, %v69_v22 }
  0xdf   :  { %v441_v27 = vpop.f32.mrb[0].mxu0 }
  0xe0   :  { %v453_v28 = vpop.f32.mrb[0].mxu1  ;;  %v269_v29 = vadd.f32 %v441_v27, %v39_v23  ;;  %v189_v31 = vpop.f32.mrb[1].mxu0 }
  0xe1   :  { %v277_v30 = vadd.f32 %v453_v28, %v47_v24  ;;  %v229_v32 = vpop.f32.mrb[1].mxu1  ;;  %v268_v33 = vadd.f32 %v189_v31, %v38_v25 }
  0xe2   :  { %v276_v34 = vadd.f32 %v229_v32, %v46_v26  ;;  %285 = vst.msk [vmem:[#allocation2 + $0x8] sm:$0xff] %vm21_vm0, %v269_v29  ;;  %v344_v26 = vld [vmem:[%s746_s3 + $0x10] sm:$0xff] }
  0xe3   :  { %293 = vst.msk [vmem:[#allocation2 + $0x48] sm:$0xff] %vm21_vm0, %v277_v30  ;;  %284 = vst.msk [vmem:[#allocation2] sm:$0xff] %vm21_vm0, %v268_v33  ;;  %v444_v39 = vpop.f32.mrb[2].mxu0  ;;  %v352_v33 = vld [vmem:[%s746_s3 + $0x50] sm:$0xff] }
  0xe4   :  { %292 = vst.msk [vmem:[#allocation2 + $0x40] sm:$0xff] %vm21_vm0, %v276_v34  ;;  %v456_v40 = vpop.f32.mrb[2].mxu1  ;;  %v271_v41 = vadd.f32 %v444_v39, %v41_v35  ;;  %v199_v43 = vpop.f32.mrb[3].mxu0  ;;  %v355_v39 = vld [vmem:[%s746_s3 + $0x68] sm:$0xff] }
  0xe5   :  { %v279_v42 = vadd.f32 %v456_v40, %v49_v36  ;;  %v239_v44 = vpop.f32.mrb[3].mxu1  ;;  %v270_v45 = vadd.f32 %v199_v43, %v40_v37 }
  0xe6   :  { %v278_v46 = vadd.f32 %v239_v44, %v48_v38  ;;  %287 = vst.msk [vmem:[#allocation2 + $0x18] sm:$0xff] %vm21_vm0, %v271_v41  ;;  %v347_v38 = vld [vmem:[%s746_s3 + $0x28] sm:$0xff]  ;;  %v346_v44 = vld [vmem:[%s746_s3 + $0x20] sm:$0xff] }
  0xe7   :  { %295 = vst.msk [vmem:[#allocation2 + $0x58] sm:$0xff] %vm21_vm0, %v279_v42  ;;  %286 = vst.msk [vmem:[#allocation2 + $0x10] sm:$0xff] %vm21_vm0, %v270_v45  ;;  %v447_v54 = vpop.f32.mrb[4].mxu0 }
  0xe8   :  { %294 = vst.msk [vmem:[#allocation2 + $0x50] sm:$0xff] %vm21_vm0, %v278_v46  ;;  %v459_v55 = vpop.f32.mrb[4].mxu1  ;;  %v273_v59 = vadd.f32 %v447_v54, %v43_v47  ;;  %v209_v61 = vpop.f32.mrb[5].mxu0 }
  0xe9   :  { %v281_v60 = vadd.f32 %v459_v55, %v51_v48  ;;  %v249_v62 = vpop.f32.mrb[5].mxu1  ;;  %v304_v0 = vld [vmem:[#allocation2 + $0x8] sm:$0xff]  ;;  %v272_v2 = vadd.f32 %v209_v61, %v42_v50  ;;  %v354_v50 = vld [vmem:[%s746_s3 + $0x60] sm:$0xff]  ;;  %v349_v55 = vld [vmem:[%s746_s3 + $0x38] sm:$0xff] }
  0xea   :  { %v312_v1 = vld [vmem:[#allocation2 + $0x48] sm:$0xff]  ;;  %v280_v3 = vadd.f32 %v249_v62, %v50_v51  ;;  %v327_v5 = vadd.f32 %v601_v49, %v304_v0  ;;  %v303_v7 = vld [vmem:[#allocation2] sm:$0xff]  ;;  %289 = vst.msk [vmem:[#allocation2 + $0x28] sm:$0xff] %vm21_vm0, %v273_v59  ;;  %v348_v61 = vld [vmem:[%s746_s3 + $0x30] sm:$0xff] }
  0xeb   :  { %v335_v6 = vadd.f32 %v601_v49, %v312_v1  ;;  %v311_v8 = vld [vmem:[#allocation2 + $0x40] sm:$0xff]  ;;  %297 = vst.msk [vmem:[#allocation2 + $0x68] sm:$0xff] %vm21_vm0, %v281_v60  ;;  %v326_v10 = vadd.f32 %v601_v49, %v303_v7  ;;  %288 = vst.msk [vmem:[#allocation2 + $0x20] sm:$0xff] %vm21_vm0, %v272_v2  ;;  %v450_v12 = vpop.f32.mrb[6].mxu0  ;;  %v356_v2 = vld [vmem:[%s746_s3 + $0x70] sm:$0xff] }
  0xec   :  { %v334_v11 = vadd.f32 %v601_v49, %v311_v8  ;;  %296 = vst.msk [vmem:[#allocation2 + $0x60] sm:$0xff] %vm21_vm0, %v280_v3  ;;  %v462_v13 = vpop.f32.mrb[6].mxu1  ;;  %v359_v14 = vadd.f32 %v343_v52, %v327_v5  ;;  %v275_v18 = vadd.f32 %v450_v12, %v45_v56  ;;  %v219_v20 = vpop.f32.mrb[7].mxu0  ;;  %v357_v56 = vld [vmem:[%s746_s3 + $0x78] sm:$0xff] }
  0xed   :  { %v367_v15 = vadd.f32 %v351_v53, %v335_v6  ;;  %v283_v19 = vadd.f32 %v462_v13, %v53_v63  ;;  %v259_v21 = vpop.f32.mrb[7].mxu1  ;;  %v358_v22 = vadd.f32 %v342_v57, %v326_v10  ;;  %v306_v24 = vld [vmem:[#allocation2 + $0x18] sm:$0xff]  ;;  %v274_v27 = vadd.f32 %v219_v20, %v44_v4 }
  0xee   :  { %v366_v23 = vadd.f32 %v350_v58, %v334_v11  ;;  %v314_v25 = vld [vmem:[#allocation2 + $0x58] sm:$0xff]  ;;  %v282_v28 = vadd.f32 %v259_v21, %v52_v9  ;;  %375 = vst.msk [vmem:[%s747_s4 + $0x8] sm:$0xff] %vm21_vm0, %v359_v14  ;;  %v329_v29 = vadd.f32 %v601_v49, %v306_v24  ;;  %v305_v31 = vld [vmem:[#allocation2 + $0x10] sm:$0xff]  ;;  %291 = vst.msk [vmem:[#allocation2 + $0x38] sm:$0xff] %vm21_vm0, %v275_v18 }
  0xef   :  { %383 = vst.msk [vmem:[%s747_s4 + $0x48] sm:$0xff] %vm21_vm0, %v367_v15  ;;  %v337_v30 = vadd.f32 %v601_v49, %v314_v25  ;;  %v313_v32 = vld [vmem:[#allocation2 + $0x50] sm:$0xff]  ;;  %299 = vst.msk [vmem:[#allocation2 + $0x78] sm:$0xff] %vm21_vm0, %v283_v19  ;;  %v328_v34 = vadd.f32 %v601_v49, %v305_v31 }
  0xf0   :  { %374 = vst.msk [vmem:[%s747_s4] sm:$0xff] %vm21_vm0, %v358_v22  ;;  %382 = vst.msk [vmem:[%s747_s4 + $0x40] sm:$0xff] %vm21_vm0, %v366_v23  ;;  %v336_v35 = vadd.f32 %v601_v49, %v313_v32  ;;  %v361_v36 = vadd.f32 %v345_v16, %v329_v29 }
  0xf1   :  { %290 = vst.msk [vmem:[#allocation2 + $0x30] sm:$0xff] %vm21_vm0, %v274_v27  ;;  %298 = vst.msk [vmem:[#allocation2 + $0x70] sm:$0xff] %vm21_vm0, %v282_v28  ;;  %v369_v37 = vadd.f32 %v353_v17, %v337_v30  ;;  %v360_v40 = vadd.f32 %v344_v26, %v328_v34  ;;  %v308_v42 = vld [vmem:[#allocation2 + $0x28] sm:$0xff] }
  0xf2   :  { %v368_v41 = vadd.f32 %v352_v33, %v336_v35  ;;  %v316_v43 = vld [vmem:[#allocation2 + $0x68] sm:$0xff]  ;;  %377 = vst.msk [vmem:[%s747_s4 + $0x18] sm:$0xff] %vm21_vm0, %v361_v36  ;;  %v331_v45 = vadd.f32 %v601_v49, %v308_v42  ;;  %v307_v47 = vld [vmem:[#allocation2 + $0x20] sm:$0xff] }
  0xf3   :  { %385 = vst.msk [vmem:[%s747_s4 + $0x58] sm:$0xff] %vm21_vm0, %v369_v37  ;;  %v339_v46 = vadd.f32 %v601_v49, %v316_v43  ;;  %v315_v48 = vld [vmem:[#allocation2 + $0x60] sm:$0xff]  ;;  %376 = vst.msk [vmem:[%s747_s4 + $0x10] sm:$0xff] %vm21_vm0, %v360_v40  ;;  %v330_v51 = vadd.f32 %v601_v49, %v307_v47 }
  0xf4   :  { %384 = vst.msk [vmem:[%s747_s4 + $0x50] sm:$0xff] %vm21_vm0, %v368_v41  ;;  %v338_v52 = vadd.f32 %v601_v49, %v315_v48  ;;  %v363_v53 = vadd.f32 %v347_v38, %v331_v45 }
  0xf5   :  { %v371_v54 = vadd.f32 %v355_v39, %v339_v46  ;;  %v362_v57 = vadd.f32 %v346_v44, %v330_v51  ;;  %v310_v59 = vld [vmem:[#allocation2 + $0x38] sm:$0xff] }
  0xf6   :  { %v370_v58 = vadd.f32 %v354_v50, %v338_v52  ;;  %v318_v60 = vld [vmem:[#allocation2 + $0x78] sm:$0xff]  ;;  %379 = vst.msk [vmem:[%s747_s4 + $0x28] sm:$0xff] %vm21_vm0, %v363_v53  ;;  %v333_v62 = vadd.f32 %v601_v49, %v310_v59 }
  0xf7   :  { %387 = vst.msk [vmem:[%s747_s4 + $0x68] sm:$0xff] %vm21_vm0, %v371_v54  ;;  %v341_v63 = vadd.f32 %v601_v49, %v318_v60  ;;  %378 = vst.msk [vmem:[%s747_s4 + $0x20] sm:$0xff] %vm21_vm0, %v362_v57 }
  0xf8   :  { %v309_v0 = vld [vmem:[#allocation2 + $0x30] sm:$0xff]  ;;  %386 = vst.msk [vmem:[%s747_s4 + $0x60] sm:$0xff] %vm21_vm0, %v370_v58  ;;  %v365_v5 = vadd.f32 %v349_v55, %v333_v62 }
  0xf9   :  { %v317_v1 = vld [vmem:[#allocation2 + $0x70] sm:$0xff]  ;;  %v332_v3 = vadd.f32 %v601_v49, %v309_v0  ;;  %v373_v6 = vadd.f32 %v357_v56, %v341_v63 }
  0xfa   :  { %v340_v4 = vadd.f32 %v601_v49, %v317_v1  ;;  %381 = vst.msk [vmem:[%s747_s4 + $0x38] sm:$0xff] %vm21_vm0, %v365_v5 }
  0xfb   :  { %v364_v7 = vadd.f32 %v348_v61, %v332_v3  ;;  %389 = vst.msk [vmem:[%s747_s4 + $0x78] sm:$0xff] %vm21_vm0, %v373_v6 }
  0xfc   :  { %v372_v8 = vadd.f32 %v356_v2, %v340_v4 }
  0xfd   :  { %380 = vst.msk [vmem:[%s747_s4 + $0x30] sm:$0xff] %vm21_vm0, %v364_v7 }
  0xfe   :  { %388 = vst.msk [vmem:[%s747_s4 + $0x70] sm:$0xff] %vm21_vm0, %v372_v8 }

// kernel: _lambda_.16
= control target key start
LH: loop header
LB: loop body
LE: loop exit
PB: predicated region body
PF: predicated region fallthrough
CT: control target
= control target key end

     0   :  { %vm21_vm0 = vcmask 261120   ;;  %v496_v3 = vmov 0.0   ;;  %s783_s1 = inlined_call_operand.vmem [shape: f32[128,32], index: 1, kind: input, shape index: {}]   ;;  %s784_s0 = inlined_call_operand.vmem [shape: f32[128,128], index: 0, kind: input, shape index: {}]   ;;  %s785_s2 = inlined_call_operand.vmem [shape: f32[1,32], index: 2, kind: input, shape index: {}]   ;;  %s786_s3 = inlined_call_operand.vmem [shape: f32[128,32], index: 3, kind: input, shape index: {}]   ;;  %s787_s4 = inlined_call_operand.vmem [shape: f32[128,32], index: 4, kind: output, shape index: {}]  }
   0x1   :  { %v70_v0 = vld [vmem:[%s783_s1] sm:$0xff]  ;;  %v71_v1 = vld [vmem:[%s783_s1 + $0x8] sm:$0xff]  ;;  %v72_v2 = vld [vmem:[%s783_s1 + $0x10] sm:$0xff]  ;;  %23 = vst.msk [vmem:[#allocation2 + $0x8] sm:$0xff] %vm21_vm0, %v496_v3 }
   0x2   :  { %22 = vst.msk [vmem:[#allocation2] sm:$0xff] %vm21_vm0, %v496_v3  ;;  %24 = vst.msk [vmem:[#allocation2 + $0x10] sm:$0xff] %vm21_vm0, %v496_v3  ;;  %v447_v4 = vpack.c.bf16 %v71_v1, %v70_v0  ;;  %v73_v5 = vld [vmem:[%s783_s1 + $0x18] sm:$0xff]  ;;  %v74_v7 = vld [vmem:[%s783_s1 + $0x20] sm:$0xff] }
   0x3   :  { %25 = vst.msk [vmem:[#allocation2 + $0x18] sm:$0xff] %vm21_vm0, %v496_v3  ;;  %26 = vst.msk [vmem:[#allocation2 + $0x20] sm:$0xff] %vm21_vm0, %v496_v3  ;;  %v451_v6 = vpack.c.bf16 %v73_v5, %v72_v2  ;;  %v75_v8 = vld [vmem:[%s783_s1 + $0x28] sm:$0xff]  ;;  %v54_v10 = vld [vmem:[%s784_s0] sm:$0xff] }
   0x4   :  { %27 = vst.msk [vmem:[#allocation2 + $0x28] sm:$0xff] %vm21_vm0, %v496_v3  ;;  %28 = vst.msk [vmem:[#allocation2 + $0x30] sm:$0xff] %vm21_vm0, %v496_v3  ;;  %448 = vmatprep.subr.bf16.mxu0 %v447_v4  ;;  %479 = vmatprep.subr.bf16.mxu1 %v447_v4  ;;  %v455_v9 = vpack.c.bf16 %v75_v8, %v74_v7  ;;  %v62_v11 = vld [vmem:[%s784_s0 + $0x40] sm:$0xff]  ;;  %v76_v12 = vld [vmem:[%s783_s1 + $0x30] sm:$0xff] }
   0x5   :  { %29 = vst.msk [vmem:[#allocation2 + $0x38] sm:$0xff] %vm21_vm0, %v496_v3  ;;  %30 = vst.msk [vmem:[#allocation2 + $0x40] sm:$0xff] %vm21_vm0, %v496_v3  ;;  %450 = vmatpush3.bf16.msra.mxu0 %v447_v4  ;;  %487 = vmatpush3.bf16.msra.mxu1 %v447_v4  ;;  %v77_v13 = vld [vmem:[%s783_s1 + $0x38] sm:$0xff]  ;;  %v78_v15 = vld [vmem:[%s783_s1 + $0x40] sm:$0xff] }
   0x6   :  { %31 = vst.msk [vmem:[#allocation2 + $0x48] sm:$0xff] %vm21_vm0, %v496_v3  ;;  %32 = vst.msk [vmem:[#allocation2 + $0x50] sm:$0xff] %vm21_vm0, %v496_v3  ;;  %452 = vmatprep.subr.bf16.mxu0 %v451_v6  ;;  %480 = vmatprep.subr.bf16.mxu1 %v451_v6  ;;  %v459_v14 = vpack.c.bf16 %v77_v13, %v76_v12  ;;  %v79_v16 = vld [vmem:[%s783_s1 + $0x48] sm:$0xff]  ;;  %v80_v18 = vld [vmem:[%s783_s1 + $0x50] sm:$0xff] }
   0x7   :  { %33 = vst.msk [vmem:[#allocation2 + $0x58] sm:$0xff] %vm21_vm0, %v496_v3  ;;  %34 = vst.msk [vmem:[#allocation2 + $0x60] sm:$0xff] %vm21_vm0, %v496_v3  ;;  %423 = vmatprep.mubr.f32.mxu0 %v54_v10  ;;  %435 = vmatprep.mubr.f32.mxu1 %v62_v11  ;;  %v463_v17 = vpack.c.bf16 %v79_v16, %v78_v15  ;;  %v81_v19 = vld [vmem:[%s783_s1 + $0x58] sm:$0xff]  ;;  %v82_v21 = vld [vmem:[%s783_s1 + $0x60] sm:$0xff] }
   0x8   :  { %35 = vst.msk [vmem:[#allocation2 + $0x68] sm:$0xff] %vm21_vm0, %v496_v3  ;;  %36 = vst.msk [vmem:[#allocation2 + $0x70] sm:$0xff] %vm21_vm0, %v496_v3  ;;  %v467_v20 = vpack.c.bf16 %v81_v19, %v80_v18  ;;  %v83_v22 = vld [vmem:[%s783_s1 + $0x68] sm:$0xff]  ;;  %v84_v24 = vld [vmem:[%s783_s1 + $0x70] sm:$0xff] }
   0x9   :  { %37 = vst.msk [vmem:[#allocation2 + $0x78] sm:$0xff] %vm21_vm0, %v496_v3  ;;  %454 = vmatpush3.bf16.msra.mxu0 %v451_v6  ;;  %488 = vmatpush3.bf16.msra.mxu1 %v451_v6  ;;  %v471_v23 = vpack.c.bf16 %v83_v22, %v82_v21  ;;  %v85_v25 = vld [vmem:[%s783_s1 + $0x78] sm:$0xff]  ;;  %v55_v27 = vld [vmem:[%s784_s0 + $0x8] sm:$0xff]  ;;  %v56_v29 = vld [vmem:[%s784_s0 + $0x10] sm:$0xff] }
   0xa   :  { %456 = vmatprep.subr.bf16.mxu0 %v455_v9  ;;  %481 = vmatprep.subr.bf16.mxu1 %v455_v9  ;;  %v475_v26 = vpack.c.bf16 %v85_v25, %v84_v24  ;;  %v63_v28 = vld [vmem:[%s784_s0 + $0x48] sm:$0xff]  ;;  %v64_v30 = vld [vmem:[%s784_s0 + $0x50] sm:$0xff]  ;;  %v57_v31 = vld [vmem:[%s784_s0 + $0x18] sm:$0xff] }
   0xb   :  { %v65_v32 = vld [vmem:[%s784_s0 + $0x58] sm:$0xff]  ;;  %v58_v33 = vld [vmem:[%s784_s0 + $0x20] sm:$0xff]  ;;  %v59_v35 = vld [vmem:[%s784_s0 + $0x28] sm:$0xff] }
   0xc   :  { %v66_v34 = vld [vmem:[%s784_s0 + $0x60] sm:$0xff]  ;;  %v67_v36 = vld [vmem:[%s784_s0 + $0x68] sm:$0xff]  ;;  %v60_v37 = vld [vmem:[%s784_s0 + $0x30] sm:$0xff] }
   0xd   :  { %458 = vmatpush3.bf16.msra.mxu0 %v455_v9  ;;  %489 = vmatpush3.bf16.msra.mxu1 %v455_v9  ;;  %v68_v38 = vld [vmem:[%s784_s0 + $0x70] sm:$0xff]  ;;  %v61_v39 = vld [vmem:[%s784_s0 + $0x38] sm:$0xff]  ;;  %v39_v41 = vld [vmem:[#allocation2 + $0x8] sm:$0xff] }
   0xe   :  { %460 = vmatprep.subr.bf16.mxu0 %v459_v14  ;;  %482 = vmatprep.subr.bf16.mxu1 %v459_v14  ;;  %v69_v40 = vld [vmem:[%s784_s0 + $0x78] sm:$0xff]  ;;  %v47_v42 = vld [vmem:[#allocation2 + $0x48] sm:$0xff]  ;;  %v38_v43 = vld [vmem:[#allocation2] sm:$0xff] }
   0xf   :  { %v46_v44 = vld [vmem:[#allocation2 + $0x40] sm:$0xff]  ;;  %v41_v53 = vld [vmem:[#allocation2 + $0x18] sm:$0xff]  ;;  %v40_v55 = vld [vmem:[#allocation2 + $0x10] sm:$0xff] }
  0x10   :  { %v49_v54 = vld [vmem:[#allocation2 + $0x58] sm:$0xff]  ;;  %v48_v56 = vld [vmem:[#allocation2 + $0x50] sm:$0xff]  ;;  %v43_v1 = vld [vmem:[#allocation2 + $0x28] sm:$0xff] }
  0x11   :  { %462 = vmatpush3.bf16.msra.mxu0 %v459_v14  ;;  %490 = vmatpush3.bf16.msra.mxu1 %v459_v14  ;;  %v51_v2 = vld [vmem:[#allocation2 + $0x68] sm:$0xff]  ;;  %v641_v3 = vld [vmem:[%s785_s2] ss:$0 sm:$0xff]  ;;  %v45_v10 = vld [vmem:[#allocation2 + $0x38] sm:$0xff] }
  0x12   :  { %464 = vmatprep.subr.bf16.mxu0 %v463_v17  ;;  %483 = vmatprep.subr.bf16.mxu1 %v463_v17  ;;  %v42_v4 = vld [vmem:[#allocation2 + $0x20] sm:$0xff]  ;;  %v307_v6 = vld [vmem:[%s786_s3 + $0x8] sm:$0xff]  ;;  %v44_v22 = vld [vmem:[#allocation2 + $0x30] sm:$0xff] }
  0x13   :  { %v50_v5 = vld [vmem:[#allocation2 + $0x60] sm:$0xff]  ;;  %v315_v7 = vld [vmem:[%s786_s3 + $0x48] sm:$0xff] }
  0x14   :  { %v306_v11 = vld [vmem:[%s786_s3] sm:$0xff] }
  0x15   :  { %466 = vmatpush3.bf16.msra.mxu0 %v463_v17  ;;  %491 = vmatpush3.bf16.msra.mxu1 %v463_v17  ;;  %v314_v12 = vld [vmem:[%s786_s3 + $0x40] sm:$0xff]  ;;  %v53_v17 = vld [vmem:[#allocation2 + $0x78] sm:$0xff] }
  0x16   :  { %468 = vmatprep.subr.bf16.mxu0 %v467_v20  ;;  %484 = vmatprep.subr.bf16.mxu1 %v467_v20 }
  0x19   :  { %470 = vmatpush3.bf16.msra.mxu0 %v467_v20  ;;  %492 = vmatpush3.bf16.msra.mxu1 %v467_v20 }
  0x1a   :  { %472 = vmatprep.subr.bf16.mxu0 %v471_v23  ;;  %485 = vmatprep.subr.bf16.mxu1 %v471_v23 }
  0x1d   :  { %474 = vmatpush3.bf16.msra.mxu0 %v471_v23  ;;  %493 = vmatpush3.bf16.msra.mxu1 %v471_v23 }
  0x1e   :  { %476 = vmatprep.subr.bf16.mxu0 %v475_v26  ;;  %486 = vmatprep.subr.bf16.mxu1 %v475_v26 }
  0x21   :  { %478 = vmatpush3.bf16.msra.mxu0 %v475_v26  ;;  %494 = vmatpush3.bf16.msra.mxu1 %v475_v26 }
  0x24   :  { %424 = vmatmul.mubr.f32.vlgmr.msra.gmra.mrb[0].mxu0 %v55_v27  ;;  %436 = vmatmul.mubr.f32.vlgmr.msra.gmra.mrb[0].mxu1 %v63_v28  ;;  %v52_v27 = vld [vmem:[#allocation2 + $0x70] sm:$0xff] }
  0x25   :  { %426 = vmatprep.mubr.f32.mxu0 %v56_v29  ;;  %438 = vmatprep.mubr.f32.mxu1 %v64_v30 }
  0x28   :  { %427 = vmatmul.mubr.f32.gmra.mrb[2].mxu0 %v57_v31  ;;  %439 = vmatmul.mubr.f32.gmra.mrb[2].mxu1 %v65_v32 }
  0x29   :  { %429 = vmatprep.mubr.f32.mxu0 %v58_v33  ;;  %441 = vmatprep.mubr.f32.mxu1 %v66_v34  ;;  %v309_v34 = vld [vmem:[%s786_s3 + $0x18] sm:$0xff] }
  0x2c   :  { %430 = vmatmul.mubr.f32.gmra.mrb[4].mxu0 %v59_v35  ;;  %442 = vmatmul.mubr.f32.gmra.mrb[4].mxu1 %v67_v36  ;;  %v317_v35 = vld [vmem:[%s786_s3 + $0x58] sm:$0xff] }
  0x2d   :  { %432 = vmatprep.mubr.f32.mxu0 %v60_v37  ;;  %444 = vmatprep.mubr.f32.mxu1 %v68_v38 }
  0x30   :  { %433 = vmatmul.mubr.f32.gmra.mrb[6].mxu0 %v61_v39  ;;  %445 = vmatmul.mubr.f32.gmra.mrb[6].mxu1 %v69_v40 }
  0xf7   :  { %v425_v45 = vpop.f32.mrb[0].mxu0  ;;  %v437_v46 = vpop.f32.mrb[0].mxu1 }
  0xf8   :  { %v232_v47 = vadd.f32 %v425_v45, %v39_v41  ;;  %v240_v48 = vadd.f32 %v437_v46, %v47_v42  ;;  %v152_v49 = vpop.f32.mrb[1].mxu0  ;;  %v192_v50 = vpop.f32.mrb[1].mxu1 }
  0xf9   :  { %v231_v51 = vadd.f32 %v152_v49, %v38_v43  ;;  %v239_v52 = vadd.f32 %v192_v50, %v46_v44  ;;  %v308_v44 = vld [vmem:[%s786_s3 + $0x10] sm:$0xff] }
  0xfa   :  { %249 = vst.msk [vmem:[#allocation2 + $0x8] sm:$0xff] %vm21_vm0, %v232_v47  ;;  %257 = vst.msk [vmem:[#allocation2 + $0x48] sm:$0xff] %vm21_vm0, %v240_v48 }
  0xfb   :  { %248 = vst.msk [vmem:[#allocation2] sm:$0xff] %vm21_vm0, %v231_v51  ;;  %256 = vst.msk [vmem:[#allocation2 + $0x40] sm:$0xff] %vm21_vm0, %v239_v52  ;;  %v428_v57 = vpop.f32.mrb[2].mxu0  ;;  %v440_v58 = vpop.f32.mrb[2].mxu1  ;;  %v316_v51 = vld [vmem:[%s786_s3 + $0x50] sm:$0xff] }
  0xfc   :  { %v234_v59 = vadd.f32 %v428_v57, %v41_v53  ;;  %v242_v60 = vadd.f32 %v440_v58, %v49_v54  ;;  %v162_v61 = vpop.f32.mrb[3].mxu0  ;;  %v202_v62 = vpop.f32.mrb[3].mxu1  ;;  %v319_v57 = vld [vmem:[%s786_s3 + $0x68] sm:$0xff] }
  0xfd   :  { %v233_v63 = vadd.f32 %v162_v61, %v40_v55  ;;  %v241_v0 = vadd.f32 %v202_v62, %v48_v56  ;;  %v311_v56 = vld [vmem:[%s786_s3 + $0x28] sm:$0xff]  ;;  %v310_v62 = vld [vmem:[%s786_s3 + $0x20] sm:$0xff] }
  0xfe   :  { %251 = vst.msk [vmem:[#allocation2 + $0x18] sm:$0xff] %vm21_vm0, %v234_v59  ;;  %259 = vst.msk [vmem:[#allocation2 + $0x58] sm:$0xff] %vm21_vm0, %v242_v60 }
  0xff   :  { %250 = vst.msk [vmem:[#allocation2 + $0x10] sm:$0xff] %vm21_vm0, %v233_v63  ;;  %258 = vst.msk [vmem:[#allocation2 + $0x50] sm:$0xff] %vm21_vm0, %v241_v0  ;;  %v431_v8 = vpop.f32.mrb[4].mxu0  ;;  %v443_v9 = vpop.f32.mrb[4].mxu1 }
 0x100   :  { %v236_v13 = vadd.f32 %v431_v8, %v43_v1  ;;  %v244_v14 = vadd.f32 %v443_v9, %v51_v2  ;;  %v172_v15 = vpop.f32.mrb[5].mxu0  ;;  %v212_v16 = vpop.f32.mrb[5].mxu1  ;;  %v313_v9 = vld [vmem:[%s786_s3 + $0x38] sm:$0xff] }
 0x101   :  { %v268_v18 = vld [vmem:[#allocation2 + $0x8] sm:$0xff]  ;;  %v235_v20 = vadd.f32 %v172_v15, %v42_v4  ;;  %v243_v21 = vadd.f32 %v212_v16, %v50_v5  ;;  %v318_v4 = vld [vmem:[%s786_s3 + $0x60] sm:$0xff]  ;;  %v312_v15 = vld [vmem:[%s786_s3 + $0x30] sm:$0xff] }
 0x102   :  { %v276_v19 = vld [vmem:[#allocation2 + $0x48] sm:$0xff]  ;;  %v291_v23 = vadd.f32 %v641_v3, %v268_v18  ;;  %v267_v25 = vld [vmem:[#allocation2] sm:$0xff]  ;;  %253 = vst.msk [vmem:[#allocation2 + $0x28] sm:$0xff] %vm21_vm0, %v236_v13  ;;  %261 = vst.msk [vmem:[#allocation2 + $0x68] sm:$0xff] %vm21_vm0, %v244_v14 }
 0x103   :  { %v299_v24 = vadd.f32 %v641_v3, %v276_v19  ;;  %v275_v26 = vld [vmem:[#allocation2 + $0x40] sm:$0xff]  ;;  %v290_v28 = vadd.f32 %v641_v3, %v267_v25  ;;  %252 = vst.msk [vmem:[#allocation2 + $0x20] sm:$0xff] %vm21_vm0, %v235_v20  ;;  %260 = vst.msk [vmem:[#allocation2 + $0x60] sm:$0xff] %vm21_vm0, %v243_v21  ;;  %v434_v30 = vpop.f32.mrb[6].mxu0  ;;  %v446_v31 = vpop.f32.mrb[6].mxu1  ;;  %v320_v20 = vld [vmem:[%s786_s3 + $0x70] sm:$0xff] }
 0x104   :  { %v298_v29 = vadd.f32 %v641_v3, %v275_v26  ;;  %v323_v32 = vadd.f32 %v307_v6, %v291_v23  ;;  %v238_v36 = vadd.f32 %v434_v30, %v45_v10  ;;  %v246_v37 = vadd.f32 %v446_v31, %v53_v17  ;;  %v182_v38 = vpop.f32.mrb[7].mxu0  ;;  %v222_v39 = vpop.f32.mrb[7].mxu1  ;;  %v321_v10 = vld [vmem:[%s786_s3 + $0x78] sm:$0xff] }
 0x105   :  { %v331_v33 = vadd.f32 %v315_v7, %v299_v24  ;;  %v322_v40 = vadd.f32 %v306_v11, %v290_v28  ;;  %v270_v42 = vld [vmem:[#allocation2 + $0x18] sm:$0xff]  ;;  %v237_v45 = vadd.f32 %v182_v38, %v44_v22  ;;  %v245_v46 = vadd.f32 %v222_v39, %v52_v27 }
 0x106   :  { %v330_v41 = vadd.f32 %v314_v12, %v298_v29  ;;  %v278_v43 = vld [vmem:[#allocation2 + $0x58] sm:$0xff]  ;;  %339 = vst.msk [vmem:[%s787_s4 + $0x8] sm:$0xff] %vm21_vm0, %v323_v32  ;;  %v293_v47 = vadd.f32 %v641_v3, %v270_v42  ;;  %v269_v49 = vld [vmem:[#allocation2 + $0x10] sm:$0xff]  ;;  %255 = vst.msk [vmem:[#allocation2 + $0x38] sm:$0xff] %vm21_vm0, %v238_v36 }
 0x107   :  { %347 = vst.msk [vmem:[%s787_s4 + $0x48] sm:$0xff] %vm21_vm0, %v331_v33  ;;  %v301_v48 = vadd.f32 %v641_v3, %v278_v43  ;;  %v277_v50 = vld [vmem:[#allocation2 + $0x50] sm:$0xff]  ;;  %263 = vst.msk [vmem:[#allocation2 + $0x78] sm:$0xff] %vm21_vm0, %v246_v37  ;;  %v292_v52 = vadd.f32 %v641_v3, %v269_v49 }
 0x108   :  { %338 = vst.msk [vmem:[%s787_s4] sm:$0xff] %vm21_vm0, %v322_v40  ;;  %346 = vst.msk [vmem:[%s787_s4 + $0x40] sm:$0xff] %vm21_vm0, %v330_v41  ;;  %v300_v53 = vadd.f32 %v641_v3, %v277_v50  ;;  %v325_v54 = vadd.f32 %v309_v34, %v293_v47 }
 0x109   :  { %254 = vst.msk [vmem:[#allocation2 + $0x30] sm:$0xff] %vm21_vm0, %v237_v45  ;;  %262 = vst.msk [vmem:[#allocation2 + $0x70] sm:$0xff] %vm21_vm0, %v245_v46  ;;  %v333_v55 = vadd.f32 %v317_v35, %v301_v48  ;;  %v324_v58 = vadd.f32 %v308_v44, %v292_v52  ;;  %v272_v60 = vld [vmem:[#allocation2 + $0x28] sm:$0xff] }
 0x10a   :  { %v332_v59 = vadd.f32 %v316_v51, %v300_v53  ;;  %v280_v61 = vld [vmem:[#allocation2 + $0x68] sm:$0xff]  ;;  %341 = vst.msk [vmem:[%s787_s4 + $0x18] sm:$0xff] %vm21_vm0, %v325_v54  ;;  %v295_v63 = vadd.f32 %v641_v3, %v272_v60  ;;  %v271_v1 = vld [vmem:[#allocation2 + $0x20] sm:$0xff] }
 0x10b   :  { %349 = vst.msk [vmem:[%s787_s4 + $0x58] sm:$0xff] %vm21_vm0, %v333_v55  ;;  %v303_v0 = vadd.f32 %v641_v3, %v280_v61  ;;  %v279_v2 = vld [vmem:[#allocation2 + $0x60] sm:$0xff]  ;;  %340 = vst.msk [vmem:[%s787_s4 + $0x10] sm:$0xff] %vm21_vm0, %v324_v58  ;;  %v294_v5 = vadd.f32 %v641_v3, %v271_v1 }
 0x10c   :  { %348 = vst.msk [vmem:[%s787_s4 + $0x50] sm:$0xff] %vm21_vm0, %v332_v59  ;;  %v302_v6 = vadd.f32 %v641_v3, %v279_v2  ;;  %v327_v7 = vadd.f32 %v311_v56, %v295_v63 }
 0x10d   :  { %v335_v8 = vadd.f32 %v319_v57, %v303_v0  ;;  %v326_v11 = vadd.f32 %v310_v62, %v294_v5  ;;  %v274_v13 = vld [vmem:[#allocation2 + $0x38] sm:$0xff] }
 0x10e   :  { %v334_v12 = vadd.f32 %v318_v4, %v302_v6  ;;  %v282_v14 = vld [vmem:[#allocation2 + $0x78] sm:$0xff]  ;;  %343 = vst.msk [vmem:[%s787_s4 + $0x28] sm:$0xff] %vm21_vm0, %v327_v7  ;;  %v297_v16 = vadd.f32 %v641_v3, %v274_v13 }
 0x10f   :  { %351 = vst.msk [vmem:[%s787_s4 + $0x68] sm:$0xff] %vm21_vm0, %v335_v8  ;;  %v305_v17 = vadd.f32 %v641_v3, %v282_v14  ;;  %342 = vst.msk [vmem:[%s787_s4 + $0x20] sm:$0xff] %vm21_vm0, %v326_v11 }
 0x110   :  { %v273_v18 = vld [vmem:[#allocation2 + $0x30] sm:$0xff]  ;;  %350 = vst.msk [vmem:[%s787_s4 + $0x60] sm:$0xff] %vm21_vm0, %v334_v12  ;;  %v329_v23 = vadd.f32 %v313_v9, %v297_v16 }
 0x111   :  { %v281_v19 = vld [vmem:[#allocation2 + $0x70] sm:$0xff]  ;;  %v296_v21 = vadd.f32 %v641_v3, %v273_v18  ;;  %v337_v24 = vadd.f32 %v321_v10, %v305_v17 }
 0x112   :  { %v304_v22 = vadd.f32 %v641_v3, %v281_v19  ;;  %345 = vst.msk [vmem:[%s787_s4 + $0x38] sm:$0xff] %vm21_vm0, %v329_v23 }
 0x113   :  { %v328_v25 = vadd.f32 %v312_v15, %v296_v21  ;;  %353 = vst.msk [vmem:[%s787_s4 + $0x78] sm:$0xff] %vm21_vm0, %v337_v24 }
 0x114   :  { %v336_v26 = vadd.f32 %v320_v20, %v304_v22 }
 0x115   :  { %344 = vst.msk [vmem:[%s787_s4 + $0x30] sm:$0xff] %vm21_vm0, %v328_v25 }
 0x116   :  { %352 = vst.msk [vmem:[%s787_s4 + $0x70] sm:$0xff] %vm21_vm0, %v336_v26 }

// kernel: _lambda_.15
= control target key start
LH: loop header
LB: loop body
LE: loop exit
PB: predicated region body
PF: predicated region fallthrough
CT: control target
= control target key end

     0   :  { %v74_v0 = vlaneseq  ;;  %vm178_vm0 = vcmask 1046528   ;;  %vm327_vm1 = vcmask 1045504   ;;  %vm1072_vm2 = vcmask 261120   ;;  %s3658_s1 = inlined_call_operand.vmem [shape: f32[3,3,32], index: 1, kind: input, shape index: {}]   ;;  %s3659_s0 = inlined_call_operand.vmem [shape: f32[2,10,10,32], index: 0, kind: input, shape index: {}]   ;;  %s3660_s2 = inlined_call_operand.vmem [shape: f32[1,32], index: 2, kind: input, shape index: {}]   ;;  %s3661_s3 = inlined_call_operand.vmem [shape: f32[1,32], index: 3, kind: input, shape index: {}]   ;;  %s3662_s8 = inlined_call_operand.vmem [shape: f32[2,8,8,32], index: 8, kind: output, shape index: {0}]   ;;  %s3663_s6 = inlined_call_operand.vmem [shape: f32[32,128], index: 6, kind: input, shape index: {}]   ;;  %s3664_s4 = inlined_call_operand.vmem [shape: f32[1,32], index: 4, kind: input, shape index: {}]   ;;  %s3665_s5 = inlined_call_operand.vmem [shape: f32[1,32], index: 5, kind: input, shape index: {}]   ;;  %s3666_s7 = inlined_call_operand.vmem [shape: f32[1,128], index: 7, kind: input, shape index: {}]   ;;  %s3667_s9 = inlined_call_operand.vmem [shape: f32[128,128], index: 9, kind: output, shape index: {1}]  }
   0x1   :  { %v71_v5 = vld [vmem:[%s3658_s1] sm:$0x7]  ;;  %v72_v6 = vld [vmem:[%s3658_s1 + $0x4] sm:$0x7]  ;;  %v73_v7 = vld [vmem:[%s3658_s1 + $0x8] sm:$0x7] }
   0x2   :  { %v75_v1 = vshrl.u32 %v74_v0, 7  ;;  %v1953_v9 = vld [vmem:[%s3659_s0] sm:$0xff]  ;;  %v1958_v10 = vld [vmem:[%s3659_s0 + $0x10] sm:$0xff]  ;;  %v1980_v16 = vld [vmem:[%s3659_s0 + $0x8] sm:$0x3] }
   0x3   :  { %3762 = vst [vmem:[#allocation3_spill] sm:$0xff] %v1958_v10  ;;  %v1963_v11 = vld [vmem:[%s3659_s0 + $0x20] sm:$0xff]  ;;  %v1968_v12 = vld [vmem:[%s3659_s0 + $0x30] sm:$0xff]  ;;  %3767 = vst [vmem:[#allocation8_spill] sm:$0xff] %v1980_v16 }
   0x4   :  { %v76_v2 = vsub.s32 0, %v75_v1  ;;  %v112_v3 = vsub.s32 1, %v75_v1  ;;  %v1939_v4 = vsub.s32 2, %v75_v1  ;;  %3763 = vst [vmem:[#allocation4_spill] sm:$0xff] %v1963_v11  ;;  %3764 = vst [vmem:[#allocation5_spill] sm:$0xff] %v1968_v12  ;;  %v1990_v18 = vld [vmem:[%s3659_s0 + $0x40] sm:$0xff] }
   0x5   :  { %v1985_v17 = vld [vmem:[%s3659_s0 + $0x18] sm:$0x3]  ;;  %3769 = vst [vmem:[#allocation10_spill] sm:$0xff] %v1990_v18  ;;  %v1995_v19 = vld [vmem:[%s3659_s0 + $0x50] sm:$0xff]  ;;  %v2000_v20 = vld [vmem:[%s3659_s0 + $0x60] sm:$0xff] }
   0x6   :  { %3761 = vst [vmem:[#allocation2_spill] sm:$0xff] %v1939_v4  ;;  %v77_v8 = vrot.slane %v71_v5, %v76_v2  ;;  %v1970_v13 = vrot.slane %v71_v5, %v112_v3  ;;  %v1973_v14 = vrot.slane %v71_v5, %v1939_v4  ;;  %v1975_v15 = vrot.slane %v72_v6, %v76_v2  ;;  %v2014_v25 = vld [vmem:[%s3659_s0 + $0x28] sm:$0x3]  ;;  %v2019_v26 = vld [vmem:[%s3659_s0 + $0x38] sm:$0x3]  ;;  %v2024_v27 = vld [vmem:[%s3659_s0 + $0x70] sm:$0xff] }
   0x7   :  { %3768 = vst [vmem:[#allocation9_spill] sm:$0xff] %v1985_v17  ;;  %3770 = vst [vmem:[#allocation11_spill] sm:$0xff] %v1995_v19  ;;  %v2002_v21 = vrot.slane %v72_v6, %v112_v3  ;;  %v2005_v22 = vrot.slane %v72_v6, %v1939_v4  ;;  %v2007_v23 = vrot.slane %v73_v7, %v76_v2  ;;  %v2029_v28 = vld [vmem:[%s3659_s0 + $0xa0] sm:$0xff]  ;;  %v2034_v29 = vld [vmem:[%s3659_s0 + $0xb0] sm:$0xff] }
   0x8   :  { %3765 = vst [vmem:[#allocation6_spill] sm:$0xff] %v1973_v14  ;;  %3766 = vst [vmem:[#allocation7_spill] sm:$0xff] %v1975_v15  ;;  %v2009_v24 = vrot.slane %v73_v7, %v112_v3  ;;  %v2037_v30 = vmul.f32 %v77_v8, %v1953_v9  ;;  %v2040_v31 = vmul.f32 %v77_v8, %v1958_v10  ;;  %v2051_v34 = vld [vmem:[%s3659_s0 + $0xc0] sm:$0xff]  ;;  %v2056_v35 = vld [vmem:[%s3659_s0 + $0xd0] sm:$0xff] }
   0x9   :  { %3771 = vst [vmem:[#allocation12_spill] sm:$0xff] %v2000_v20  ;;  %3772 = vst [vmem:[#allocation13_spill] sm:$0xff] %v2002_v21  ;;  %v2043_v32 = vmul.f32 %v77_v8, %v1963_v11  ;;  %v2046_v33 = vmul.f32 %v77_v8, %v1968_v12  ;;  %v2061_v36 = vld [vmem:[%s3659_s0 + $0xe0] sm:$0xff]  ;;  %v2064_v37 = vmul.f32 %v77_v8, %v1990_v18  ;;  %v2078_v41 = vld [vmem:[%s3659_s0 + $0xf0] sm:$0xff] }
   0xa   :  { %3773 = vst [vmem:[#allocation14_spill] sm:$0xff] %v2005_v22  ;;  %3774 = vst [vmem:[#allocation15_spill] sm:$0xff] %v2007_v23  ;;  %v2067_v38 = vmul.f32 %v77_v8, %v1995_v19  ;;  %v2070_v39 = vmul.f32 %v77_v8, %v2000_v20  ;;  %v2073_v40 = vmul.f32 %v77_v8, %v2024_v27  ;;  %v2083_v42 = vld [vmem:[%s3659_s0 + $0x100] sm:$0xff]  ;;  %v2088_v43 = vld [vmem:[%s3659_s0 + $0x110] sm:$0xff] }
   0xb   :  { %3775 = vst [vmem:[#allocation16_spill] sm:$0xff] %v2009_v24  ;;  %3776 = vst [vmem:[#allocation17_spill] sm:$0xff] %v2014_v25  ;;  %v2091_v44 = vmul.f32 %v77_v8, %v2029_v28  ;;  %v2094_v45 = vmul.f32 %v77_v8, %v2034_v29  ;;  %v2097_v46 = vmul.f32 %v77_v8, %v2051_v34  ;;  %v2105_v48 = vld [vmem:[%s3659_s0 + $0x48] sm:$0x3]  ;;  %v2110_v49 = vld [vmem:[%s3659_s0 + $0x58] sm:$0x3] }
   0xc   :  { %3777 = vst [vmem:[#allocation18_spill] sm:$0xff] %v2019_v26  ;;  %3778 = vst [vmem:[#allocation19_spill] sm:$0xff] %v2024_v27  ;;  %v2100_v47 = vmul.f32 %v77_v8, %v2056_v35  ;;  %v2113_v50 = vmul.f32 %v77_v8, %v2061_v36  ;;  %v2116_v51 = vmul.f32 %v77_v8, %v2078_v41  ;;  %v2127_v54 = vld [vmem:[%s3659_s0 + $0x68] sm:$0x3]  ;;  %v2132_v55 = vld [vmem:[%s3659_s0 + $0x78] sm:$0x3] }
   0xd   :  { %3779 = vst [vmem:[#allocation20_spill] sm:$0xff] %v2029_v28  ;;  %3780 = vst [vmem:[#allocation21_spill] sm:$0xff] %v2034_v29  ;;  %v2119_v52 = vmul.f32 %v77_v8, %v2083_v42  ;;  %v2122_v53 = vmul.f32 %v77_v8, %v2088_v43  ;;  %v114_v56 = vmul.f32 %v1970_v13, %v1953_v9  ;;  %v2145_v60 = vld [vmem:[%s3659_s0 + $0xa8] sm:$0x3]  ;;  %v2150_v61 = vld [vmem:[%s3659_s0 + $0xb8] sm:$0x3] }
   0xe   :  { %3781 = vst [vmem:[#allocation22_spill] sm:$0xff] %v2051_v34  ;;  %3782 = vst [vmem:[#allocation23_spill] sm:$0xff] %v2056_v35  ;;  %v115_v57 = vmul.f32 %v1970_v13, %v1980_v16  ;;  %v116_v58 = vmul.f32 %v1970_v13, %v1958_v10  ;;  %v117_v59 = vmul.f32 %v1970_v13, %v1985_v17  ;;  %v2163_v2 = vld [vmem:[%s3659_s0 + $0xc8] sm:$0x3]  ;;  %v2168_v3 = vld [vmem:[%s3659_s0 + $0xd8] sm:$0x3] }
   0xf   :  { %3783 = vst [vmem:[#allocation24_spill] sm:$0xff] %v2061_v36  ;;  %3784 = vst [vmem:[#allocation25_spill] sm:$0xff] %v2078_v41  ;;  %v118_v62 = vmul.f32 %v1970_v13, %v1963_v11  ;;  %v119_v63 = vmul.f32 %v1970_v13, %v2014_v25  ;;  %v120_v0 = vmul.f32 %v1970_v13, %v1968_v12 }
  0x10   :  { %3785 = vst [vmem:[#allocation26_spill] sm:$0xff] %v2083_v42  ;;  %3786 = vst [vmem:[#allocation27_spill] sm:$0xff] %v2088_v43  ;;  %v121_v1 = vmul.f32 %v1970_v13, %v2019_v26  ;;  %v2172_v5 = vmul.f32 %v1970_v13, %v1990_v18  ;;  %v2176_v6 = vmul.f32 %v1970_v13, %v2105_v48  ;;  %v180_v18 = vrot.slane %v115_v57, 1 }
  0x11   :  { %3787 = vst [vmem:[#allocation28_spill] sm:$0xff] %v2105_v48  ;;  %3788 = vst [vmem:[#allocation29_spill] sm:$0xff] %v2110_v49  ;;  %v2180_v7 = vmul.f32 %v1970_v13, %v1995_v19  ;;  %v2184_v8 = vmul.f32 %v1970_v13, %v2110_v49  ;;  %v2188_v4 = vmul.f32 %v1970_v13, %v2000_v20  ;;  %v2234_v19 = vld [vmem:[%s3659_s0 + $0x118] sm:$0x3]  ;;  %v179_v48 = vrot.slane %v114_v56, 1 }
  0x12   :  { %3789 = vst [vmem:[#allocation30_spill] sm:$0xff] %v2127_v54  ;;  %3790 = vst [vmem:[#allocation31_spill] sm:$0xff] %v2132_v55  ;;  %v2192_v24 = vmul.f32 %v1970_v13, %v2127_v54  ;;  %v2196_v23 = vmul.f32 %v1970_v13, %v2024_v27  ;;  %v129_v22 = vmul.f32 %v1970_v13, %v2132_v55  ;;  %v2211_v27 = vld [vmem:[%s3659_s0 + $0xe8] sm:$0x3]  ;;  %v2216_v55 = vld [vmem:[%s3659_s0 + $0xf8] sm:$0x3] }
  0x13   :  { %3791 = vst [vmem:[#allocation32_spill] sm:$0xff] %v2145_v60  ;;  %3792 = vst [vmem:[#allocation33_spill] sm:$0xff] %v2150_v61  ;;  %v130_v21 = vmul.f32 %v1970_v13, %v2029_v28  ;;  %v131_v15 = vmul.f32 %v1970_v13, %v2145_v60  ;;  %v132_v20 = vmul.f32 %v1970_v13, %v2034_v29  ;;  %v2221_v60 = vld [vmem:[%s3659_s0 + $0x108] sm:$0x3]  ;;  %v182_v26 = vrot.slane %v116_v58, 1 }
  0x14   :  { %3793 = vst [vmem:[#allocation34_spill] sm:$0xff] %v2163_v2  ;;  %3794 = vst [vmem:[#allocation35_spill] sm:$0xff] %v2168_v3  ;;  %v133_v54 = vmul.f32 %v1970_v13, %v2150_v61  ;;  %v134_v29 = vmul.f32 %v1970_v13, %v2051_v34  ;;  %v135_v61 = vmul.f32 %v1970_v13, %v2163_v2  ;;  %v183_v12 = vrot.slane %v117_v59, 1 }
  0x15   :  { %3795 = vst [vmem:[#allocation36_spill] sm:$0xff] %v2211_v27  ;;  %3796 = vst [vmem:[#allocation37_spill] sm:$0xff] %v2216_v55  ;;  %v136_v28 = vmul.f32 %v1970_v13, %v2056_v35  ;;  %v137_v49 = vmul.f32 %v1970_v13, %v2168_v3  ;;  %v185_v25 = vrot.slane %v118_v62, 1  ;;  %v186_v34 = vrot.slane %v119_v63, 1 }
  0x16   :  { %3797 = vst [vmem:[#allocation38_spill] sm:$0xff] %v2221_v60  ;;  %3798 = vst [vmem:[#allocation39_spill] sm:$0xff] %v2234_v19  ;;  %v188_v11 = vrot.slane %v120_v0, 1  ;;  %v189_v17 = vrot.slane %v121_v1, 1  ;;  %v138_v2 = vmul.f32 %v1970_v13, %v2061_v36  ;;  %v139_v35 = vmul.f32 %v1970_v13, %v2211_v27 }
  0x17   :  { %v140_v3 = vmul.f32 %v1970_v13, %v2078_v41  ;;  %v141_v10 = vmul.f32 %v1970_v13, %v2216_v55  ;;  %v142_v56 = vmul.f32 %v1970_v13, %v2083_v42  ;;  %v143_v57 = vmul.f32 %v1970_v13, %v2221_v60 }
  0x18   :  { %v144_v58 = vmul.f32 %v1970_v13, %v2088_v43  ;;  %v145_v59 = vmul.f32 %v1970_v13, %v2234_v19  ;;  %v181_v62 = vsel %vm178_vm0, %v179_v48, %v180_v18  ;;  %v184_v63 = vsel %vm178_vm0, %v182_v26, %v183_v12 }
  0x19   :  { %v191_v0 = vrot.slane %v2172_v5, 1  ;;  %v192_v1 = vrot.slane %v2176_v6, 1  ;;  %v187_v55 = vsel %vm178_vm0, %v185_v25, %v186_v34  ;;  %v190_v42 = vsel %vm178_vm0, %v188_v11, %v189_v17 }
  0x1a   :  { %v194_v60 = vrot.slane %v2180_v7, 1  ;;  %v195_v41 = vrot.slane %v2184_v8, 1  ;;  %v197_v43 = vrot.slane %v2188_v4, 1  ;;  %v198_v13 = vrot.slane %v2192_v24, 1 }
  0x1b   :  { %v200_v18 = vrot.slane %v2196_v23, 1  ;;  %v201_v48 = vrot.slane %v129_v22, 1  ;;  %v203_v12 = vrot.slane %v130_v21, 1  ;;  %v204_v26 = vrot.slane %v131_v15, 1 }
  0x1c   :  { %v206_v5 = vrot.slane %v132_v20, 1  ;;  %v207_v19 = vrot.slane %v133_v54, 1  ;;  %v209_v6 = vrot.slane %v134_v29, 1  ;;  %v210_v27 = vrot.slane %v135_v61, 1  ;;  %v3804_v61 = vld [vmem:[#allocation4_spill] sm:$0xff] }
  0x1d   :  { %v212_v25 = vrot.slane %v136_v28, 1  ;;  %v213_v34 = vrot.slane %v137_v49, 1  ;;  %v215_v11 = vrot.slane %v138_v2, 1  ;;  %v216_v17 = vrot.slane %v139_v35, 1  ;;  %v3805_v2 = vld [vmem:[#allocation17_spill] sm:$0xff] }
  0x1e   :  { %v218_v7 = vrot.slane %v140_v3, 1  ;;  %v219_v36 = vrot.slane %v141_v10, 1  ;;  %v221_v8 = vrot.slane %v142_v56, 1  ;;  %v222_v16 = vrot.slane %v143_v57, 1  ;;  %v3806_v3 = vld [vmem:[#allocation5_spill] sm:$0xff]  ;;  %v3807_v57 = vld [vmem:[#allocation18_spill] sm:$0xff] }
  0x1f   :  { %v224_v4 = vrot.slane %v144_v58, 1  ;;  %v225_v14 = vrot.slane %v145_v59, 1  ;;  %v193_v24 = vsel %vm178_vm0, %v191_v0, %v192_v1  ;;  %v196_v22 = vsel %vm178_vm0, %v194_v60, %v195_v41  ;;  %v3808_v58 = vld [vmem:[#allocation10_spill] sm:$0xff]  ;;  %v3810_v0 = vld [vmem:[#allocation11_spill] sm:$0xff] }
  0x20   :  { %v199_v15 = vsel %vm178_vm0, %v197_v43, %v198_v13  ;;  %v202_v20 = vsel %vm178_vm0, %v200_v18, %v201_v48  ;;  %v205_v21 = vsel %vm178_vm0, %v203_v12, %v204_v26  ;;  %v208_v23 = vsel %vm178_vm0, %v206_v5, %v207_v19  ;;  %v3811_v13 = vld [vmem:[#allocation29_spill] sm:$0xff]  ;;  %v3812_v48 = vld [vmem:[#allocation12_spill] sm:$0xff]  ;;  %v3813_v26 = vld [vmem:[#allocation30_spill] sm:$0xff] }
  0x21   :  { %v211_v28 = vsel %vm178_vm0, %v209_v6, %v210_v27  ;;  %v214_v10 = vsel %vm178_vm0, %v212_v25, %v213_v34  ;;  %v217_v29 = vsel %vm178_vm0, %v215_v11, %v216_v17  ;;  %v220_v35 = vsel %vm178_vm0, %v218_v7, %v219_v36  ;;  %v3814_v6 = vld [vmem:[#allocation19_spill] sm:$0xff]  ;;  %v3816_v17 = vld [vmem:[#allocation20_spill] sm:$0xff] }
  0x22   :  { %v2274_v49 = vadd.f32 %v181_v62, %v2037_v30  ;;  %v2277_v41 = vadd.f32 %v184_v63, %v2040_v31  ;;  %v223_v43 = vsel %vm178_vm0, %v221_v8, %v222_v16  ;;  %v226_v54 = vsel %vm178_vm0, %v224_v4, %v225_v14  ;;  %v3809_v62 = vld [vmem:[#allocation28_spill] sm:$0xff]  ;;  %v3815_v34 = vld [vmem:[#allocation31_spill] sm:$0xff] }
  0x23   :  { %v2282_v19 = vadd.f32 %v187_v55, %v2043_v32  ;;  %v2285_v27 = vadd.f32 %v190_v42, %v2046_v33  ;;  %v2288_v60 = vadd.f32 %v193_v24, %v2064_v37  ;;  %v2291_v36 = vadd.f32 %v196_v22, %v2067_v38  ;;  %v3800_v42 = vld [vmem:[#allocation6_spill] sm:$0xff]  ;;  %v3803_v55 = vld [vmem:[#allocation9_spill] sm:$0xff]  ;;  %v3817_v8 = vld [vmem:[#allocation32_spill] sm:$0xff] }
  0x24   :  { %v2294_v30 = vadd.f32 %v199_v15, %v2070_v39  ;;  %v2297_v31 = vadd.f32 %v202_v20, %v2073_v40  ;;  %v2300_v14 = vadd.f32 %v205_v21, %v2091_v44  ;;  %v2303_v16 = vadd.f32 %v208_v23, %v2094_v45  ;;  %v3801_v45 = vld [vmem:[#allocation8_spill] sm:$0xff]  ;;  %v3818_v24 = vld [vmem:[#allocation21_spill] sm:$0xff]  ;;  %v3820_v21 = vld [vmem:[#allocation22_spill] sm:$0xff] }
  0x25   :  { %v2306_v32 = vadd.f32 %v211_v28, %v2097_v46  ;;  %v2309_v33 = vadd.f32 %v214_v10, %v2100_v47  ;;  %v2312_v37 = vadd.f32 %v217_v29, %v2113_v50  ;;  %v2315_v38 = vadd.f32 %v220_v35, %v2116_v51  ;;  %v3802_v47 = vld [vmem:[#allocation3_spill] sm:$0xff]  ;;  %v3819_v15 = vld [vmem:[#allocation33_spill] sm:$0xff]  ;;  %v3821_v28 = vld [vmem:[#allocation34_spill] sm:$0xff] }
  0x26   :  { %v2318_v39 = vadd.f32 %v223_v43, %v2119_v52  ;;  %v2321_v40 = vadd.f32 %v226_v54, %v2122_v53  ;;  %v263_v44 = vmul.f32 %v3800_v42, %v1953_v9  ;;  %v264_v46 = vmul.f32 %v3800_v42, %v3801_v45  ;;  %v3822_v29 = vld [vmem:[#allocation23_spill] sm:$0xff] }
  0x27   :  { %v265_v50 = vmul.f32 %v3800_v42, %v3802_v47  ;;  %v266_v51 = vmul.f32 %v3800_v42, %v3803_v55  ;;  %v267_v52 = vmul.f32 %v3800_v42, %v3804_v61  ;;  %v268_v53 = vmul.f32 %v3800_v42, %v3805_v2  ;;  %v3823_v43 = vld [vmem:[#allocation35_spill] sm:$0xff]  ;;  %v3825_v55 = vld [vmem:[#allocation36_spill] sm:$0xff] }
  0x28   :  { %3799 = vst [vmem:[#allocation40_spill] sm:$0xff] %v2321_v40  ;;  %v269_v56 = vmul.f32 %v3800_v42, %v3806_v3  ;;  %v270_v9 = vmul.f32 %v3800_v42, %v3807_v57  ;;  %v271_v59 = vmul.f32 %v3800_v42, %v3808_v58  ;;  %v272_v63 = vmul.f32 %v3800_v42, %v3809_v62  ;;  %v3824_v57 = vld [vmem:[#allocation24_spill] sm:$0xff] }
  0x29   :  { %v273_v1 = vmul.f32 %v3800_v42, %v3810_v0  ;;  %v274_v18 = vmul.f32 %v3800_v42, %v3811_v13  ;;  %v275_v12 = vmul.f32 %v3800_v42, %v3812_v48  ;;  %v276_v5 = vmul.f32 %v3800_v42, %v3813_v26 }
  0x2a   :  { %v277_v25 = vmul.f32 %v3800_v42, %v3814_v6  ;;  %v278_v11 = vmul.f32 %v3800_v42, %v3815_v34  ;;  %v279_v7 = vmul.f32 %v3800_v42, %v3816_v17  ;;  %v280_v4 = vmul.f32 %v3800_v42, %v3817_v8 }
  0x2b   :  { %v281_v22 = vmul.f32 %v3800_v42, %v3818_v24  ;;  %v282_v20 = vmul.f32 %v3800_v42, %v3819_v15  ;;  %v283_v23 = vmul.f32 %v3800_v42, %v3820_v21  ;;  %v284_v10 = vmul.f32 %v3800_v42, %v3821_v28  ;;  %v3826_v21 = vld [vmem:[#allocation25_spill] sm:$0xff] }
  0x2c   :  { %v285_v35 = vmul.f32 %v3800_v42, %v3822_v29  ;;  %v286_v54 = vmul.f32 %v3800_v42, %v3823_v43  ;;  %v328_v45 = vrot.slane %v263_v44, 2  ;;  %v329_v17 = vrot.slane %v264_v46, 2  ;;  %v3827_v24 = vld [vmem:[#allocation37_spill] sm:$0xff]  ;;  %v3828_v44 = vld [vmem:[#allocation26_spill] sm:$0xff] }
  0x2d   :  { %v331_v8 = vrot.slane %v265_v50, 2  ;;  %v332_v34 = vrot.slane %v266_v51, 2  ;;  %v334_v26 = vrot.slane %v267_v52, 2  ;;  %v335_v13 = vrot.slane %v268_v53, 2  ;;  %v3829_v50 = vld [vmem:[#allocation38_spill] sm:$0xff]  ;;  %v3830_v52 = vld [vmem:[#allocation27_spill] sm:$0xff] }
  0x2e   :  { %v337_v62 = vrot.slane %v269_v56, 2  ;;  %v338_v15 = vrot.slane %v270_v9, 2  ;;  %v287_v2 = vmul.f32 %v3800_v42, %v3824_v57  ;;  %v288_v28 = vmul.f32 %v3800_v42, %v3825_v55  ;;  %v3831_v56 = vld [vmem:[#allocation39_spill] sm:$0xff] }
  0x2f   :  { %v289_v29 = vmul.f32 %v3800_v42, %v3826_v21  ;;  %v290_v43 = vmul.f32 %v3800_v42, %v3827_v24  ;;  %v291_v46 = vmul.f32 %v3800_v42, %v3828_v44  ;;  %v292_v51 = vmul.f32 %v3800_v42, %v3829_v50 }
  0x30   :  { %v293_v53 = vmul.f32 %v3800_v42, %v3830_v52  ;;  %v294_v9 = vmul.f32 %v3800_v42, %v3831_v56  ;;  %v330_v55 = vsel %vm327_vm1, %v328_v45, %v329_v17  ;;  %v333_v57 = vsel %vm327_vm1, %v331_v8, %v332_v34 }
  0x31   :  { %v340_v21 = vrot.slane %v271_v59, 2  ;;  %v341_v6 = vrot.slane %v272_v63, 2  ;;  %v336_v24 = vsel %vm327_vm1, %v334_v26, %v335_v13  ;;  %v339_v48 = vsel %vm327_vm1, %v337_v62, %v338_v15 }
  0x32   :  { %v343_v44 = vrot.slane %v273_v1, 2  ;;  %v344_v0 = vrot.slane %v274_v18, 2  ;;  %v346_v58 = vrot.slane %v275_v12, 2  ;;  %v347_v50 = vrot.slane %v276_v5, 2 }
  0x33   :  { %v349_v3 = vrot.slane %v277_v25, 2  ;;  %v350_v61 = vrot.slane %v278_v11, 2  ;;  %v352_v52 = vrot.slane %v279_v7, 2  ;;  %v353_v47 = vrot.slane %v280_v4, 2 }
  0x34   :  { %v355_v40 = vrot.slane %v281_v22, 2  ;;  %v356_v42 = vrot.slane %v282_v20, 2  ;;  %v358_v56 = vrot.slane %v283_v23, 2  ;;  %v359_v45 = vrot.slane %v284_v10, 2  ;;  %v3837_v10 = vld [vmem:[#allocation4_spill] sm:$0xff] }
  0x35   :  { %v361_v17 = vrot.slane %v285_v35, 2  ;;  %v362_v34 = vrot.slane %v286_v54, 2  ;;  %v364_v59 = vrot.slane %v287_v2, 2  ;;  %v365_v63 = vrot.slane %v288_v28, 2 }
  0x36   :  { %v367_v8 = vrot.slane %v289_v29, 2  ;;  %v368_v13 = vrot.slane %v290_v43, 2  ;;  %v370_v26 = vrot.slane %v291_v46, 2  ;;  %v371_v62 = vrot.slane %v292_v51, 2  ;;  %v3839_v29 = vld [vmem:[#allocation10_spill] sm:$0xff]  ;;  %v3841_v43 = vld [vmem:[#allocation12_spill] sm:$0xff] }
  0x37   :  { %v373_v1 = vrot.slane %v293_v53, 2  ;;  %v374_v18 = vrot.slane %v294_v9, 2  ;;  %v342_v12 = vsel %vm327_vm1, %v340_v21, %v341_v6  ;;  %v345_v5 = vsel %vm327_vm1, %v343_v44, %v344_v0  ;;  %v3842_v44 = vld [vmem:[#allocation19_spill] sm:$0xff]  ;;  %v3843_v51 = vld [vmem:[#allocation21_spill] sm:$0xff]  ;;  %v3844_v53 = vld [vmem:[#allocation22_spill] sm:$0xff] }
  0x38   :  { %v348_v25 = vsel %vm327_vm1, %v346_v58, %v347_v50  ;;  %v351_v11 = vsel %vm327_vm1, %v349_v3, %v350_v61  ;;  %v354_v7 = vsel %vm327_vm1, %v352_v52, %v353_v47  ;;  %v357_v4 = vsel %vm327_vm1, %v355_v40, %v356_v42  ;;  %v3845_v9 = vld [vmem:[#allocation23_spill] sm:$0xff] }
  0x39   :  { %v360_v2 = vsel %vm327_vm1, %v358_v56, %v359_v45  ;;  %v363_v22 = vsel %vm327_vm1, %v361_v17, %v362_v34  ;;  %v366_v15 = vsel %vm327_vm1, %v364_v59, %v365_v63  ;;  %v369_v20 = vsel %vm327_vm1, %v367_v8, %v368_v13  ;;  %v3846_v45 = vld [vmem:[#allocation24_spill] sm:$0xff]  ;;  %v3847_v34 = vld [vmem:[#allocation25_spill] sm:$0xff]  ;;  %v3848_v63 = vld [vmem:[#allocation26_spill] sm:$0xff] }
  0x3a   :  { %v392_v6 = vadd.f32 %v330_v55, %v2274_v49  ;;  %v393_v0 = vadd.f32 %v333_v57, %v2277_v41  ;;  %v372_v58 = vsel %vm327_vm1, %v370_v26, %v371_v62  ;;  %v375_v61 = vsel %vm327_vm1, %v373_v1, %v374_v18  ;;  %v2414_v49 = vld [vmem:[%s3659_s0 + $0x80] sm:$0xff]  ;;  %v3849_v13 = vld [vmem:[#allocation27_spill] sm:$0xff] }
  0x3b   :  { %v394_v47 = vadd.f32 %v336_v24, %v2282_v19  ;;  %v395_v40 = vadd.f32 %v339_v48, %v2285_v27  ;;  %v396_v3 = vadd.f32 %v342_v12, %v2288_v60  ;;  %v397_v21 = vadd.f32 %v345_v5, %v2291_v36  ;;  %3832 = vst [vmem:[#allocation6_spill] sm:$0xff] %v2414_v49  ;;  %v2427_v48 = vld [vmem:[%s3659_s0 + $0x120] sm:$0xff]  ;;  %v3836_v24 = vld [vmem:[#allocation7_spill] sm:$0xff] }
  0x3c   :  { %v398_v23 = vadd.f32 %v348_v25, %v2294_v30  ;;  %v399_v28 = vadd.f32 %v351_v11, %v2297_v31  ;;  %v400_v41 = vadd.f32 %v354_v7, %v2300_v14  ;;  %v401_v55 = vadd.f32 %v357_v4, %v2303_v16  ;;  %v3833_v31 = vld [vmem:[#allocation40_spill] sm:$0xff]  ;;  %3834 = vst [vmem:[#allocation8_spill] sm:$0xff] %v2427_v48  ;;  %v3835_v14 = vld [vmem:[#allocation3_spill] sm:$0xff] }
  0x3d   :  { %v402_v19 = vadd.f32 %v360_v2, %v2306_v32  ;;  %v403_v27 = vadd.f32 %v363_v22, %v2309_v33  ;;  %v404_v60 = vadd.f32 %v366_v15, %v2312_v37  ;;  %v405_v36 = vadd.f32 %v369_v20, %v2315_v38  ;;  %v3838_v33 = vld [vmem:[#allocation5_spill] sm:$0xff] }
  0x3e   :  { %v406_v30 = vadd.f32 %v372_v58, %v2318_v39  ;;  %v407_v57 = vadd.f32 %v375_v61, %v3833_v31  ;;  %v412_v16 = vmul.f32 %v3836_v24, %v3835_v14  ;;  %v413_v32 = vmul.f32 %v3836_v24, %v3837_v10  ;;  %v3840_v39 = vld [vmem:[#allocation11_spill] sm:$0xff] }
  0x3f   :  { %v414_v37 = vmul.f32 %v3836_v24, %v3838_v33  ;;  %v415_v38 = vmul.f32 %v3836_v24, %v3839_v29  ;;  %v416_v35 = vmul.f32 %v3836_v24, %v3840_v39  ;;  %v417_v54 = vmul.f32 %v3836_v24, %v3841_v43 }
  0x40   :  { %v418_v46 = vmul.f32 %v3836_v24, %v3842_v44  ;;  %v419_v50 = vmul.f32 %v3836_v24, %v2414_v49  ;;  %v420_v52 = vmul.f32 %v3836_v24, %v3843_v51  ;;  %v421_v56 = vmul.f32 %v3836_v24, %v3844_v53 }
  0x41   :  { %v422_v42 = vmul.f32 %v3836_v24, %v3845_v9  ;;  %v423_v17 = vmul.f32 %v3836_v24, %v3846_v45  ;;  %v424_v59 = vmul.f32 %v3836_v24, %v3847_v34  ;;  %v425_v8 = vmul.f32 %v3836_v24, %v3848_v63 }
  0x42   :  { %v426_v26 = vmul.f32 %v3836_v24, %v3849_v13  ;;  %v427_v62 = vmul.f32 %v3836_v24, %v2427_v48  ;;  %v2461_v1 = vadd.f32 %v412_v16, %v392_v6  ;;  %v2463_v18 = vadd.f32 %v413_v32, %v393_v0  ;;  %v3857_v24 = vld [vmem:[#allocation29_spill] sm:$0xff] }
  0x43   :  { %v2465_v12 = vadd.f32 %v414_v37, %v394_v47  ;;  %v2467_v5 = vadd.f32 %v415_v38, %v395_v40  ;;  %v2469_v25 = vadd.f32 %v416_v35, %v396_v3  ;;  %v2471_v11 = vadd.f32 %v417_v54, %v397_v21  ;;  %v2496_v47 = vld [vmem:[%s3659_s0 + $0x88] sm:$0x3]  ;;  %v3852_v40 = vld [vmem:[#allocation13_spill] sm:$0xff]  ;;  %v3858_v37 = vld [vmem:[#allocation30_spill] sm:$0xff] }
  0x44   :  { %v2473_v7 = vadd.f32 %v418_v46, %v398_v23  ;;  %v2475_v4 = vadd.f32 %v419_v50, %v399_v28  ;;  %v2477_v2 = vadd.f32 %v420_v52, %v400_v41  ;;  %v2479_v22 = vadd.f32 %v421_v56, %v401_v55  ;;  %3851 = vst [vmem:[#allocation32_spill] sm:$0xff] %v2496_v47  ;;  %v3853_v21 = vld [vmem:[#allocation9_spill] sm:$0xff]  ;;  %v3859_v54 = vld [vmem:[#allocation31_spill] sm:$0xff] }
  0x45   :  { %v2481_v15 = vadd.f32 %v422_v42, %v402_v19  ;;  %v2483_v20 = vadd.f32 %v423_v17, %v403_v27  ;;  %v2485_v6 = vadd.f32 %v424_v59, %v404_v60  ;;  %v2487_v0 = vadd.f32 %v425_v8, %v405_v36  ;;  %v3854_v41 = vld [vmem:[#allocation17_spill] sm:$0xff]  ;;  %v3855_v27 = vld [vmem:[#allocation18_spill] sm:$0xff] }
  0x46   :  { %v2489_v58 = vadd.f32 %v426_v26, %v406_v30  ;;  %v2491_v61 = vadd.f32 %v427_v62, %v407_v57  ;;  %v448_v3 = vmul.f32 %v3852_v40, %v3835_v14  ;;  %v449_v23 = vmul.f32 %v3852_v40, %v3853_v21  ;;  %v3856_v30 = vld [vmem:[#allocation28_spill] sm:$0xff]  ;;  %v3860_v42 = vld [vmem:[#allocation33_spill] sm:$0xff]  ;;  %v3861_v8 = vld [vmem:[#allocation34_spill] sm:$0xff] }
  0x47   :  { %v450_v28 = vmul.f32 %v3852_v40, %v3837_v10  ;;  %v451_v55 = vmul.f32 %v3852_v40, %v3854_v41  ;;  %v452_v19 = vmul.f32 %v3852_v40, %v3838_v33  ;;  %v453_v60 = vmul.f32 %v3852_v40, %v3855_v27  ;;  %v3866_v27 = vld [vmem:[#allocation38_spill] sm:$0xff] }
  0x48   :  { %3850 = vst [vmem:[#allocation20_spill] sm:$0xff] %v2491_v61  ;;  %v454_v36 = vmul.f32 %v3852_v40, %v3839_v29  ;;  %v455_v31 = vmul.f32 %v3852_v40, %v3856_v30  ;;  %v2516_v57 = vmul.f32 %v3852_v40, %v3840_v39  ;;  %v457_v16 = vmul.f32 %v3852_v40, %v3857_v24 }
  0x49   :  { %v458_v32 = vmul.f32 %v3852_v40, %v3841_v43  ;;  %v459_v38 = vmul.f32 %v3852_v40, %v3858_v37  ;;  %v460_v35 = vmul.f32 %v3852_v40, %v3842_v44  ;;  %v461_v46 = vmul.f32 %v3852_v40, %v3859_v54  ;;  %v3862_v54 = vld [vmem:[#allocation35_spill] sm:$0xff]  ;;  %v3863_v44 = vld [vmem:[#allocation36_spill] sm:$0xff] }
  0x4a   :  { %v462_v50 = vmul.f32 %v3852_v40, %v2414_v49  ;;  %v463_v52 = vmul.f32 %v3852_v40, %v2496_v47  ;;  %v464_v56 = vmul.f32 %v3852_v40, %v3843_v51  ;;  %v465_v17 = vmul.f32 %v3852_v40, %v3860_v42  ;;  %v2551_v42 = vld [vmem:[%s3659_s0 + $0x128] sm:$0x3] }
  0x4b   :  { %v466_v59 = vmul.f32 %v3852_v40, %v3844_v53  ;;  %v467_v26 = vmul.f32 %v3852_v40, %v3861_v8  ;;  %v468_v62 = vmul.f32 %v3852_v40, %v3845_v9  ;;  %v469_v49 = vmul.f32 %v3852_v40, %v3862_v54  ;;  %3864 = vst [vmem:[#allocation40_spill] sm:$0xff] %v2551_v42 }
  0x4c   :  { %v470_v47 = vmul.f32 %v3852_v40, %v3846_v45  ;;  %v471_v51 = vmul.f32 %v3852_v40, %v3863_v44  ;;  %v512_v53 = vrot.slane %v448_v3, 1  ;;  %v513_v37 = vrot.slane %v449_v23, 1  ;;  %v3865_v45 = vld [vmem:[#allocation37_spill] sm:$0xff]  ;;  %v3867_v23 = vld [vmem:[#allocation39_spill] sm:$0xff] }
  0x4d   :  { %v515_v8 = vrot.slane %v450_v28, 1  ;;  %v516_v43 = vrot.slane %v451_v55, 1  ;;  %v518_v24 = vrot.slane %v452_v19, 1  ;;  %v519_v9 = vrot.slane %v453_v60, 1 }
  0x4e   :  { %v521_v39 = vrot.slane %v454_v36, 1  ;;  %v522_v30 = vrot.slane %v455_v31, 1  ;;  %v472_v54 = vmul.f32 %v3852_v40, %v3847_v34  ;;  %v473_v29 = vmul.f32 %v3852_v40, %v3865_v45 }
  0x4f   :  { %v474_v44 = vmul.f32 %v3852_v40, %v3848_v63  ;;  %v475_v33 = vmul.f32 %v3852_v40, %v3866_v27  ;;  %v476_v3 = vmul.f32 %v3852_v40, %v3849_v13  ;;  %v477_v28 = vmul.f32 %v3852_v40, %v3867_v23 }
  0x50   :  { %v478_v55 = vmul.f32 %v3852_v40, %v2427_v48  ;;  %v479_v19 = vmul.f32 %v3852_v40, %v2551_v42  ;;  %v514_v60 = vsel %vm178_vm0, %v512_v53, %v513_v37  ;;  %v517_v36 = vsel %vm178_vm0, %v515_v8, %v516_v43 }
  0x51   :  { %v524_v31 = vrot.slane %v2516_v57, 1  ;;  %v525_v63 = vrot.slane %v457_v16, 1  ;;  %v520_v27 = vsel %vm178_vm0, %v518_v24, %v519_v9  ;;  %v523_v13 = vsel %vm178_vm0, %v521_v39, %v522_v30 }
  0x52   :  { %v527_v45 = vrot.slane %v458_v32, 1  ;;  %v528_v34 = vrot.slane %v459_v38, 1  ;;  %v530_v23 = vrot.slane %v460_v35, 1  ;;  %v531_v41 = vrot.slane %v461_v46, 1 }
  0x53   :  { %v533_v10 = vrot.slane %v462_v50, 1  ;;  %v534_v48 = vrot.slane %v463_v52, 1  ;;  %v536_v21 = vrot.slane %v464_v56, 1  ;;  %v537_v14 = vrot.slane %v465_v17, 1 }
  0x54   :  { %v539_v40 = vrot.slane %v466_v59, 1  ;;  %v540_v42 = vrot.slane %v467_v26, 1  ;;  %v542_v53 = vrot.slane %v468_v62, 1  ;;  %v543_v37 = vrot.slane %v469_v49, 1  ;;  %v3877_v26 = vld [vmem:[#allocation10_spill] sm:$0xff] }
  0x55   :  { %v545_v43 = vrot.slane %v470_v47, 1  ;;  %v546_v8 = vrot.slane %v471_v51, 1  ;;  %v548_v57 = vrot.slane %v472_v54, 1  ;;  %v549_v16 = vrot.slane %v473_v29, 1 }
  0x56   :  { %v551_v61 = vrot.slane %v474_v44, 1  ;;  %v552_v9 = vrot.slane %v475_v33, 1  ;;  %v554_v24 = vrot.slane %v476_v3, 1  ;;  %v555_v39 = vrot.slane %v477_v28, 1  ;;  %v3878_v3 = vld [vmem:[#allocation28_spill] sm:$0xff]  ;;  %v3879_v28 = vld [vmem:[#allocation11_spill] sm:$0xff] }
  0x57   :  { %v557_v30 = vrot.slane %v478_v55, 1  ;;  %v558_v32 = vrot.slane %v479_v19, 1  ;;  %v526_v38 = vsel %vm178_vm0, %v524_v31, %v525_v63  ;;  %v529_v35 = vsel %vm178_vm0, %v527_v45, %v528_v34  ;;  %v3880_v19 = vld [vmem:[#allocation29_spill] sm:$0xff] }
  0x58   :  { %v532_v46 = vsel %vm178_vm0, %v530_v23, %v531_v41  ;;  %v535_v50 = vsel %vm178_vm0, %v533_v10, %v534_v48  ;;  %v538_v49 = vsel %vm178_vm0, %v536_v21, %v537_v14  ;;  %v541_v51 = vsel %vm178_vm0, %v539_v40, %v540_v42  ;;  %v3882_v40 = vld [vmem:[#allocation30_spill] sm:$0xff] }
  0x59   :  { %v544_v29 = vsel %vm178_vm0, %v542_v53, %v543_v37  ;;  %v547_v33 = vsel %vm178_vm0, %v545_v43, %v546_v8  ;;  %v550_v44 = vsel %vm178_vm0, %v548_v57, %v549_v16  ;;  %v553_v47 = vsel %vm178_vm0, %v551_v61, %v552_v9  ;;  %v3883_v37 = vld [vmem:[#allocation19_spill] sm:$0xff]  ;;  %v3885_v16 = vld [vmem:[#allocation6_spill] sm:$0xff] }
  0x5a   :  { %v2585_v63 = vadd.f32 %v514_v60, %v2461_v1  ;;  %v2588_v45 = vadd.f32 %v517_v36, %v2463_v18  ;;  %v556_v48 = vsel %vm178_vm0, %v554_v24, %v555_v39  ;;  %v559_v14 = vsel %vm178_vm0, %v557_v30, %v558_v32  ;;  %v3881_v36 = vld [vmem:[#allocation12_spill] sm:$0xff]  ;;  %v3884_v8 = vld [vmem:[#allocation31_spill] sm:$0xff]  ;;  %v3887_v30 = vld [vmem:[#allocation21_spill] sm:$0xff] }
  0x5b   :  { %v2593_v10 = vadd.f32 %v520_v27, %v2465_v12  ;;  %v2596_v34 = vadd.f32 %v523_v13, %v2467_v5  ;;  %v2599_v21 = vadd.f32 %v526_v38, %v2469_v25  ;;  %v2602_v61 = vadd.f32 %v529_v35, %v2471_v11  ;;  %v3871_v27 = vld [vmem:[#allocation14_spill] sm:$0xff]  ;;  %v3886_v24 = vld [vmem:[#allocation32_spill] sm:$0xff]  ;;  %v3888_v38 = vld [vmem:[#allocation33_spill] sm:$0xff] }
  0x5c   :  { %v2605_v1 = vadd.f32 %v532_v46, %v2473_v7  ;;  %v2608_v18 = vadd.f32 %v535_v50, %v2475_v4  ;;  %v2611_v41 = vadd.f32 %v538_v49, %v2477_v2  ;;  %v2614_v12 = vadd.f32 %v541_v51, %v2479_v22  ;;  %v3868_v4 = vld [vmem:[#allocation20_spill] sm:$0xff]  ;;  %v3870_v22 = vld [vmem:[#allocation3_spill] sm:$0xff]  ;;  %v3889_v46 = vld [vmem:[#allocation22_spill] sm:$0xff] }
  0x5d   :  { %v2617_v13 = vadd.f32 %v544_v29, %v2481_v15  ;;  %v2620_v5 = vadd.f32 %v547_v33, %v2483_v20  ;;  %v2623_v25 = vadd.f32 %v550_v44, %v2485_v6  ;;  %v2626_v11 = vadd.f32 %v553_v47, %v2487_v0  ;;  %v3872_v15 = vld [vmem:[#allocation9_spill] sm:$0xff]  ;;  %v3873_v20 = vld [vmem:[#allocation4_spill] sm:$0xff]  ;;  %v3890_v49 = vld [vmem:[#allocation34_spill] sm:$0xff] }
  0x5e   :  { %v2629_v7 = vadd.f32 %v556_v48, %v2489_v58  ;;  %v2632_v2 = vadd.f32 %v559_v14, %v3868_v4  ;;  %v596_v54 = vmul.f32 %v3871_v27, %v3870_v22  ;;  %v597_v52 = vmul.f32 %v3871_v27, %v3872_v15  ;;  %v3874_v6 = vld [vmem:[#allocation17_spill] sm:$0xff]  ;;  %v3876_v58 = vld [vmem:[#allocation18_spill] sm:$0xff]  ;;  %v3891_v29 = vld [vmem:[#allocation23_spill] sm:$0xff] }
  0x5f   :  { %v598_v56 = vmul.f32 %v3871_v27, %v3873_v20  ;;  %v599_v42 = vmul.f32 %v3871_v27, %v3874_v6  ;;  %v3875_v0 = vld [vmem:[#allocation5_spill] sm:$0xff]  ;;  %v601_v59 = vmul.f32 %v3871_v27, %v3876_v58  ;;  %v602_v62 = vmul.f32 %v3871_v27, %v3877_v26  ;;  %v3892_v44 = vld [vmem:[#allocation35_spill] sm:$0xff]  ;;  %v3893_v48 = vld [vmem:[#allocation24_spill] sm:$0xff] }
  0x60   :  { %3869 = vst [vmem:[#allocation7_spill] sm:$0xff] %v2632_v2  ;;  %v600_v17 = vmul.f32 %v3871_v27, %v3875_v0  ;;  %v603_v23 = vmul.f32 %v3871_v27, %v3878_v3  ;;  %v604_v55 = vmul.f32 %v3871_v27, %v3879_v28  ;;  %v605_v60 = vmul.f32 %v3871_v27, %v3880_v19  ;;  %v3894_v4 = vld [vmem:[#allocation36_spill] sm:$0xff]  ;;  %v3895_v3 = vld [vmem:[#allocation25_spill] sm:$0xff] }
  0x61   :  { %v606_v31 = vmul.f32 %v3871_v27, %v3881_v36  ;;  %v607_v53 = vmul.f32 %v3871_v27, %v3882_v40  ;;  %v608_v43 = vmul.f32 %v3871_v27, %v3883_v37  ;;  %v609_v57 = vmul.f32 %v3871_v27, %v3884_v8  ;;  %v3896_v6 = vld [vmem:[#allocation37_spill] sm:$0xff] }
  0x62   :  { %v610_v9 = vmul.f32 %v3871_v27, %v3885_v16  ;;  %v611_v39 = vmul.f32 %v3871_v27, %v3886_v24  ;;  %v612_v32 = vmul.f32 %v3871_v27, %v3887_v30  ;;  %v613_v35 = vmul.f32 %v3871_v27, %v3888_v38 }
  0x63   :  { %v614_v50 = vmul.f32 %v3871_v27, %v3889_v46  ;;  %v615_v51 = vmul.f32 %v3871_v27, %v3890_v49  ;;  %v616_v33 = vmul.f32 %v3871_v27, %v3891_v29  ;;  %v617_v47 = vmul.f32 %v3871_v27, %v3892_v44  ;;  %v3897_v29 = vld [vmem:[#allocation26_spill] sm:$0xff] }
  0x64   :  { %v618_v14 = vmul.f32 %v3871_v27, %v3893_v48  ;;  %v619_v22 = vmul.f32 %v3871_v27, %v3894_v4  ;;  %v660_v15 = vrot.slane %v596_v54, 2  ;;  %v661_v30 = vrot.slane %v597_v52, 2  ;;  %v3898_v46 = vld [vmem:[#allocation38_spill] sm:$0xff]  ;;  %v3899_v54 = vld [vmem:[#allocation27_spill] sm:$0xff] }
  0x65   :  { %v663_v38 = vrot.slane %v598_v56, 2  ;;  %v664_v24 = vrot.slane %v599_v42, 2  ;;  %v666_v8 = vrot.slane %v600_v17, 2  ;;  %v667_v40 = vrot.slane %v601_v59, 2  ;;  %v3900_v56 = vld [vmem:[#allocation39_spill] sm:$0xff]  ;;  %v3901_v17 = vld [vmem:[#allocation8_spill] sm:$0xff] }
  0x66   :  { %v669_v19 = vrot.slane %v602_v62, 2  ;;  %v670_v49 = vrot.slane %v603_v23, 2  ;;  %v620_v58 = vmul.f32 %v3871_v27, %v3895_v3  ;;  %v621_v44 = vmul.f32 %v3871_v27, %v3896_v6  ;;  %v3902_v62 = vld [vmem:[#allocation40_spill] sm:$0xff] }
  0x67   :  { %v622_v48 = vmul.f32 %v3871_v27, %v3897_v29  ;;  %v623_v4 = vmul.f32 %v3871_v27, %v3898_v46  ;;  %v624_v52 = vmul.f32 %v3871_v27, %v3899_v54  ;;  %v625_v42 = vmul.f32 %v3871_v27, %v3900_v56 }
  0x68   :  { %v626_v59 = vmul.f32 %v3871_v27, %v3901_v17  ;;  %v627_v23 = vmul.f32 %v3871_v27, %v3902_v62  ;;  %v662_v6 = vsel %vm327_vm1, %v660_v15, %v661_v30  ;;  %v665_v3 = vsel %vm327_vm1, %v663_v38, %v664_v24 }
  0x69   :  { %v672_v29 = vrot.slane %v604_v55, 2  ;;  %v673_v16 = vrot.slane %v605_v60, 2  ;;  %v668_v46 = vsel %vm327_vm1, %v666_v8, %v667_v40  ;;  %v671_v37 = vsel %vm327_vm1, %v669_v19, %v670_v49 }
  0x6a   :  { %v675_v54 = vrot.slane %v606_v31, 2  ;;  %v676_v36 = vrot.slane %v607_v53, 2  ;;  %v678_v28 = vrot.slane %v608_v43, 2  ;;  %v679_v56 = vrot.slane %v609_v57, 2 }
  0x6b   :  { %v681_v26 = vrot.slane %v610_v9, 2  ;;  %v682_v0 = vrot.slane %v611_v39, 2  ;;  %v684_v17 = vrot.slane %v612_v32, 2  ;;  %v685_v20 = vrot.slane %v613_v35, 2 }
  0x6c   :  { %v687_v2 = vrot.slane %v614_v50, 2  ;;  %v688_v27 = vrot.slane %v615_v51, 2  ;;  %v690_v62 = vrot.slane %v616_v33, 2  ;;  %v691_v15 = vrot.slane %v617_v47, 2  ;;  %v3908_v47 = vld [vmem:[#allocation5_spill] sm:$0xff] }
  0x6d   :  { %v693_v30 = vrot.slane %v618_v14, 2  ;;  %v694_v24 = vrot.slane %v619_v22, 2  ;;  %v696_v55 = vrot.slane %v620_v58, 2  ;;  %v697_v60 = vrot.slane %v621_v44, 2 }
  0x6e   :  { %v699_v38 = vrot.slane %v622_v48, 2  ;;  %v700_v40 = vrot.slane %v623_v4, 2  ;;  %v702_v8 = vrot.slane %v624_v52, 2  ;;  %v703_v19 = vrot.slane %v625_v42, 2  ;;  %v3910_v48 = vld [vmem:[#allocation11_spill] sm:$0xff]  ;;  %v3914_v42 = vld [vmem:[#allocation22_spill] sm:$0xff] }
  0x6f   :  { %v705_v31 = vrot.slane %v626_v59, 2  ;;  %v706_v53 = vrot.slane %v627_v23, 2  ;;  %v674_v43 = vsel %vm327_vm1, %v672_v29, %v673_v16  ;;  %v677_v57 = vsel %vm327_vm1, %v675_v54, %v676_v36  ;;  %v3912_v4 = vld [vmem:[#allocation19_spill] sm:$0xff]  ;;  %v3913_v54 = vld [vmem:[#allocation6_spill] sm:$0xff]  ;;  %v3916_v23 = vld [vmem:[#allocation24_spill] sm:$0xff] }
  0x70   :  { %v680_v9 = vsel %vm327_vm1, %v678_v28, %v679_v56  ;;  %v683_v39 = vsel %vm327_vm1, %v681_v26, %v682_v0  ;;  %v686_v32 = vsel %vm327_vm1, %v684_v17, %v685_v20  ;;  %v689_v35 = vsel %vm327_vm1, %v687_v2, %v688_v27  ;;  %v3915_v59 = vld [vmem:[#allocation23_spill] sm:$0xff] }
  0x71   :  { %v692_v58 = vsel %vm327_vm1, %v690_v62, %v691_v15  ;;  %v695_v50 = vsel %vm327_vm1, %v693_v30, %v694_v24  ;;  %v698_v49 = vsel %vm327_vm1, %v696_v55, %v697_v60  ;;  %v701_v51 = vsel %vm327_vm1, %v699_v38, %v700_v40  ;;  %v3917_v15 = vld [vmem:[#allocation25_spill] sm:$0xff]  ;;  %v3918_v24 = vld [vmem:[#allocation26_spill] sm:$0xff]  ;;  %v3919_v60 = vld [vmem:[#allocation27_spill] sm:$0xff] }
  0x72   :  { %v724_v16 = vadd.f32 %v662_v6, %v2585_v63  ;;  %v725_v36 = vadd.f32 %v665_v3, %v2588_v45  ;;  %v704_v28 = vsel %vm327_vm1, %v702_v8, %v703_v19  ;;  %v707_v0 = vsel %vm327_vm1, %v705_v31, %v706_v53  ;;  %v2725_v63 = vld [vmem:[%s3659_s0 + $0x90] sm:$0xff] }
  0x73   :  { %v726_v20 = vadd.f32 %v668_v46, %v2593_v10  ;;  %v727_v2 = vadd.f32 %v671_v37, %v2596_v34  ;;  %v728_v26 = vadd.f32 %v674_v43, %v2599_v21  ;;  %v729_v29 = vadd.f32 %v677_v57, %v2602_v61  ;;  %3903 = vst [vmem:[#allocation13_spill] sm:$0xff] %v2725_v63  ;;  %v2738_v37 = vld [vmem:[%s3659_s0 + $0x130] sm:$0xff]  ;;  %v3907_v46 = vld [vmem:[#allocation15_spill] sm:$0xff] }
  0x74   :  { %v730_v33 = vadd.f32 %v680_v9, %v2605_v1  ;;  %v731_v44 = vadd.f32 %v683_v39, %v2608_v18  ;;  %v732_v45 = vadd.f32 %v686_v32, %v2611_v41  ;;  %v733_v6 = vadd.f32 %v689_v35, %v2614_v12  ;;  %v3904_v18 = vld [vmem:[#allocation7_spill] sm:$0xff]  ;;  %3905 = vst [vmem:[#allocation20_spill] sm:$0xff] %v2738_v37  ;;  %v3906_v41 = vld [vmem:[#allocation4_spill] sm:$0xff] }
  0x75   :  { %v734_v10 = vadd.f32 %v692_v58, %v2617_v13  ;;  %v735_v34 = vadd.f32 %v695_v50, %v2620_v5  ;;  %v736_v21 = vadd.f32 %v698_v49, %v2623_v25  ;;  %v737_v61 = vadd.f32 %v701_v51, %v2626_v11  ;;  %v3909_v5 = vld [vmem:[#allocation10_spill] sm:$0xff]  ;;  %v3920_v40 = vld [vmem:[#allocation8_spill] sm:$0xff] }
  0x76   :  { %v738_v1 = vadd.f32 %v704_v28, %v2629_v7  ;;  %v739_v3 = vadd.f32 %v707_v0, %v3904_v18  ;;  %v744_v12 = vmul.f32 %v3907_v46, %v3906_v41  ;;  %v745_v13 = vmul.f32 %v3907_v46, %v3908_v47  ;;  %v3911_v7 = vld [vmem:[#allocation12_spill] sm:$0xff] }
  0x77   :  { %v746_v25 = vmul.f32 %v3907_v46, %v3909_v5  ;;  %v747_v11 = vmul.f32 %v3907_v46, %v3910_v48  ;;  %v748_v14 = vmul.f32 %v3907_v46, %v3911_v7  ;;  %v749_v22 = vmul.f32 %v3907_v46, %v3912_v4 }
  0x78   :  { %v750_v52 = vmul.f32 %v3907_v46, %v3913_v54  ;;  %v751_v56 = vmul.f32 %v3907_v46, %v2725_v63  ;;  %v752_v17 = vmul.f32 %v3907_v46, %v3914_v42  ;;  %v753_v62 = vmul.f32 %v3907_v46, %v3915_v59 }
  0x79   :  { %v754_v27 = vmul.f32 %v3907_v46, %v3916_v23  ;;  %v755_v30 = vmul.f32 %v3907_v46, %v3917_v15  ;;  %v756_v55 = vmul.f32 %v3907_v46, %v3918_v24  ;;  %v757_v38 = vmul.f32 %v3907_v46, %v3919_v60 }
  0x7a   :  { %v758_v8 = vmul.f32 %v3907_v46, %v3920_v40  ;;  %v759_v19 = vmul.f32 %v3907_v46, %v2738_v37  ;;  %v2772_v31 = vadd.f32 %v744_v12, %v724_v16  ;;  %v2774_v53 = vadd.f32 %v745_v13, %v725_v36 }
  0x7b   :  { %v2776_v43 = vadd.f32 %v746_v25, %v726_v20  ;;  %v2778_v57 = vadd.f32 %v747_v11, %v727_v2  ;;  %v2780_v9 = vadd.f32 %v748_v14, %v728_v26  ;;  %v2782_v39 = vadd.f32 %v749_v22, %v729_v29  ;;  %v2807_v20 = vld [vmem:[%s3659_s0 + $0x98] sm:$0x3]  ;;  %v3927_v2 = vld [vmem:[#allocation16_spill] sm:$0xff]  ;;  %v3935_v22 = vld [vmem:[#allocation34_spill] sm:$0xff] }
  0x7c   :  { %v2784_v32 = vadd.f32 %v750_v52, %v730_v33  ;;  %v2786_v35 = vadd.f32 %v751_v56, %v731_v44  ;;  %v2788_v58 = vadd.f32 %v752_v17, %v732_v45  ;;  %v2790_v50 = vadd.f32 %v753_v62, %v733_v6  ;;  %3926 = vst [vmem:[#allocation7_spill] sm:$0xff] %v2807_v20  ;;  %v3928_v29 = vld [vmem:[#allocation17_spill] sm:$0xff]  ;;  %v3929_v45 = vld [vmem:[#allocation18_spill] sm:$0xff]  ;;  %v3934_v25 = vld [vmem:[#allocation32_spill] sm:$0xff] }
  0x7d   :  { %v2792_v49 = vadd.f32 %v754_v27, %v734_v10  ;;  %v2794_v51 = vadd.f32 %v755_v30, %v735_v34  ;;  %v2796_v16 = vadd.f32 %v756_v55, %v736_v21  ;;  %v2798_v36 = vadd.f32 %v757_v38, %v737_v61  ;;  %v3930_v34 = vld [vmem:[#allocation28_spill] sm:$0xff]  ;;  %v3936_v56 = vld [vmem:[#allocation35_spill] sm:$0xff]  ;;  %v2852_v62 = vld [vmem:[%s3659_s0 + $0x138] sm:$0x3] }
  0x7e   :  { %v2800_v28 = vadd.f32 %v758_v8, %v738_v1  ;;  %v2802_v0 = vadd.f32 %v759_v19, %v739_v3  ;;  %v780_v26 = vmul.f32 %v3927_v2, %v3906_v41  ;;  %v781_v33 = vmul.f32 %v3927_v2, %v3928_v29  ;;  %v3931_v1 = vld [vmem:[#allocation29_spill] sm:$0xff]  ;;  %v3932_v41 = vld [vmem:[#allocation30_spill] sm:$0xff]  ;;  %3937 = vst [vmem:[#allocation4_spill] sm:$0xff] %v2852_v62  ;;  %v3938_v30 = vld [vmem:[#allocation36_spill] sm:$0xff] }
  0x7f   :  { %3921 = vst [vmem:[#allocation3_spill] sm:$0xff] %v2794_v51  ;;  %3922 = vst [vmem:[#allocation14_spill] sm:$0xff] %v2796_v16  ;;  %v782_v44 = vmul.f32 %v3927_v2, %v3908_v47  ;;  %v783_v6 = vmul.f32 %v3927_v2, %v3929_v45  ;;  %v784_v10 = vmul.f32 %v3927_v2, %v3909_v5  ;;  %v3933_v47 = vld [vmem:[#allocation31_spill] sm:$0xff]  ;;  %v3939_v38 = vld [vmem:[#allocation37_spill] sm:$0xff] }
  0x80   :  { %3923 = vst [vmem:[#allocation9_spill] sm:$0xff] %v2798_v36  ;;  %3924 = vst [vmem:[#allocation21_spill] sm:$0xff] %v2800_v28  ;;  %v785_v21 = vmul.f32 %v3927_v2, %v3930_v34  ;;  %v786_v61 = vmul.f32 %v3927_v2, %v3910_v48  ;;  %v787_v18 = vmul.f32 %v3927_v2, %v3931_v1  ;;  %v844_v8 = vrot.slane %v780_v26, 1  ;;  %v3940_v1 = vld [vmem:[#allocation38_spill] sm:$0xff]  ;;  %v3942_v26 = vld [vmem:[#allocation40_spill] sm:$0xff] }
  0x81   :  { %3925 = vst [vmem:[#allocation33_spill] sm:$0xff] %v2802_v0  ;;  %v788_v3 = vmul.f32 %v3927_v2, %v3911_v7  ;;  %v789_v46 = vmul.f32 %v3927_v2, %v3932_v41  ;;  %v790_v12 = vmul.f32 %v3927_v2, %v3912_v4  ;;  %v791_v13 = vmul.f32 %v3927_v2, %v3933_v47  ;;  %v3941_v47 = vld [vmem:[#allocation39_spill] sm:$0xff] }
  0x82   :  { %v792_v5 = vmul.f32 %v3927_v2, %v3913_v54  ;;  %v793_v48 = vmul.f32 %v3927_v2, %v3934_v25  ;;  %v794_v11 = vmul.f32 %v3927_v2, %v2725_v63  ;;  %v795_v7 = vmul.f32 %v3927_v2, %v2807_v20 }
  0x83   :  { %v796_v14 = vmul.f32 %v3927_v2, %v3914_v42  ;;  %v797_v4 = vmul.f32 %v3927_v2, %v3935_v22  ;;  %v798_v52 = vmul.f32 %v3927_v2, %v3915_v59  ;;  %v799_v17 = vmul.f32 %v3927_v2, %v3936_v56 }
  0x84   :  { %v800_v27 = vmul.f32 %v3927_v2, %v3916_v23  ;;  %v801_v42 = vmul.f32 %v3927_v2, %v3938_v30  ;;  %v802_v55 = vmul.f32 %v3927_v2, %v3917_v15  ;;  %v803_v59 = vmul.f32 %v3927_v2, %v3939_v38 }
  0x85   :  { %v845_v19 = vrot.slane %v781_v33, 1  ;;  %v847_v29 = vrot.slane %v782_v44, 1  ;;  %v848_v45 = vrot.slane %v783_v6, 1  ;;  %v804_v34 = vmul.f32 %v3927_v2, %v3918_v24 }
  0x86   :  { %v805_v41 = vmul.f32 %v3927_v2, %v3940_v1  ;;  %v806_v23 = vmul.f32 %v3927_v2, %v3919_v60  ;;  %v807_v22 = vmul.f32 %v3927_v2, %v3941_v47  ;;  %v2872_v15 = vmul.f32 %v3927_v2, %v3920_v40 }
  0x87   :  { %v2876_v33 = vmul.f32 %v3927_v2, %v3942_v26  ;;  %v2880_v24 = vmul.f32 %v3927_v2, %v2738_v37  ;;  %v2884_v44 = vmul.f32 %v3927_v2, %v2852_v62  ;;  %v850_v60 = vrot.slane %v784_v10, 1 }
  0x88   :  { %v851_v6 = vrot.slane %v785_v21, 1  ;;  %v853_v56 = vrot.slane %v786_v61, 1  ;;  %v854_v30 = vrot.slane %v787_v18, 1  ;;  %v846_v38 = vsel %vm178_vm0, %v844_v8, %v845_v19 }
  0x89   :  { %v849_v1 = vsel %vm178_vm0, %v847_v29, %v848_v45  ;;  %v856_v47 = vrot.slane %v788_v3, 1  ;;  %v857_v0 = vrot.slane %v789_v46, 1  ;;  %v859_v28 = vrot.slane %v790_v12, 1  ;;  %v1864_v12 = vld [vmem:[%s3658_s1 + $0x8] sm:$0x7]  ;;  %v1869_v45 = vld [vmem:[%s3659_s0 + $0x40] sm:$0xff] }
  0x8a   :  { %v860_v36 = vrot.slane %v791_v13, 1  ;;  %v862_v16 = vrot.slane %v792_v5, 1  ;;  %v863_v26 = vrot.slane %v793_v48, 1  ;;  %v865_v37 = vrot.slane %v794_v11, 1  ;;  %v3943_v13 = vld [vmem:[#allocation2_spill] sm:$0xff] }
  0x8b   :  { %v866_v40 = vrot.slane %v795_v7, 1  ;;  %v868_v20 = vrot.slane %v796_v14, 1  ;;  %v869_v63 = vrot.slane %v797_v4, 1  ;;  %v871_v2 = vrot.slane %v798_v52, 1 }
  0x8c   :  { %v872_v62 = vrot.slane %v799_v17, 1  ;;  %v874_v10 = vrot.slane %v800_v27, 1  ;;  %v875_v21 = vrot.slane %v801_v42, 1  ;;  %v877_v61 = vrot.slane %v802_v55, 1 }
  0x8d   :  { %v878_v18 = vrot.slane %v803_v59, 1  ;;  %v880_v51 = vrot.slane %v804_v34, 1  ;;  %v881_v8 = vrot.slane %v805_v41, 1  ;;  %v852_v19 = vsel %vm178_vm0, %v850_v60, %v851_v6  ;;  %v1870_v41 = vld [vmem:[%s3659_s0 + $0x48] sm:$0x3] }
  0x8e   :  { %v883_v3 = vrot.slane %v806_v23, 1  ;;  %v884_v46 = vrot.slane %v807_v22, 1  ;;  %v2893_v5 = vrot.slane %v1864_v12, %v3943_v13  ;;  %v855_v48 = vsel %vm178_vm0, %v853_v56, %v854_v30  ;;  %v1875_v13 = vld [vmem:[%s3659_s0 + $0x70] sm:$0xff] }
  0x8f   :  { %v858_v11 = vsel %vm178_vm0, %v856_v47, %v857_v0  ;;  %v861_v7 = vsel %vm178_vm0, %v859_v28, %v860_v36  ;;  %v864_v14 = vsel %vm178_vm0, %v862_v16, %v863_v26  ;;  %v867_v4 = vsel %vm178_vm0, %v865_v37, %v866_v40  ;;  %v1867_v28 = vld [vmem:[%s3659_s0 + $0x30] sm:$0xff] }
  0x90   :  { %v870_v52 = vsel %vm178_vm0, %v868_v20, %v869_v63  ;;  %v873_v17 = vsel %vm178_vm0, %v871_v2, %v872_v62  ;;  %v876_v27 = vsel %vm178_vm0, %v874_v10, %v875_v21  ;;  %v879_v42 = vsel %vm178_vm0, %v877_v61, %v878_v18  ;;  %v1865_v63 = vld [vmem:[%s3659_s0 + $0x20] sm:$0xff]  ;;  %v1868_v62 = vld [vmem:[%s3659_s0 + $0x38] sm:$0x3]  ;;  %v1871_v47 = vld [vmem:[%s3659_s0 + $0x50] sm:$0xff] }
  0x91   :  { %v2905_v55 = vsel %vm178_vm0, %v880_v51, %v881_v8  ;;  %v886_v59 = vrot.slane %v2872_v15, 1  ;;  %v887_v0 = vrot.slane %v2876_v33, 1  ;;  %v2910_v36 = vsel %vm178_vm0, %v883_v3, %v884_v46  ;;  %v1866_v51 = vld [vmem:[%s3659_s0 + $0x28] sm:$0x3]  ;;  %v1872_v10 = vld [vmem:[%s3659_s0 + $0x58] sm:$0x3] }
  0x92   :  { %v889_v37 = vrot.slane %v2880_v24, 1  ;;  %v928_v40 = vmul.f32 %v1865_v63, %v2893_v5  ;;  %v929_v16 = vmul.f32 %v1866_v51, %v2893_v5  ;;  %v930_v20 = vmul.f32 %v1867_v28, %v2893_v5  ;;  %v3944_v28 = vld [vmem:[#allocation3_spill] sm:$0xff]  ;;  %v3952_v33 = vld [vmem:[#allocation9_spill] sm:$0xff] }
  0x93   :  { %v931_v29 = vmul.f32 %v1868_v62, %v2893_v5  ;;  %v932_v34 = vmul.f32 %v1869_v45, %v2893_v5  ;;  %v933_v23 = vmul.f32 %v1870_v41, %v2893_v5  ;;  %v890_v22 = vrot.slane %v2884_v44, 1 }
  0x94   :  { %v908_v26 = vadd.f32 %v846_v38, %v2772_v31  ;;  %v909_v60 = vadd.f32 %v849_v1, %v2774_v53  ;;  %v910_v6 = vadd.f32 %v852_v19, %v2776_v43  ;;  %v911_v56 = vadd.f32 %v855_v48, %v2778_v57  ;;  %v1873_v53 = vld [vmem:[%s3659_s0 + $0x60] sm:$0xff]  ;;  %v1874_v57 = vld [vmem:[%s3659_s0 + $0x68] sm:$0x3] }
  0x95   :  { %v2943_v30 = vadd.f32 %v858_v11, %v2780_v9  ;;  %v934_v2 = vmul.f32 %v1871_v47, %v2893_v5  ;;  %v935_v31 = vmul.f32 %v1872_v10, %v2893_v5  ;;  %v936_v43 = vmul.f32 %v1873_v53, %v2893_v5  ;;  %v1876_v11 = vld [vmem:[%s3659_s0 + $0x78] sm:$0x3]  ;;  %v1879_v53 = vld [vmem:[%s3659_s0 + $0xd0] sm:$0xff] }
  0x96   :  { %v937_v9 = vmul.f32 %v1874_v57, %v2893_v5  ;;  %v992_v38 = vrot.slane %v928_v40, 2  ;;  %v993_v1 = vrot.slane %v929_v16, 2  ;;  %v995_v21 = vrot.slane %v930_v20, 2  ;;  %v3946_v20 = vld [vmem:[#allocation7_spill] sm:$0xff] }
  0x97   :  { %v996_v61 = vrot.slane %v931_v29, 2  ;;  %v998_v18 = vrot.slane %v932_v34, 2  ;;  %v999_v8 = vrot.slane %v933_v23, 2  ;;  %v913_v19 = vadd.f32 %v861_v7, %v2782_v39  ;;  %v1877_v34 = vld [vmem:[%s3659_s0 + $0xc0] sm:$0xff]  ;;  %v1878_v23 = vld [vmem:[%s3659_s0 + $0xc8] sm:$0x3] }
  0x98   :  { %v2963_v3 = vadd.f32 %v864_v14, %v2784_v32  ;;  %v2966_v46 = vadd.f32 %v867_v4, %v2786_v35  ;;  %v2969_v12 = vadd.f32 %v870_v52, %v2788_v58  ;;  %v938_v48 = vmul.f32 %v1875_v13, %v2893_v5 }
  0x99   :  { %v939_v39 = vmul.f32 %v1876_v11, %v2893_v5  ;;  %v1001_v32 = vrot.slane %v934_v2, 2  ;;  %v1002_v7 = vrot.slane %v935_v31, 2  ;;  %v2980_v35 = vadd.f32 %v873_v17, %v2790_v50  ;;  %v3945_v17 = vld [vmem:[#allocation13_spill] sm:$0xff] }
  0x9a   :  { %v940_v58 = vmul.f32 %v2893_v5, %v3913_v54  ;;  %v941_v14 = vmul.f32 %v2893_v5, %v3934_v25  ;;  %v994_v4 = vsel %vm327_vm1, %v992_v38, %v993_v1  ;;  %v997_v52 = vsel %vm327_vm1, %v995_v21, %v996_v61  ;;  %v1882_v38 = vld [vmem:[%s3659_s0 + $0xe8] sm:$0x3] }
  0x9b   :  { %v1000_v63 = vsel %vm327_vm1, %v998_v18, %v999_v8  ;;  %v1004_v40 = vrot.slane %v936_v43, 2  ;;  %v1005_v51 = vrot.slane %v937_v9, 2  ;;  %v2990_v16 = vadd.f32 %v876_v27, %v2792_v49  ;;  %v1881_v43 = vld [vmem:[%s3659_s0 + $0xe0] sm:$0xff] }
  0x9c   :  { %v2993_v50 = vadd.f32 %v879_v42, %v3944_v28  ;;  %v942_v54 = vmul.f32 %v2893_v5, %v3945_v17  ;;  %v943_v25 = vmul.f32 %v2893_v5, %v3946_v20  ;;  %v1003_v62 = vsel %vm327_vm1, %v1001_v32, %v1002_v7 }
  0x9d   :  { %v1007_v29 = vrot.slane %v938_v48, 2  ;;  %v1008_v45 = vrot.slane %v939_v39, 2  ;;  %v944_v49 = vmul.f32 %v1877_v34, %v2893_v5  ;;  %v3004_v27 = vadd.f32 %v994_v4, %v908_v26 }
  0x9e   :  { %v3006_v42 = vadd.f32 %v997_v52, %v909_v60  ;;  %v3008_v41 = vadd.f32 %v1000_v63, %v910_v6  ;;  %v945_v47 = vmul.f32 %v1878_v23, %v2893_v5  ;;  %v1006_v2 = vsel %vm327_vm1, %v1004_v40, %v1005_v51  ;;  %v1880_v60 = vld [vmem:[%s3659_s0 + $0xd8] sm:$0x3] }
  0x9f   :  { %v1010_v10 = vrot.slane %v940_v58, 2  ;;  %v1011_v31 = vrot.slane %v941_v14, 2  ;;  %v946_v26 = vmul.f32 %v1879_v53, %v2893_v5  ;;  %v947_v6 = vmul.f32 %v1880_v60, %v2893_v5  ;;  %v1883_v58 = vld [vmem:[%s3659_s0 + $0xf0] sm:$0xff]  ;;  %v1884_v14 = vld [vmem:[%s3659_s0 + $0xf8] sm:$0x3] }
  0xa0   :  { %v948_v57 = vmul.f32 %v1881_v43, %v2893_v5  ;;  %v3027_v9 = vadd.f32 %v1003_v62, %v911_v56  ;;  %v949_v1 = vmul.f32 %v1882_v38, %v2893_v5  ;;  %v1009_v21 = vsel %vm327_vm1, %v1007_v29, %v1008_v45 }
  0xa1   :  { %v1013_v61 = vrot.slane %v942_v54, 2  ;;  %v1014_v18 = vrot.slane %v943_v25, 2  ;;  %v3035_v8 = vadd.f32 %v1006_v2, %v2943_v30  ;;  %v1073_v13 = vsel %vm1072_vm2, %v3004_v27, 0.0  ;;  %v1885_v54 = vld [vmem:[%s3659_s0 + $0x100] sm:$0xff]  ;;  %v1886_v25 = vld [vmem:[%s3659_s0 + $0x108] sm:$0x3] }
  0xa2   :  { %v1074_v56 = vsel %vm1072_vm2, %v3006_v42, 0.0  ;;  %v1076_v48 = vsel %vm1072_vm2, %v3008_v41, 0.0  ;;  %v1012_v11 = vsel %vm327_vm1, %v1010_v10, %v1011_v31  ;;  %v1016_v39 = vrot.slane %v944_v49, 2  ;;  %v1888_v10 = vld [vmem:[%s3659_s0 + $0x118] sm:$0x3] }
  0xa3   :  { %v1017_v32 = vrot.slane %v945_v47, 2  ;;  %v1075_v7 = vadd.f32 %v1074_v56, %v1073_v13  ;;  %v950_v30 = vmul.f32 %v1883_v58, %v2893_v5  ;;  %v951_v4 = vmul.f32 %v1884_v14, %v2893_v5  ;;  %v1887_v47 = vld [vmem:[%s3659_s0 + $0x110] sm:$0xff] }
  0xa4   :  { %v3052_v52 = vadd.f32 %v1009_v21, %v913_v19  ;;  %v1078_v63 = vsel %vm1072_vm2, %v3027_v9, 0.0  ;;  %v1015_v40 = vsel %vm327_vm1, %v1013_v61, %v1014_v18  ;;  %v1019_v51 = vrot.slane %v946_v26, 2 }
  0xa5   :  { %v1020_v28 = vrot.slane %v947_v6, 2  ;;  %v1077_v17 = vadd.f32 %v1076_v48, %v1075_v7  ;;  %v952_v20 = vmul.f32 %v1885_v54, %v2893_v5  ;;  %v953_v19 = vmul.f32 %v1886_v25, %v2893_v5 }
  0xa6   :  { %v3066_v62 = vadd.f32 %v1012_v11, %v2963_v3  ;;  %v1080_v29 = vsel %vm1072_vm2, %v3035_v8, 0.0  ;;  %v1018_v45 = vsel %vm327_vm1, %v1016_v39, %v1017_v32  ;;  %v1022_v34 = vrot.slane %v948_v57, 2  ;;  %v3947_v57 = vld [vmem:[#allocation8_spill] sm:$0xff] }
  0xa7   :  { %v1023_v49 = vrot.slane %v949_v1, 2  ;;  %v1079_v23 = vadd.f32 %v1078_v63, %v1077_v17  ;;  %v954_v2 = vmul.f32 %v1887_v47, %v2893_v5  ;;  %v955_v3 = vmul.f32 %v1888_v10, %v2893_v5  ;;  %v3948_v1 = vld [vmem:[#allocation40_spill] sm:$0xff] }
  0xa8   :  { %v3080_v31 = vadd.f32 %v1015_v40, %v2966_v46  ;;  %v1082_v53 = vsel %vm1072_vm2, %v3052_v52, 0.0  ;;  %v1021_v26 = vsel %vm327_vm1, %v1019_v51, %v1020_v28  ;;  %v1025_v60 = vrot.slane %v950_v30, 2  ;;  %v3949_v11 = vld [vmem:[#allocation20_spill] sm:$0xff]  ;;  %v3951_v51 = vld [vmem:[#allocation14_spill] sm:$0xff] }
  0xa9   :  { %v1026_v6 = vrot.slane %v951_v4, 2  ;;  %v1081_v43 = vadd.f32 %v1080_v29, %v1079_v23  ;;  %v956_v38 = vmul.f32 %v2893_v5, %v3947_v57  ;;  %v957_v21 = vmul.f32 %v2893_v5, %v3948_v1  ;;  %v3950_v32 = vld [vmem:[#allocation4_spill] sm:$0xff] }
  0xaa   :  { %v3090_v61 = vadd.f32 %v1018_v45, %v2969_v12  ;;  %v1084_v46 = vsel %vm1072_vm2, %v3066_v62, 0.0  ;;  %v1024_v18 = vsel %vm327_vm1, %v1022_v34, %v1023_v49  ;;  %v1028_v13 = vrot.slane %v952_v20, 2  ;;  %v3953_v34 = vld [vmem:[#allocation21_spill] sm:$0xff] }
  0xab   :  { %v1029_v56 = vrot.slane %v953_v19, 2  ;;  %v1083_v48 = vadd.f32 %v1082_v53, %v1081_v43  ;;  %v958_v39 = vmul.f32 %v2893_v5, %v3949_v11  ;;  %v959_v7 = vmul.f32 %v2893_v5, %v3950_v32 }
  0xac   :  { %v3100_v58 = vadd.f32 %v1021_v26, %v2980_v35  ;;  %v1086_v12 = vsel %vm1072_vm2, %v3080_v31, 0.0  ;;  %v1027_v30 = vsel %vm327_vm1, %v1025_v60, %v1026_v6  ;;  %v1031_v14 = vrot.slane %v954_v2, 2 }
  0xad   :  { %v1032_v4 = vrot.slane %v955_v3, 2  ;;  %v1085_v63 = vadd.f32 %v1084_v46, %v1083_v48  ;;  %v888_v40 = vsel %vm178_vm0, %v886_v59, %v887_v0  ;;  %v920_v5 = vadd.f32 %v2905_v55, %v3951_v51 }
  0xae   :  { %v3113_v35 = vadd.f32 %v1024_v18, %v2990_v16  ;;  %v1088_v28 = vsel %vm1072_vm2, %v3090_v61, 0.0  ;;  %v1030_v17 = vsel %vm327_vm1, %v1028_v13, %v1029_v56  ;;  %v1034_v54 = vrot.slane %v956_v38, 2 }
  0xaf   :  { %v1035_v20 = vrot.slane %v957_v21, 2  ;;  %v1087_v25 = vadd.f32 %v1086_v12, %v1085_v63  ;;  %v891_v15 = vsel %vm178_vm0, %v889_v37, %v890_v22  ;;  %v921_v55 = vadd.f32 %v2910_v36, %v3952_v33  ;;  %v3954_v22 = vld [vmem:[#allocation33_spill] sm:$0xff] }
  0xb0   :  { %v3126_v59 = vadd.f32 %v1027_v30, %v2993_v50  ;;  %v1090_v0 = vsel %vm1072_vm2, %v3100_v58, 0.0  ;;  %v1033_v16 = vsel %vm327_vm1, %v1031_v14, %v1032_v4  ;;  %v1037_v19 = vrot.slane %v958_v39, 2 }
  0xb1   :  { %v1038_v29 = vrot.slane %v959_v7, 2  ;;  %v1089_v45 = vadd.f32 %v1088_v28, %v1087_v25  ;;  %v922_v44 = vadd.f32 %v888_v40, %v3953_v34  ;;  %v3132_v49 = vadd.f32 %v1030_v17, %v920_v5 }
  0xb2   :  { %v1092_v24 = vsel %vm1072_vm2, %v3113_v35, 0.0  ;;  %v1036_v36 = vsel %vm327_vm1, %v1034_v54, %v1035_v20  ;;  %v923_v50 = vadd.f32 %v891_v15, %v3954_v22  ;;  %v1069_v23 = vadd.f32 %v1033_v16, %v921_v55 }
  0xb3   :  { %v1091_v37 = vadd.f32 %v1090_v0, %v1089_v45  ;;  %v1094_v47 = vsel %vm1072_vm2, %v3126_v59, 0.0  ;;  %v1039_v2 = vsel %vm327_vm1, %v1037_v19, %v1038_v29  ;;  %v1070_v3 = vadd.f32 %v1036_v36, %v922_v44 }
  0xb4   :  { %v1096_v53 = vsel %vm1072_vm2, %v3132_v49, 0.0  ;;  %v3143_v60 = vadd.f32 %v1039_v2, %v923_v50  ;;  %v1098_v6 = vsel %vm1072_vm2, %v1069_v23, 0.0 }
  0xb5   :  { %v1093_v10 = vadd.f32 %v1092_v24, %v1091_v37  ;;  %v1100_v57 = vsel %vm1072_vm2, %v1070_v3, 0.0 }
  0xb6   :  { %v1102_v1 = vsel %vm1072_vm2, %v3143_v60, 0.0 }
  0xb7   :  { %v1095_v26 = vadd.f32 %v1094_v47, %v1093_v10 }
  0xb9   :  { %v1097_v43 = vadd.f32 %v1096_v53, %v1095_v26 }
  0xbb   :  { %v1099_v38 = vadd.f32 %v1098_v6, %v1097_v43 }
  0xbd   :  { %v1101_v21 = vadd.f32 %v1100_v57, %v1099_v38 }
  0xbf   :  { %v1103_v46 = vadd.f32 %v1102_v1, %v1101_v21 }
  0xc1   :  { %v1104_v18 = vrot.slane %v1103_v46, 4 }
  0xc3   :  { %v1105_v13 = vadd.f32 %v1104_v18, %v1103_v46 }
  0xc5   :  { %v1106_v56 = vrot.slane %v1105_v13, 2 }
  0xc7   :  { %v1107_v48 = vadd.f32 %v1106_v56, %v1105_v13 }
  0xc9   :  { %v1108_v11 = vrot.slane %v1107_v48, 1 }
  0xcb   :  { %v1109_v39 = vadd.f32 %v1108_v11, %v1107_v48 }
  0xcd   :  { %v1111_v32 = vmul.f32 0.0078125, %v1109_v39 }
  0xcf   :  { %v3150_v7 = vsub.f32 %v3004_v27, %v1111_v32  ;;  %v3153_v12 = vsub.f32 %v3006_v42, %v1111_v32  ;;  %v3156_v30 = vsub.f32 %v3008_v41, %v1111_v32  ;;  %v3159_v14 = vsub.f32 %v3027_v9, %v1111_v32 }
  0xd0   :  { %v3162_v4 = vsub.f32 %v3035_v8, %v1111_v32  ;;  %v3171_v42 = vsub.f32 %v3052_v52, %v1111_v32  ;;  %v3176_v9 = vsub.f32 %v3066_v62, %v1111_v32  ;;  %v3184_v54 = vsub.f32 %v3080_v31, %v1111_v32 }
  0xd1   :  { %v1128_v63 = vmul.f32 %v3150_v7, %v3150_v7  ;;  %v1129_v40 = vmul.f32 %v3153_v12, %v3153_v12  ;;  %v1130_v27 = vmul.f32 %v3156_v30, %v3156_v30  ;;  %v1131_v41 = vmul.f32 %v3159_v14, %v3159_v14 }
  0xd2   :  { %v1132_v8 = vmul.f32 %v3162_v4, %v3162_v4  ;;  %v1133_v52 = vmul.f32 %v3171_v42, %v3171_v42  ;;  %v1120_v25 = vsub.f32 %v3090_v61, %v1111_v32  ;;  %v1134_v15 = vmul.f32 %v3176_v9, %v3176_v9 }
  0xd3   :  { %v1144_v51 = vsel %vm1072_vm2, %v1128_v63, 0.0  ;;  %v1145_v5 = vsel %vm1072_vm2, %v1129_v40, 0.0  ;;  %v1147_v28 = vsel %vm1072_vm2, %v1130_v27, 0.0  ;;  %v1149_v20 = vsel %vm1072_vm2, %v1131_v41, 0.0 }
  0xd4   :  { %v1146_v17 = vadd.f32 %v1145_v5, %v1144_v51  ;;  %v1151_v33 = vsel %vm1072_vm2, %v1132_v8, 0.0  ;;  %v1121_v0 = vsub.f32 %v3100_v58, %v1111_v32  ;;  %v1135_v31 = vmul.f32 %v3184_v54, %v3184_v54 }
  0xd5   :  { %v1153_v16 = vsel %vm1072_vm2, %v1133_v52, 0.0  ;;  %v1122_v29 = vsub.f32 %v3113_v35, %v1111_v32  ;;  %v1136_v45 = vmul.f32 %v1120_v25, %v1120_v25  ;;  %v1155_v34 = vsel %vm1072_vm2, %v1134_v15, 0.0 }
  0xd6   :  { %v1148_v62 = vadd.f32 %v1147_v28, %v1146_v17  ;;  %v1123_v44 = vsub.f32 %v3126_v59, %v1111_v32  ;;  %v1137_v24 = vmul.f32 %v1121_v0, %v1121_v0  ;;  %v1157_v36 = vsel %vm1072_vm2, %v1135_v31, 0.0  ;;  %v3230_v17 = vld [vmem:[%s3660_s2] ss:$0 sm:$0xff] }
  0xd7   :  { %v3202_v58 = vsub.f32 %v3132_v49, %v1111_v32  ;;  %v1138_v22 = vmul.f32 %v1122_v29, %v1122_v29  ;;  %v1159_v50 = vsel %vm1072_vm2, %v1136_v45, 0.0  ;;  %v3205_v2 = vsub.f32 %v1069_v23, %v1111_v32 }
  0xd8   :  { %v1150_v55 = vadd.f32 %v1149_v20, %v1148_v62  ;;  %v1139_v35 = vmul.f32 %v1123_v44, %v1123_v44  ;;  %v1161_v10 = vsel %vm1072_vm2, %v1137_v24, 0.0  ;;  %v3208_v26 = vsub.f32 %v1070_v3, %v1111_v32 }
  0xd9   :  { %v1140_v59 = vmul.f32 %v3202_v58, %v3202_v58  ;;  %v1163_v6 = vsel %vm1072_vm2, %v1138_v22, 0.0  ;;  %v3214_v49 = vsub.f32 %v3143_v60, %v1111_v32  ;;  %v1141_v57 = vmul.f32 %v3205_v2, %v3205_v2 }
  0xda   :  { %v1152_v19 = vadd.f32 %v1151_v33, %v1150_v55  ;;  %v1165_v23 = vsel %vm1072_vm2, %v1139_v35, 0.0  ;;  %v1142_v1 = vmul.f32 %v3208_v26, %v3208_v26  ;;  %v3237_v33 = vld [vmem:[%s3661_s3] ss:$0 sm:$0xff] }
  0xdb   :  { %v1167_v3 = vsel %vm1072_vm2, %v1140_v59, 0.0  ;;  %v1143_v46 = vmul.f32 %v3214_v49, %v3214_v49  ;;  %v1169_v18 = vsel %vm1072_vm2, %v1141_v57, 0.0 }
  0xdc   :  { %v1154_v61 = vadd.f32 %v1153_v16, %v1152_v19  ;;  %v1171_v60 = vsel %vm1072_vm2, %v1142_v1, 0.0 }
  0xdd   :  { %v1173_v48 = vsel %vm1072_vm2, %v1143_v46, 0.0 }
  0xde   :  { %v1156_v37 = vadd.f32 %v1155_v34, %v1154_v61 }
  0xe0   :  { %v1158_v47 = vadd.f32 %v1157_v36, %v1156_v37 }
  0xe2   :  { %v1160_v53 = vadd.f32 %v1159_v50, %v1158_v47 }
  0xe4   :  { %v1162_v43 = vadd.f32 %v1161_v10, %v1160_v53 }
  0xe6   :  { %v1164_v38 = vadd.f32 %v1163_v6, %v1162_v43 }
  0xe8   :  { %v1166_v21 = vadd.f32 %v1165_v23, %v1164_v38 }
  0xea   :  { %v1168_v13 = vadd.f32 %v1167_v3, %v1166_v21 }
  0xec   :  { %v1170_v56 = vadd.f32 %v1169_v18, %v1168_v13 }
  0xee   :  { %v1172_v11 = vadd.f32 %v1171_v60, %v1170_v56 }
  0xf0   :  { %v1174_v39 = vadd.f32 %v1173_v48, %v1172_v11 }
  0xf2   :  { %v1175_v32 = vrot.slane %v1174_v39, 4 }
  0xf4   :  { %v1176_v63 = vadd.f32 %v1175_v32, %v1174_v39 }
  0xf6   :  { %v1177_v40 = vrot.slane %v1176_v63, 2 }
  0xf8   :  { %v1178_v27 = vadd.f32 %v1177_v40, %v1176_v63 }
  0xfa   :  { %v1179_v41 = vrot.slane %v1178_v27, 1 }
  0xfc   :  { %v1180_v8 = vadd.f32 %v1179_v41, %v1178_v27 }
  0xfe   :  { %v1181_v51 = vmul.f32 0.0078125, %v1180_v8 }
 0x100   :  { %v1182_v5 = vadd.f32 1e-05, %v1181_v51 }
 0x102   :  { %1830 = vrsqrt.f32 %v1182_v5 }
 0x10c   :  { %v1831_v28 = vpop.eup %1830 }
 0x10d   :  { %v1184_v52 = vmul.f32 %v1831_v28, %v3150_v7  ;;  %v1185_v20 = vmul.f32 %v1831_v28, %v3153_v12  ;;  %v1192_v62 = vmul.f32 %v1831_v28, %v1120_v25  ;;  %v1193_v15 = vmul.f32 %v1831_v28, %v1121_v0 }
 0x10e   :  { %v1186_v55 = vmul.f32 %v1831_v28, %v3156_v30  ;;  %v1194_v31 = vmul.f32 %v1831_v28, %v1122_v29  ;;  %v1187_v16 = vmul.f32 %v1831_v28, %v3159_v14  ;;  %v1195_v19 = vmul.f32 %v1831_v28, %v1123_v44 }
 0x10f   :  { %v1207_v45 = vmul.f32 %v3230_v17, %v1184_v52  ;;  %v1208_v34 = vmul.f32 %v3230_v17, %v1185_v20  ;;  %v1215_v7 = vmul.f32 %v3230_v17, %v1192_v62  ;;  %v1216_v12 = vmul.f32 %v3230_v17, %v1193_v15 }
 0x110   :  { %v1209_v25 = vmul.f32 %v3230_v17, %v1186_v55  ;;  %v1217_v0 = vmul.f32 %v3230_v17, %v1194_v31  ;;  %v1210_v61 = vmul.f32 %v3230_v17, %v1187_v16  ;;  %v1218_v30 = vmul.f32 %v3230_v17, %v1195_v19 }
 0x111   :  { %v3250_v29 = vadd.f32 %v3237_v33, %v1207_v45  ;;  %v3253_v14 = vadd.f32 %v3237_v33, %v1208_v34  ;;  %v3256_v44 = vadd.f32 %v3237_v33, %v1215_v7  ;;  %v3259_v24 = vadd.f32 %v3237_v33, %v1216_v12 }
 0x112   :  { %v3262_v36 = vadd.f32 %v3237_v33, %v1209_v25  ;;  %v3265_v37 = vadd.f32 %v3237_v33, %v1217_v0  ;;  %v3268_v22 = vadd.f32 %v3237_v33, %v1210_v61  ;;  %v3271_v50 = vadd.f32 %v3237_v33, %v1218_v30 }
 0x113   :  { %v1262_v47 = vsel %vm1072_vm2, %v3250_v29, 0.0  ;;  %1246 = vst.msk [vmem:[%s3662_s8] sm:$0xff] %vm1072_vm2, %v3250_v29  ;;  %v1265_v35 = vsel %vm1072_vm2, %v3253_v14, 0.0  ;;  %1247 = vst.msk [vmem:[%s3662_s8 + $0x8] sm:$0xff] %vm1072_vm2, %v3253_v14  ;;  %v1286_v10 = vsel %vm1072_vm2, %v3256_v44, 0.0  ;;  %v1289_v53 = vsel %vm1072_vm2, %v3259_v24, 0.0 }
 0x114   :  { %1254 = vst.msk [vmem:[%s3662_s8 + $0x40] sm:$0xff] %vm1072_vm2, %v3256_v44  ;;  %1255 = vst.msk [vmem:[%s3662_s8 + $0x48] sm:$0xff] %vm1072_vm2, %v3259_v24  ;;  %1263 = vadd.xlane.f32.xlu0 %v1262_v47  ;;  %1266 = vadd.xlane.f32.xlu1 %v1265_v35  ;;  %v1268_v59 = vsel %vm1072_vm2, %v3262_v36, 0.0  ;;  %v1188_v6 = vmul.f32 %v1831_v28, %v3162_v4  ;;  %v1196_v43 = vmul.f32 %v1831_v28, %v3202_v58 }
 0x115   :  { %1248 = vst.msk [vmem:[%s3662_s8 + $0x10] sm:$0xff] %vm1072_vm2, %v3262_v36  ;;  %1256 = vst.msk [vmem:[%s3662_s8 + $0x50] sm:$0xff] %vm1072_vm2, %v3265_v37  ;;  %v1189_v57 = vmul.f32 %v1831_v28, %v3171_v42  ;;  %v1197_v23 = vmul.f32 %v1831_v28, %v3205_v2  ;;  %v1190_v38 = vmul.f32 %v1831_v28, %v3176_v9  ;;  %v1292_v42 = vsel %vm1072_vm2, %v3265_v37, 0.0 }
 0x116   :  { %1249 = vst.msk [vmem:[%s3662_s8 + $0x18] sm:$0xff] %vm1072_vm2, %v3268_v22  ;;  %1257 = vst.msk [vmem:[%s3662_s8 + $0x58] sm:$0xff] %vm1072_vm2, %v3271_v50  ;;  %v1198_v1 = vmul.f32 %v1831_v28, %v3208_v26  ;;  %v1191_v3 = vmul.f32 %v1831_v28, %v3184_v54  ;;  %v1199_v21 = vmul.f32 %v1831_v28, %v3214_v49  ;;  %v1271_v63 = vsel %vm1072_vm2, %v3268_v22, 0.0 }
 0x117   :  { %v1211_v46 = vmul.f32 %v3230_v17, %v1188_v6  ;;  %v1219_v18 = vmul.f32 %v3230_v17, %v1196_v43  ;;  %v1212_v4 = vmul.f32 %v3230_v17, %v1189_v57  ;;  %v1220_v58 = vmul.f32 %v3230_v17, %v1197_v23 }
 0x118   :  { %1287 = vadd.xlane.f32.xlu0 %v1286_v10  ;;  %1290 = vadd.xlane.f32.xlu1 %v1289_v53  ;;  %v1213_v9 = vmul.f32 %v3230_v17, %v1190_v38  ;;  %v1221_v2 = vmul.f32 %v3230_v17, %v1198_v1  ;;  %v1214_v54 = vmul.f32 %v3230_v17, %v1191_v3  ;;  %v1295_v40 = vsel %vm1072_vm2, %v3271_v50, 0.0 }
 0x119   :  { %v3341_v26 = vadd.f32 %v3237_v33, %v1211_v46  ;;  %v3344_v49 = vadd.f32 %v3237_v33, %v1219_v18  ;;  %v3347_v13 = vadd.f32 %v3237_v33, %v1212_v4  ;;  %v3350_v60 = vadd.f32 %v3237_v33, %v1220_v58 }
 0x11a   :  { %v3353_v56 = vadd.f32 %v3237_v33, %v1213_v9  ;;  %v3356_v48 = vadd.f32 %v3237_v33, %v1221_v2  ;;  %v3359_v11 = vadd.f32 %v3237_v33, %v1214_v54  ;;  %v1222_v39 = vmul.f32 %v3230_v17, %v1199_v21 }
 0x11b   :  { %1250 = vst.msk [vmem:[%s3662_s8 + $0x20] sm:$0xff] %vm1072_vm2, %v3341_v26  ;;  %1258 = vst.msk [vmem:[%s3662_s8 + $0x60] sm:$0xff] %vm1072_vm2, %v3344_v49  ;;  %v1274_v27 = vsel %vm1072_vm2, %v3341_v26, 0.0  ;;  %v1298_v41 = vsel %vm1072_vm2, %v3344_v49, 0.0  ;;  %v1277_v8 = vsel %vm1072_vm2, %v3347_v13, 0.0  ;;  %v1301_v51 = vsel %vm1072_vm2, %v3350_v60, 0.0 }
 0x11c   :  { %1251 = vst.msk [vmem:[%s3662_s8 + $0x28] sm:$0xff] %vm1072_vm2, %v3347_v13  ;;  %1259 = vst.msk [vmem:[%s3662_s8 + $0x68] sm:$0xff] %vm1072_vm2, %v3350_v60  ;;  %1269 = vadd.xlane.f32.xlu0 %v1268_v59  ;;  %1293 = vadd.xlane.f32.xlu1 %v1292_v42  ;;  %v3398_v32 = vadd.f32 %v3237_v33, %v1222_v39  ;;  %v1280_v5 = vsel %vm1072_vm2, %v3353_v56, 0.0  ;;  %v1304_v28 = vsel %vm1072_vm2, %v3356_v48, 0.0  ;;  %v1283_v17 = vsel %vm1072_vm2, %v3359_v11, 0.0 }
 0x11d   :  { %1252 = vst.msk [vmem:[%s3662_s8 + $0x30] sm:$0xff] %vm1072_vm2, %v3353_v56  ;;  %1260 = vst.msk [vmem:[%s3662_s8 + $0x70] sm:$0xff] %vm1072_vm2, %v3356_v48 }
 0x11e   :  { %1253 = vst.msk [vmem:[%s3662_s8 + $0x38] sm:$0xff] %vm1072_vm2, %v3359_v11  ;;  %1261 = vst.msk [vmem:[%s3662_s8 + $0x78] sm:$0xff] %vm1072_vm2, %v3398_v32  ;;  %v1307_v52 = vsel %vm1072_vm2, %v3398_v32, 0.0 }
 0x120   :  { %1272 = vadd.xlane.f32.xlu0 %v1271_v63  ;;  %1296 = vadd.xlane.f32.xlu1 %v1295_v40 }
 0x124   :  { %1275 = vadd.xlane.f32.xlu0 %v1274_v27  ;;  %1299 = vadd.xlane.f32.xlu1 %v1298_v41 }
 0x128   :  { %1278 = vadd.xlane.f32.xlu0 %v1277_v8  ;;  %1302 = vadd.xlane.f32.xlu1 %v1301_v51 }
 0x12c   :  { %1281 = vadd.xlane.f32.xlu0 %v1280_v5  ;;  %1305 = vadd.xlane.f32.xlu1 %v1304_v28 }
 0x130   :  { %1284 = vadd.xlane.f32.xlu0 %v1283_v17  ;;  %1308 = vadd.xlane.f32.xlu1 %v1307_v52 }
 0x1a1   :  { %v1264_v20 = vpop.xlane.xlu0 %1263  ;;  %v1267_v62 = vpop.xlane.xlu1 %1266 }
 0x1a2   :  { %v1311_v15 = vmul.f32 0.03125, %v1264_v20  ;;  %v1312_v33 = vmul.f32 0.03125, %v1267_v62 }
 0x1a4   :  { %v3426_v55 = vsub.f32 %v3250_v29, %v1311_v15  ;;  %v3429_v31 = vsub.f32 %v3253_v14, %v1312_v33 }
 0x1a5   :  { %v1288_v16 = vpop.xlane.xlu0 %1287  ;;  %v1291_v19 = vpop.xlane.xlu1 %1290 }
 0x1a6   :  { %v1319_v45 = vmul.f32 0.03125, %v1288_v16  ;;  %v1320_v34 = vmul.f32 0.03125, %v1291_v19  ;;  %v1343_v7 = vmul.f32 %v3426_v55, %v3426_v55  ;;  %v1344_v12 = vmul.f32 %v3429_v31, %v3429_v31 }
 0x1a8   :  { %v3436_v25 = vsub.f32 %v3256_v44, %v1319_v45  ;;  %v3439_v0 = vsub.f32 %v3259_v24, %v1320_v34  ;;  %v1359_v61 = vsel %vm1072_vm2, %v1343_v7, 0.0  ;;  %v1362_v14 = vsel %vm1072_vm2, %v1344_v12, 0.0 }
 0x1a9   :  { %1360 = vadd.xlane.f32.xlu0 %v1359_v61  ;;  %v1270_v30 = vpop.xlane.xlu0 %1269  ;;  %v1294_v29 = vpop.xlane.xlu1 %1293 }
 0x1aa   :  { %v1313_v47 = vmul.f32 0.03125, %v1270_v30  ;;  %v1321_v35 = vmul.f32 0.03125, %v1294_v29  ;;  %v1351_v10 = vmul.f32 %v3436_v25, %v3436_v25  ;;  %v1352_v53 = vmul.f32 %v3439_v0, %v3439_v0 }
 0x1ac   :  { %v3448_v44 = vsub.f32 %v3262_v36, %v1313_v47  ;;  %v3451_v24 = vsub.f32 %v3265_v37, %v1321_v35  ;;  %v1383_v59 = vsel %vm1072_vm2, %v1351_v10, 0.0  ;;  %v1386_v57 = vsel %vm1072_vm2, %v1352_v53, 0.0  ;;  %v1518_v53 = vld [vmem:[%s3663_s6 + $0x8] sm:$0xff] }
 0x1ad   :  { %1363 = vadd.xlane.f32.xlu0 %v1362_v14  ;;  %1384 = vadd.xlane.f32.xlu1 %v1383_v59  ;;  %v1273_v6 = vpop.xlane.xlu0 %1272  ;;  %v1297_v43 = vpop.xlane.xlu1 %1296 }
 0x1ae   :  { %v1314_v23 = vmul.f32 0.03125, %v1273_v6  ;;  %v1322_v38 = vmul.f32 0.03125, %v1297_v43  ;;  %v1345_v1 = vmul.f32 %v3448_v44, %v3448_v44  ;;  %v1353_v36 = vmul.f32 %v3451_v24, %v3451_v24  ;;  %v1519_v6 = vld [vmem:[%s3663_s6 + $0x10] sm:$0xff]  ;;  %v1520_v43 = vld [vmem:[%s3663_s6 + $0x18] sm:$0xff] }
 0x1b0   :  { %v3460_v3 = vsub.f32 %v3268_v22, %v1314_v23  ;;  %v3463_v37 = vsub.f32 %v3271_v50, %v1322_v38  ;;  %v1365_v21 = vsel %vm1072_vm2, %v1345_v1, 0.0  ;;  %v1389_v4 = vsel %vm1072_vm2, %v1353_v36, 0.0 }
 0x1b1   :  { %1387 = vadd.xlane.f32.xlu1 %v1386_v57  ;;  %1366 = vadd.xlane.f32.xlu0 %v1365_v21  ;;  %v1276_v46 = vpop.xlane.xlu0 %1275  ;;  %v1300_v18 = vpop.xlane.xlu1 %1299  ;;  %v1822_v57 = vpack.c.bf16 %v1520_v43, %v1519_v6 }
 0x1b2   :  { %v1315_v58 = vmul.f32 0.03125, %v1276_v46  ;;  %v1323_v42 = vmul.f32 0.03125, %v1300_v18  ;;  %v1346_v9 = vmul.f32 %v3460_v3, %v3460_v3  ;;  %v1354_v22 = vmul.f32 %v3463_v37, %v3463_v37 }
 0x1b4   :  { %v3472_v2 = vsub.f32 %v3341_v26, %v1315_v58  ;;  %v3475_v50 = vsub.f32 %v3344_v49, %v1323_v42  ;;  %v1368_v54 = vsel %vm1072_vm2, %v1346_v9, 0.0  ;;  %v1392_v40 = vsel %vm1072_vm2, %v1354_v22, 0.0 }
 0x1b5   :  { %1390 = vadd.xlane.f32.xlu1 %v1389_v4  ;;  %1369 = vadd.xlane.f32.xlu0 %v1368_v54  ;;  %v1279_v39 = vpop.xlane.xlu0 %1278  ;;  %v1303_v63 = vpop.xlane.xlu1 %1302 }
 0x1b6   :  { %v1316_v27 = vmul.f32 0.03125, %v1279_v39  ;;  %v1324_v41 = vmul.f32 0.03125, %v1303_v63  ;;  %v1347_v8 = vmul.f32 %v3472_v2, %v3472_v2  ;;  %v1355_v26 = vmul.f32 %v3475_v50, %v3475_v50 }
 0x1b8   :  { %v3484_v51 = vsub.f32 %v3347_v13, %v1316_v27  ;;  %v3487_v49 = vsub.f32 %v3350_v60, %v1324_v41  ;;  %v1371_v5 = vsel %vm1072_vm2, %v1347_v8, 0.0  ;;  %v1395_v52 = vsel %vm1072_vm2, %v1355_v26, 0.0 }
 0x1b9   :  { %1393 = vadd.xlane.f32.xlu1 %v1392_v40  ;;  %1372 = vadd.xlane.f32.xlu0 %v1371_v5  ;;  %v1282_v28 = vpop.xlane.xlu0 %1281  ;;  %v1306_v17 = vpop.xlane.xlu1 %1305 }
 0x1ba   :  { %v1317_v20 = vmul.f32 0.03125, %v1282_v28  ;;  %v1325_v62 = vmul.f32 0.03125, %v1306_v17  ;;  %v1348_v15 = vmul.f32 %v3484_v51, %v3484_v51  ;;  %v1356_v13 = vmul.f32 %v3487_v49, %v3487_v49  ;;  %v3536_v17 = vld [vmem:[%s3664_s4] ss:$0 sm:$0xff] }
 0x1bc   :  { %v3496_v33 = vsub.f32 %v3353_v56, %v1317_v20  ;;  %v3499_v60 = vsub.f32 %v3356_v48, %v1325_v62  ;;  %v1374_v16 = vsel %vm1072_vm2, %v1348_v15, 0.0  ;;  %v1398_v34 = vsel %vm1072_vm2, %v1356_v13, 0.0 }
 0x1bd   :  { %1396 = vadd.xlane.f32.xlu1 %v1395_v52  ;;  %1375 = vadd.xlane.f32.xlu0 %v1374_v16  ;;  %v1285_v19 = vpop.xlane.xlu0 %1284  ;;  %v1309_v45 = vpop.xlane.xlu1 %1308  ;;  %v3542_v16 = vld [vmem:[%s3665_s5] ss:$0 sm:$0xff] }
 0x1be   :  { %v1318_v7 = vmul.f32 0.03125, %v1285_v19  ;;  %v1326_v12 = vmul.f32 0.03125, %v1309_v45  ;;  %v1349_v61 = vmul.f32 %v3496_v33, %v3496_v33  ;;  %v1357_v56 = vmul.f32 %v3499_v60, %v3499_v60 }
 0x1c0   :  { %v3508_v30 = vsub.f32 %v3359_v11, %v1318_v7  ;;  %v3511_v48 = vsub.f32 %v3398_v32, %v1326_v12  ;;  %v1377_v29 = vsel %vm1072_vm2, %v1349_v61, 0.0  ;;  %v1401_v14 = vsel %vm1072_vm2, %v1357_v56, 0.0  ;;  %v1517_v32 = vld [vmem:[%s3663_s6] sm:$0xff] }
 0x1c1   :  { %1399 = vadd.xlane.f32.xlu1 %v1398_v34  ;;  %1378 = vadd.xlane.f32.xlu0 %v1377_v29  ;;  %v1818_v59 = vpack.c.bf16 %v1518_v53, %v1517_v32 }
 0x1c2   :  { %v1350_v47 = vmul.f32 %v3508_v30, %v3508_v30  ;;  %v1358_v35 = vmul.f32 %v3511_v48, %v3511_v48 }
 0x1c3   :  { %1819 = vmatprep.subr.bf16.mxu0 %v1818_v59  ;;  %1826 = vmatprep.subr.bf16.mxu1 %v1818_v59 }
 0x1c4   :  { %v1380_v10 = vsel %vm1072_vm2, %v1350_v47, 0.0  ;;  %v1404_v11 = vsel %vm1072_vm2, %v1358_v35, 0.0  ;;  %1821 = vmatpush3.bf16.msra.mxu0 %v1818_v59  ;;  %1828 = vmatpush3.bf16.msra.mxu1 %v1818_v59 }
 0x1c5   :  { %1402 = vadd.xlane.f32.xlu1 %v1401_v14  ;;  %1381 = vadd.xlane.f32.xlu0 %v1380_v10 }
 0x1c6   :  { %1823 = vmatprep.subr.bf16.mxu0 %v1822_v57  ;;  %1827 = vmatprep.subr.bf16.mxu1 %v1822_v57 }
 0x1c8   :  { %1825 = vmatpush3.bf16.msra.mxu0 %v1822_v57  ;;  %1829 = vmatpush3.bf16.msra.mxu1 %v1822_v57 }
 0x1c9   :  { %1405 = vadd.xlane.f32.xlu1 %v1404_v11 }
 0x236   :  { %v1361_v23 = vpop.xlane.xlu0 %1360 }
 0x237   :  { %v1407_v38 = vmul.f32 0.03125, %v1361_v23 }
 0x239   :  { %v1423_v1 = vadd.f32 1e-05, %v1407_v38 }
 0x23a   :  { %v1385_v36 = vpop.xlane.xlu1 %1384  ;;  %v1364_v21 = vpop.xlane.xlu0 %1363 }
 0x23b   :  { %1832 = vrsqrt.f32 %v1423_v1  ;;  %v1415_v46 = vmul.f32 0.03125, %v1385_v36  ;;  %v1408_v18 = vmul.f32 0.03125, %v1364_v21 }
 0x23d   :  { %v1431_v4 = vadd.f32 1e-05, %v1415_v46  ;;  %v1424_v58 = vadd.f32 1e-05, %v1408_v18 }
 0x23e   :  { %v1388_v42 = vpop.xlane.xlu1 %1387  ;;  %v1367_v9 = vpop.xlane.xlu0 %1366 }
 0x23f   :  { %1834 = vrsqrt.f32 %v1431_v4  ;;  %v1416_v22 = vmul.f32 0.03125, %v1388_v42  ;;  %v1409_v54 = vmul.f32 0.03125, %v1367_v9 }
 0x240   :  { %1836 = vrsqrt.f32 %v1424_v58 }
 0x241   :  { %v1432_v39 = vadd.f32 1e-05, %v1416_v22  ;;  %v1425_v63 = vadd.f32 1e-05, %v1409_v54 }
 0x242   :  { %v1391_v40 = vpop.xlane.xlu1 %1390  ;;  %v1370_v27 = vpop.xlane.xlu0 %1369 }
 0x243   :  { %1838 = vrsqrt.f32 %v1432_v39  ;;  %v1417_v41 = vmul.f32 0.03125, %v1391_v40  ;;  %v1410_v8 = vmul.f32 0.03125, %v1370_v27 }
 0x244   :  { %1840 = vrsqrt.f32 %v1425_v63 }
 0x245   :  { %v1833_v26 = vpop.eup %1832  ;;  %v1433_v5 = vadd.f32 1e-05, %v1417_v41  ;;  %v1426_v28 = vadd.f32 1e-05, %v1410_v8 }
 0x246   :  { %v1394_v52 = vpop.xlane.xlu1 %1393  ;;  %v1373_v20 = vpop.xlane.xlu0 %1372  ;;  %v1455_v62 = vmul.f32 %v1833_v26, %v3426_v55 }
 0x247   :  { %1842 = vrsqrt.f32 %v1433_v5  ;;  %v1418_v15 = vmul.f32 0.03125, %v1394_v52  ;;  %v1411_v13 = vmul.f32 0.03125, %v1373_v20 }
 0x248   :  { %1844 = vrsqrt.f32 %v1426_v28  ;;  %v1478_v19 = vmul.f32 %v3536_v17, %v1455_v62 }
 0x249   :  { %v1835_v45 = vpop.eup %1834  ;;  %v1434_v34 = vadd.f32 1e-05, %v1418_v15  ;;  %v1427_v7 = vadd.f32 1e-05, %v1411_v13 }
 0x24a   :  { %v1837_v12 = vpop.eup %1836  ;;  %v1397_v61 = vpop.xlane.xlu1 %1396  ;;  %v1501_v29 = vadd.f32 %v3542_v16, %v1478_v19  ;;  %v1463_v55 = vmul.f32 %v1835_v45, %v3436_v25 }
 0x24b   :  { %v1376_v56 = vpop.xlane.xlu0 %1375  ;;  %1846 = vrsqrt.f32 %v1434_v34  ;;  %v1419_v14 = vmul.f32 0.03125, %v1397_v61  ;;  %v1456_v35 = vmul.f32 %v1837_v12, %v3429_v31 }
 0x24c   :  { %v1412_v47 = vmul.f32 0.03125, %v1376_v56  ;;  %1848 = vrsqrt.f32 %v1427_v7  ;;  %1794 = vmatprep.mubr.msk.f32.mxu0 %vm1072_vm2, %v1501_v29  ;;  %v1486_v10 = vmul.f32 %v3536_v17, %v1463_v55 }
 0x24d   :  { %v1839_v11 = vpop.eup %1838  ;;  %v1435_v32 = vadd.f32 1e-05, %v1419_v14  ;;  %v1479_v59 = vmul.f32 %v3536_v17, %v1456_v35 }
 0x24e   :  { %v1428_v53 = vadd.f32 1e-05, %v1412_v47  ;;  %v1841_v6 = vpop.eup %1840  ;;  %v1400_v43 = vpop.xlane.xlu1 %1399  ;;  %v1509_v25 = vadd.f32 %v3542_v16, %v1486_v10  ;;  %v1464_v23 = vmul.f32 %v1839_v11, %v3439_v0 }
 0x24f   :  { %v1379_v57 = vpop.xlane.xlu0 %1378  ;;  %1850 = vrsqrt.f32 %v1435_v32  ;;  %v1420_v38 = vmul.f32 0.03125, %v1400_v43  ;;  %v1502_v1 = vadd.f32 %v3542_v16, %v1479_v59  ;;  %v1457_v36 = vmul.f32 %v1841_v6, %v3448_v44 }
 0x250   :  { %v1413_v31 = vmul.f32 0.03125, %v1379_v57  ;;  %1852 = vrsqrt.f32 %v1428_v53  ;;  %1806 = vmatprep.mubr.msk.f32.mxu1 %vm1072_vm2, %v1509_v25  ;;  %v1487_v21 = vmul.f32 %v3536_v17, %v1464_v23 }
 0x251   :  { %v1843_v46 = vpop.eup %1842  ;;  %v1436_v18 = vadd.f32 1e-05, %v1420_v38  ;;  %1795 = vmatmul.mubr.msk.f32.vlgmr.msra.gmra.mrb[0].mxu0 %vm1072_vm2, %v1502_v1  ;;  %v1480_v9 = vmul.f32 %v3536_v17, %v1457_v36  ;;  %v1749_v1 = vld [vmem:[%s3666_s7] ss:$0 sm:$0xff] }
 0x252   :  { %v1429_v4 = vadd.f32 1e-05, %v1413_v31  ;;  %v1845_v58 = vpop.eup %1844  ;;  %v1403_v42 = vpop.xlane.xlu1 %1402  ;;  %v1510_v22 = vadd.f32 %v3542_v16, %v1487_v21  ;;  %v1465_v54 = vmul.f32 %v1843_v46, %v3451_v24 }
 0x253   :  { %v1382_v0 = vpop.xlane.xlu0 %1381  ;;  %1854 = vrsqrt.f32 %v1436_v18  ;;  %v1421_v39 = vmul.f32 0.03125, %v1403_v42  ;;  %v1458_v44 = vmul.f32 %v1845_v58, %v3460_v3  ;;  %v1503_v40 = vadd.f32 %v3542_v16, %v1480_v9 }
 0x254   :  { %v1414_v63 = vmul.f32 0.03125, %v1382_v0  ;;  %1856 = vrsqrt.f32 %v1429_v4  ;;  %1807 = vmatmul.mubr.msk.f32.vlgmr.msra.gmra.mrb[0].mxu1 %vm1072_vm2, %v1510_v22  ;;  %v1488_v27 = vmul.f32 %v3536_v17, %v1465_v54 }
 0x255   :  { %v1847_v41 = vpop.eup %1846  ;;  %v1437_v8 = vadd.f32 1e-05, %v1421_v39  ;;  %v1481_v5 = vmul.f32 %v3536_v17, %v1458_v44  ;;  %1797 = vmatprep.mubr.msk.f32.mxu0 %vm1072_vm2, %v1503_v40 }
 0x256   :  { %v1430_v26 = vadd.f32 1e-05, %v1414_v63  ;;  %v1849_v28 = vpop.eup %1848  ;;  %v1406_v24 = vpop.xlane.xlu1 %1405  ;;  %v1511_v52 = vadd.f32 %v3542_v16, %v1488_v27  ;;  %v1466_v3 = vmul.f32 %v1847_v41, %v3463_v37 }
 0x257   :  { %1858 = vrsqrt.f32 %v1437_v8  ;;  %v1422_v20 = vmul.f32 0.03125, %v1406_v24  ;;  %v1504_v62 = vadd.f32 %v3542_v16, %v1481_v5  ;;  %v1459_v15 = vmul.f32 %v1849_v28, %v3472_v2 }
 0x258   :  { %1860 = vrsqrt.f32 %v1430_v26  ;;  %1809 = vmatprep.mubr.msk.f32.mxu1 %vm1072_vm2, %v1511_v52  ;;  %v1489_v13 = vmul.f32 %v3536_v17, %v1466_v3 }
 0x259   :  { %v1851_v19 = vpop.eup %1850  ;;  %v1438_v45 = vadd.f32 1e-05, %v1422_v20  ;;  %1798 = vmatmul.mubr.msk.f32.gmra.mrb[2].mxu0 %vm1072_vm2, %v1504_v62  ;;  %v1482_v34 = vmul.f32 %v3536_v17, %v1459_v15 }
 0x25a   :  { %v1853_v7 = vpop.eup %1852  ;;  %v1512_v37 = vadd.f32 %v3542_v16, %v1489_v13  ;;  %v1467_v12 = vmul.f32 %v1851_v19, %v3475_v50 }
 0x25b   :  { %1862 = vrsqrt.f32 %v1438_v45  ;;  %v1505_v61 = vadd.f32 %v3542_v16, %v1482_v34  ;;  %v1460_v2 = vmul.f32 %v1853_v7, %v3484_v51 }
 0x25c   :  { %1810 = vmatmul.mubr.msk.f32.gmra.mrb[2].mxu1 %vm1072_vm2, %v1512_v37  ;;  %v1490_v56 = vmul.f32 %v3536_v17, %v1467_v12 }
 0x25d   :  { %v1855_v29 = vpop.eup %1854  ;;  %1800 = vmatprep.mubr.msk.f32.mxu0 %vm1072_vm2, %v1505_v61  ;;  %v1483_v55 = vmul.f32 %v3536_v17, %v1460_v2 }
 0x25e   :  { %v1857_v14 = vpop.eup %1856  ;;  %v1513_v47 = vadd.f32 %v3542_v16, %v1490_v56  ;;  %v1468_v35 = vmul.f32 %v1855_v29, %v3487_v49 }
 0x25f   :  { %v1506_v50 = vadd.f32 %v3542_v16, %v1483_v55  ;;  %v1461_v10 = vmul.f32 %v1857_v14, %v3496_v33 }
 0x260   :  { %1812 = vmatprep.mubr.msk.f32.mxu1 %vm1072_vm2, %v1513_v47  ;;  %v1491_v51 = vmul.f32 %v3536_v17, %v1468_v35 }
 0x261   :  { %v1859_v11 = vpop.eup %1858  ;;  %1801 = vmatmul.mubr.msk.f32.gmra.mrb[4].mxu0 %vm1072_vm2, %v1506_v50  ;;  %v1484_v32 = vmul.f32 %v3536_v17, %v1461_v10 }
 0x262   :  { %v1861_v53 = vpop.eup %1860  ;;  %v1514_v59 = vadd.f32 %v3542_v16, %v1491_v51  ;;  %v1469_v6 = vmul.f32 %v1859_v11, %v3499_v60 }
 0x263   :  { %v1507_v49 = vadd.f32 %v3542_v16, %v1484_v32  ;;  %v1462_v43 = vmul.f32 %v1861_v53, %v3508_v30 }
 0x264   :  { %1813 = vmatmul.mubr.msk.f32.gmra.mrb[4].mxu1 %vm1072_vm2, %v1514_v59  ;;  %v1492_v33 = vmul.f32 %v3536_v17, %v1469_v6 }
 0x265   :  { %v1863_v57 = vpop.eup %1862  ;;  %1803 = vmatprep.mubr.msk.f32.mxu0 %vm1072_vm2, %v1507_v49  ;;  %v1485_v25 = vmul.f32 %v3536_v17, %v1462_v43 }
 0x266   :  { %v1515_v23 = vadd.f32 %v3542_v16, %v1492_v33  ;;  %v1470_v38 = vmul.f32 %v1863_v57, %v3511_v48 }
 0x267   :  { %v1508_v31 = vadd.f32 %v3542_v16, %v1485_v25 }
 0x268   :  { %1815 = vmatprep.mubr.msk.f32.mxu1 %vm1072_vm2, %v1515_v23  ;;  %v1493_v60 = vmul.f32 %v3536_v17, %v1470_v38 }
 0x269   :  { %1804 = vmatmul.mubr.msk.f32.gmra.mrb[6].mxu0 %vm1072_vm2, %v1508_v31 }
 0x26a   :  { %v1516_v30 = vadd.f32 %v3542_v16, %v1493_v60 }
 0x26c   :  { %1816 = vmatmul.mubr.msk.f32.gmra.mrb[6].mxu1 %vm1072_vm2, %v1516_v30 }
 0x324   :  { %v1796_v36 = vpop.f32.mrb[0].mxu0 }
 0x325   :  { %v1648_v21 = vadd.f32 %v1796_v36, %v1749_v1  ;;  %v1642_v46 = vpop.f32.mrb[1].mxu0 }
 0x326   :  { %v1643_v48 = vadd.f32 %v1749_v1, %v1642_v46 }
 0x327   :  { %1722 = vst [vmem:[%s3667_s9 + $0x8] sm:$0xff] %v1648_v21  ;;  %v1808_v18 = vpop.f32.mrb[0].mxu1 }
 0x328   :  { %1721 = vst [vmem:[%s3667_s9] sm:$0xff] %v1643_v48  ;;  %v1688_v17 = vadd.f32 %v1808_v18, %v1749_v1  ;;  %v1682_v16 = vpop.f32.mrb[1].mxu1 }
 0x329   :  { %v1683_v4 = vadd.f32 %v1749_v1, %v1682_v16 }
 0x32a   :  { %1730 = vst [vmem:[%s3667_s9 + $0x48] sm:$0xff] %v1688_v17 }
 0x32b   :  { %1729 = vst [vmem:[%s3667_s9 + $0x40] sm:$0xff] %v1683_v4 }
 0x32c   :  { %v1799_v58 = vpop.f32.mrb[2].mxu0 }
 0x32d   :  { %v1658_v42 = vadd.f32 %v1799_v58, %v1749_v1  ;;  %v1652_v0 = vpop.f32.mrb[3].mxu0 }
 0x32e   :  { %v1653_v9 = vadd.f32 %v1749_v1, %v1652_v0 }
 0x32f   :  { %1724 = vst [vmem:[%s3667_s9 + $0x18] sm:$0xff] %v1658_v42  ;;  %v1811_v22 = vpop.f32.mrb[2].mxu1 }
 0x330   :  { %1723 = vst [vmem:[%s3667_s9 + $0x10] sm:$0xff] %v1653_v9  ;;  %v1698_v54 = vadd.f32 %v1811_v22, %v1749_v1  ;;  %v1692_v39 = vpop.f32.mrb[3].mxu1 }
 0x331   :  { %v1693_v63 = vadd.f32 %v1749_v1, %v1692_v39 }
 0x332   :  { %1732 = vst [vmem:[%s3667_s9 + $0x58] sm:$0xff] %v1698_v54 }
 0x333   :  { %1731 = vst [vmem:[%s3667_s9 + $0x50] sm:$0xff] %v1693_v63 }
 0x334   :  { %v1802_v44 = vpop.f32.mrb[4].mxu0 }
 0x335   :  { %v1668_v40 = vadd.f32 %v1802_v44, %v1749_v1  ;;  %v1662_v27 = vpop.f32.mrb[5].mxu0 }
 0x336   :  { %v1663_v41 = vadd.f32 %v1749_v1, %v1662_v27 }
 0x337   :  { %1726 = vst [vmem:[%s3667_s9 + $0x28] sm:$0xff] %v1668_v40  ;;  %v1814_v8 = vpop.f32.mrb[4].mxu1 }
 0x338   :  { %1725 = vst [vmem:[%s3667_s9 + $0x20] sm:$0xff] %v1663_v41  ;;  %v1708_v26 = vadd.f32 %v1814_v8, %v1749_v1  ;;  %v1702_v5 = vpop.f32.mrb[5].mxu1 }
 0x339   :  { %v1703_v28 = vadd.f32 %v1749_v1, %v1702_v5 }
 0x33a   :  { %1734 = vst [vmem:[%s3667_s9 + $0x68] sm:$0xff] %v1708_v26 }
 0x33b   :  { %1733 = vst [vmem:[%s3667_s9 + $0x60] sm:$0xff] %v1703_v28 }
 0x33c   :  { %v1805_v24 = vpop.f32.mrb[6].mxu0 }
 0x33d   :  { %v1678_v52 = vadd.f32 %v1805_v24, %v1749_v1  ;;  %v1672_v3 = vpop.f32.mrb[7].mxu0 }
 0x33e   :  { %v1673_v20 = vadd.f32 %v1749_v1, %v1672_v3 }
 0x33f   :  { %1728 = vst [vmem:[%s3667_s9 + $0x38] sm:$0xff] %v1678_v52  ;;  %v1817_v62 = vpop.f32.mrb[6].mxu1 }
 0x340   :  { %1727 = vst [vmem:[%s3667_s9 + $0x30] sm:$0xff] %v1673_v20  ;;  %v1718_v15 = vadd.f32 %v1817_v62, %v1749_v1  ;;  %v1712_v13 = vpop.f32.mrb[7].mxu1 }
 0x341   :  { %v1713_v19 = vadd.f32 %v1749_v1, %v1712_v13 }
 0x342   :  { %1736 = vst [vmem:[%s3667_s9 + $0x78] sm:$0xff] %v1718_v15 }
 0x343   :  { %1735 = vst [vmem:[%s3667_s9 + $0x70] sm:$0xff] %v1713_v19 }

// kernel: _lambda_.21
= control target key start
LH: loop header
LB: loop body
LE: loop exit
PB: predicated region body
PF: predicated region fallthrough
CT: control target
= control target key end

     0   :  { %vm22_vm0 = vcmask 261120   ;;  %v536_v5 = vmov 0.0   ;;  %s790_s0 = inlined_call_operand.vmem [shape: f32[128,128], index: 0, kind: input, shape index: {}]   ;;  %s791_s1 = inlined_call_operand.vmem [shape: f32[128,32], index: 1, kind: input, shape index: {}]   ;;  %s792_s2 = inlined_call_operand.vmem [shape: f32[1,32], index: 2, kind: input, shape index: {}]   ;;  %s793_s3 = inlined_call_operand.vmem [shape: f32[128,32], index: 3, kind: input, shape index: {}]   ;;  %s794_s4 = inlined_call_operand.hbm [shape: f32[128,32], index: 4, kind: output, shape index: {}]  }
   0x1   :  { %v71_v0 = vld [vmem:[%s791_s1] sm:$0xff]  ;;  %v72_v1 = vld [vmem:[%s791_s1 + $0x8] sm:$0xff]  ;;  %v73_v2 = vld [vmem:[%s791_s1 + $0x10] sm:$0xff]  ;;  %24 = vst.msk [vmem:[#allocation2 + $0x8] sm:$0xff] %vm22_vm0, %v536_v5 }
   0x2   :  { %v460_v3 = vpack.c.bf16 %v72_v1, %v71_v0  ;;  %v74_v4 = vld [vmem:[%s791_s1 + $0x18] sm:$0xff]  ;;  %23 = vst.msk [vmem:[#allocation2] sm:$0xff] %vm22_vm0, %v536_v5  ;;  %25 = vst.msk [vmem:[#allocation2 + $0x10] sm:$0xff] %vm22_vm0, %v536_v5  ;;  %v75_v7 = vld [vmem:[%s791_s1 + $0x20] sm:$0xff] }
   0x3   :  { %26 = vst.msk [vmem:[#allocation2 + $0x18] sm:$0xff] %vm22_vm0, %v536_v5  ;;  %27 = vst.msk [vmem:[#allocation2 + $0x20] sm:$0xff] %vm22_vm0, %v536_v5  ;;  %v464_v6 = vpack.c.bf16 %v74_v4, %v73_v2  ;;  %v76_v8 = vld [vmem:[%s791_s1 + $0x28] sm:$0xff]  ;;  %v55_v10 = vld [vmem:[%s790_s0] sm:$0xff] }
   0x4   :  { %28 = vst.msk [vmem:[#allocation2 + $0x28] sm:$0xff] %vm22_vm0, %v536_v5  ;;  %29 = vst.msk [vmem:[#allocation2 + $0x30] sm:$0xff] %vm22_vm0, %v536_v5  ;;  %461 = vmatprep.subr.bf16.mxu0 %v460_v3  ;;  %492 = vmatprep.subr.bf16.mxu1 %v460_v3  ;;  %v468_v9 = vpack.c.bf16 %v76_v8, %v75_v7  ;;  %v63_v11 = vld [vmem:[%s790_s0 + $0x40] sm:$0xff]  ;;  %v77_v12 = vld [vmem:[%s791_s1 + $0x30] sm:$0xff] }
   0x5   :  { %30 = vst.msk [vmem:[#allocation2 + $0x38] sm:$0xff] %vm22_vm0, %v536_v5  ;;  %31 = vst.msk [vmem:[#allocation2 + $0x40] sm:$0xff] %vm22_vm0, %v536_v5  ;;  %463 = vmatpush3.bf16.msra.mxu0 %v460_v3  ;;  %500 = vmatpush3.bf16.msra.mxu1 %v460_v3  ;;  %v78_v13 = vld [vmem:[%s791_s1 + $0x38] sm:$0xff]  ;;  %v79_v15 = vld [vmem:[%s791_s1 + $0x40] sm:$0xff] }
   0x6   :  { %32 = vst.msk [vmem:[#allocation2 + $0x48] sm:$0xff] %vm22_vm0, %v536_v5  ;;  %33 = vst.msk [vmem:[#allocation2 + $0x50] sm:$0xff] %vm22_vm0, %v536_v5  ;;  %465 = vmatprep.subr.bf16.mxu0 %v464_v6  ;;  %493 = vmatprep.subr.bf16.mxu1 %v464_v6  ;;  %v472_v14 = vpack.c.bf16 %v78_v13, %v77_v12  ;;  %v80_v16 = vld [vmem:[%s791_s1 + $0x48] sm:$0xff] }
   0x7   :  { %34 = vst.msk [vmem:[#allocation2 + $0x58] sm:$0xff] %vm22_vm0, %v536_v5  ;;  %35 = vst.msk [vmem:[#allocation2 + $0x60] sm:$0xff] %vm22_vm0, %v536_v5  ;;  %436 = vmatprep.mubr.f32.mxu0 %v55_v10  ;;  %448 = vmatprep.mubr.f32.mxu1 %v63_v11 }
   0x8   :  { %36 = vst.msk [vmem:[#allocation2 + $0x68] sm:$0xff] %vm22_vm0, %v536_v5  ;;  %37 = vst.msk [vmem:[#allocation2 + $0x70] sm:$0xff] %vm22_vm0, %v536_v5 }
   0x9   :  { %38 = vst.msk [vmem:[#allocation2 + $0x78] sm:$0xff] %vm22_vm0, %v536_v5  ;;  %467 = vmatpush3.bf16.msra.mxu0 %v464_v6  ;;  %501 = vmatpush3.bf16.msra.mxu1 %v464_v6 }
   0xa   :  { %469 = vmatprep.subr.bf16.mxu0 %v468_v9  ;;  %494 = vmatprep.subr.bf16.mxu1 %v468_v9 }
   0xb   :  { %9 = vsyncpa [#allocation4], 0  ;;  %v476_v17 = vpack.c.bf16 %v80_v16, %v79_v15  ;;  %v81_v18 = vld [vmem:[%s791_s1 + $0x50] sm:$0xff]  ;;  %v82_v19 = vld [vmem:[%s791_s1 + $0x58] sm:$0xff]  ;;  %s537_s28 = smov [#allocation3]  }
   0xc   :  { %v480_v20 = vpack.c.bf16 %v82_v19, %v81_v18  ;;  %v83_v21 = vld [vmem:[%s791_s1 + $0x60] sm:$0xff]  ;;  %v84_v22 = vld [vmem:[%s791_s1 + $0x68] sm:$0xff]  ;;  %v85_v24 = vld [vmem:[%s791_s1 + $0x70] sm:$0xff] }
   0xd   :  { %471 = vmatpush3.bf16.msra.mxu0 %v468_v9  ;;  %502 = vmatpush3.bf16.msra.mxu1 %v468_v9  ;;  %v484_v23 = vpack.c.bf16 %v84_v22, %v83_v21  ;;  %v86_v25 = vld [vmem:[%s791_s1 + $0x78] sm:$0xff]  ;;  %v56_v27 = vld [vmem:[%s790_s0 + $0x8] sm:$0xff]  ;;  %v57_v29 = vld [vmem:[%s790_s0 + $0x10] sm:$0xff]  ;;  %s360_s1 = sshll.u32 %s537_s28, 4  ;;  %s361_s1 = int_to_ptr.vmem [resolvable:$true] %s360_s1 }
   0xe   :  { %473 = vmatprep.subr.bf16.mxu0 %v472_v14  ;;  %495 = vmatprep.subr.bf16.mxu1 %v472_v14  ;;  %v488_v26 = vpack.c.bf16 %v86_v25, %v85_v24  ;;  %v64_v28 = vld [vmem:[%s790_s0 + $0x48] sm:$0xff]  ;;  %v65_v30 = vld [vmem:[%s790_s0 + $0x50] sm:$0xff]  ;;  %v58_v31 = vld [vmem:[%s790_s0 + $0x18] sm:$0xff]  ;;  %p517_p1 = scmp.lt.s32.totalorder %s361_s1, %s361_s1 }
   0xf   :  { %v66_v32 = vld [vmem:[%s790_s0 + $0x58] sm:$0xff]  ;;  %v59_v33 = vld [vmem:[%s790_s0 + $0x20] sm:$0xff]  ;;  %v60_v35 = vld [vmem:[%s790_s0 + $0x28] sm:$0xff] }
  0x10   :  { %v67_v34 = vld [vmem:[%s790_s0 + $0x60] sm:$0xff]  ;;  %v68_v36 = vld [vmem:[%s790_s0 + $0x68] sm:$0xff]  ;;  %v61_v37 = vld [vmem:[%s790_s0 + $0x30] sm:$0xff] }
  0x11   :  { %475 = vmatpush3.bf16.msra.mxu0 %v472_v14  ;;  %503 = vmatpush3.bf16.msra.mxu1 %v472_v14  ;;  %v69_v38 = vld [vmem:[%s790_s0 + $0x70] sm:$0xff]  ;;  %v62_v39 = vld [vmem:[%s790_s0 + $0x38] sm:$0xff]  ;;  %v40_v41 = vld [vmem:[#allocation2 + $0x8] sm:$0xff] }
  0x12   :  { %477 = vmatprep.subr.bf16.mxu0 %v476_v17  ;;  %496 = vmatprep.subr.bf16.mxu1 %v476_v17  ;;  %v70_v40 = vld [vmem:[%s790_s0 + $0x78] sm:$0xff]  ;;  %v48_v42 = vld [vmem:[#allocation2 + $0x48] sm:$0xff]  ;;  %v39_v43 = vld [vmem:[#allocation2] sm:$0xff] }
  0x13   :  { %v47_v44 = vld [vmem:[#allocation2 + $0x40] sm:$0xff]  ;;  %v42_v53 = vld [vmem:[#allocation2 + $0x18] sm:$0xff]  ;;  %v41_v55 = vld [vmem:[#allocation2 + $0x10] sm:$0xff] }
  0x14   :  { %v50_v54 = vld [vmem:[#allocation2 + $0x58] sm:$0xff]  ;;  %v49_v56 = vld [vmem:[#allocation2 + $0x50] sm:$0xff]  ;;  %v44_v1 = vld [vmem:[#allocation2 + $0x28] sm:$0xff] }
  0x15   :  { %479 = vmatpush3.bf16.msra.mxu0 %v476_v17  ;;  %504 = vmatpush3.bf16.msra.mxu1 %v476_v17  ;;  %v52_v2 = vld [vmem:[#allocation2 + $0x68] sm:$0xff]  ;;  %v684_v3 = vld [vmem:[%s792_s2] ss:$0 sm:$0xff]  ;;  %v46_v10 = vld [vmem:[#allocation2 + $0x38] sm:$0xff] }
  0x16   :  { %481 = vmatprep.subr.bf16.mxu0 %v480_v20  ;;  %497 = vmatprep.subr.bf16.mxu1 %v480_v20  ;;  %v43_v4 = vld [vmem:[#allocation2 + $0x20] sm:$0xff]  ;;  %v308_v6 = vld [vmem:[%s793_s3 + $0x8] sm:$0xff]  ;;  %v54_v17 = vld [vmem:[#allocation2 + $0x78] sm:$0xff] }
  0x17   :  { %v51_v5 = vld [vmem:[#allocation2 + $0x60] sm:$0xff]  ;;  %v316_v7 = vld [vmem:[%s793_s3 + $0x48] sm:$0xff]  ;;  %v45_v22 = vld [vmem:[#allocation2 + $0x30] sm:$0xff] }
  0x18   :  { %v307_v11 = vld [vmem:[%s793_s3] sm:$0xff] }
  0x19   :  { %483 = vmatpush3.bf16.msra.mxu0 %v480_v20  ;;  %505 = vmatpush3.bf16.msra.mxu1 %v480_v20  ;;  %v315_v12 = vld [vmem:[%s793_s3 + $0x40] sm:$0xff] }
  0x1a   :  { %485 = vmatprep.subr.bf16.mxu0 %v484_v23  ;;  %498 = vmatprep.subr.bf16.mxu1 %v484_v23 }
  0x1d   :  { %487 = vmatpush3.bf16.msra.mxu0 %v484_v23  ;;  %506 = vmatpush3.bf16.msra.mxu1 %v484_v23 }
  0x1e   :  { %489 = vmatprep.subr.bf16.mxu0 %v488_v26  ;;  %499 = vmatprep.subr.bf16.mxu1 %v488_v26 }
  0x21   :  { %491 = vmatpush3.bf16.msra.mxu0 %v488_v26  ;;  %507 = vmatpush3.bf16.msra.mxu1 %v488_v26 }
  0x24   :  { %437 = vmatmul.mubr.f32.vlgmr.msra.gmra.mrb[0].mxu0 %v56_v27  ;;  %449 = vmatmul.mubr.f32.vlgmr.msra.gmra.mrb[0].mxu1 %v64_v28  ;;  %v53_v27 = vld [vmem:[#allocation2 + $0x70] sm:$0xff] }
  0x25   :  { %439 = vmatprep.mubr.f32.mxu0 %v57_v29  ;;  %451 = vmatprep.mubr.f32.mxu1 %v65_v30 }
  0x28   :  { %440 = vmatmul.mubr.f32.gmra.mrb[2].mxu0 %v58_v31  ;;  %452 = vmatmul.mubr.f32.gmra.mrb[2].mxu1 %v66_v32 }
  0x29   :  { %442 = vmatprep.mubr.f32.mxu0 %v59_v33  ;;  %454 = vmatprep.mubr.f32.mxu1 %v67_v34  ;;  %v310_v34 = vld [vmem:[%s793_s3 + $0x18] sm:$0xff] }
  0x2c   :  { %443 = vmatmul.mubr.f32.gmra.mrb[4].mxu0 %v60_v35  ;;  %455 = vmatmul.mubr.f32.gmra.mrb[4].mxu1 %v68_v36  ;;  %v318_v35 = vld [vmem:[%s793_s3 + $0x58] sm:$0xff] }
  0x2d   :  { %445 = vmatprep.mubr.f32.mxu0 %v61_v37  ;;  %457 = vmatprep.mubr.f32.mxu1 %v69_v38 }
  0x30   :  { %446 = vmatmul.mubr.f32.gmra.mrb[6].mxu0 %v62_v39  ;;  %458 = vmatmul.mubr.f32.gmra.mrb[6].mxu1 %v70_v40 }
  0xf7   :  { %v438_v45 = vpop.f32.mrb[0].mxu0  ;;  %v450_v46 = vpop.f32.mrb[0].mxu1 }
  0xf8   :  { %v233_v47 = vadd.f32 %v438_v45, %v40_v41  ;;  %v241_v48 = vadd.f32 %v450_v46, %v48_v42  ;;  %v153_v49 = vpop.f32.mrb[1].mxu0  ;;  %v193_v50 = vpop.f32.mrb[1].mxu1 }
  0xf9   :  { %v232_v51 = vadd.f32 %v153_v49, %v39_v43  ;;  %v240_v52 = vadd.f32 %v193_v50, %v47_v44  ;;  %v309_v44 = vld [vmem:[%s793_s3 + $0x10] sm:$0xff] }
  0xfa   :  { %250 = vst.msk [vmem:[#allocation2 + $0x8] sm:$0xff] %vm22_vm0, %v233_v47  ;;  %258 = vst.msk [vmem:[#allocation2 + $0x48] sm:$0xff] %vm22_vm0, %v241_v48 }
  0xfb   :  { %249 = vst.msk [vmem:[#allocation2] sm:$0xff] %vm22_vm0, %v232_v51  ;;  %257 = vst.msk [vmem:[#allocation2 + $0x40] sm:$0xff] %vm22_vm0, %v240_v52  ;;  %v441_v57 = vpop.f32.mrb[2].mxu0  ;;  %v453_v58 = vpop.f32.mrb[2].mxu1  ;;  %v317_v51 = vld [vmem:[%s793_s3 + $0x50] sm:$0xff] }
  0xfc   :  { %v235_v59 = vadd.f32 %v441_v57, %v42_v53  ;;  %v243_v60 = vadd.f32 %v453_v58, %v50_v54  ;;  %v163_v61 = vpop.f32.mrb[3].mxu0  ;;  %v203_v62 = vpop.f32.mrb[3].mxu1  ;;  %v320_v57 = vld [vmem:[%s793_s3 + $0x68] sm:$0xff] }
  0xfd   :  { %v234_v63 = vadd.f32 %v163_v61, %v41_v55  ;;  %v242_v0 = vadd.f32 %v203_v62, %v49_v56  ;;  %v312_v56 = vld [vmem:[%s793_s3 + $0x28] sm:$0xff]  ;;  %v311_v62 = vld [vmem:[%s793_s3 + $0x20] sm:$0xff] }
  0xfe   :  { %252 = vst.msk [vmem:[#allocation2 + $0x18] sm:$0xff] %vm22_vm0, %v235_v59  ;;  %260 = vst.msk [vmem:[#allocation2 + $0x58] sm:$0xff] %vm22_vm0, %v243_v60 }
  0xff   :  { %251 = vst.msk [vmem:[#allocation2 + $0x10] sm:$0xff] %vm22_vm0, %v234_v63  ;;  %259 = vst.msk [vmem:[#allocation2 + $0x50] sm:$0xff] %vm22_vm0, %v242_v0  ;;  %v444_v8 = vpop.f32.mrb[4].mxu0  ;;  %v456_v9 = vpop.f32.mrb[4].mxu1 }
 0x100   :  { %v237_v13 = vadd.f32 %v444_v8, %v44_v1  ;;  %v245_v14 = vadd.f32 %v456_v9, %v52_v2  ;;  %v173_v15 = vpop.f32.mrb[5].mxu0  ;;  %v213_v16 = vpop.f32.mrb[5].mxu1  ;;  %v314_v9 = vld [vmem:[%s793_s3 + $0x38] sm:$0xff] }
 0x101   :  { %v269_v18 = vld [vmem:[#allocation2 + $0x8] sm:$0xff]  ;;  %v236_v20 = vadd.f32 %v173_v15, %v43_v4  ;;  %v244_v21 = vadd.f32 %v213_v16, %v51_v5  ;;  %v319_v4 = vld [vmem:[%s793_s3 + $0x60] sm:$0xff]  ;;  %v313_v15 = vld [vmem:[%s793_s3 + $0x30] sm:$0xff] }
 0x102   :  { %v277_v19 = vld [vmem:[#allocation2 + $0x48] sm:$0xff]  ;;  %v292_v23 = vadd.f32 %v684_v3, %v269_v18  ;;  %v268_v25 = vld [vmem:[#allocation2] sm:$0xff]  ;;  %254 = vst.msk [vmem:[#allocation2 + $0x28] sm:$0xff] %vm22_vm0, %v237_v13  ;;  %262 = vst.msk [vmem:[#allocation2 + $0x68] sm:$0xff] %vm22_vm0, %v245_v14 }
 0x103   :  { %v300_v24 = vadd.f32 %v684_v3, %v277_v19  ;;  %v276_v26 = vld [vmem:[#allocation2 + $0x40] sm:$0xff]  ;;  %v291_v28 = vadd.f32 %v684_v3, %v268_v25  ;;  %253 = vst.msk [vmem:[#allocation2 + $0x20] sm:$0xff] %vm22_vm0, %v236_v20  ;;  %261 = vst.msk [vmem:[#allocation2 + $0x60] sm:$0xff] %vm22_vm0, %v244_v21  ;;  %v447_v30 = vpop.f32.mrb[6].mxu0  ;;  %v459_v31 = vpop.f32.mrb[6].mxu1  ;;  %v321_v20 = vld [vmem:[%s793_s3 + $0x70] sm:$0xff] }
 0x104   :  { %v299_v29 = vadd.f32 %v684_v3, %v276_v26  ;;  %v324_v32 = vadd.f32 %v308_v6, %v292_v23  ;;  %v239_v36 = vadd.f32 %v447_v30, %v46_v10  ;;  %v247_v37 = vadd.f32 %v459_v31, %v54_v17  ;;  %v183_v38 = vpop.f32.mrb[7].mxu0  ;;  %v223_v39 = vpop.f32.mrb[7].mxu1  ;;  %v322_v10 = vld [vmem:[%s793_s3 + $0x78] sm:$0xff]  ;;  %s512_s3 = scalar_lea.vmem %s361_s1, 2048 }
 0x105   :  { %v332_v33 = vadd.f32 %v316_v7, %v300_v24  ;;  %v323_v40 = vadd.f32 %v307_v11, %v291_v28  ;;  %v271_v42 = vld [vmem:[#allocation2 + $0x18] sm:$0xff]  ;;  %v238_v45 = vadd.f32 %v183_v38, %v45_v22  ;;  %v246_v46 = vadd.f32 %v223_v39, %v53_v27  ;;  %p513_p0 = scmp.ne.s32.totalorder %s361_s1, %s512_s3  ;;  %p518_p2 = scmp.lt.s32.totalorder %s512_s3, %s512_s3 }
 0x106   :  { %v331_v41 = vadd.f32 %v315_v12, %v299_v29  ;;  %v279_v43 = vld [vmem:[#allocation2 + $0x58] sm:$0xff]  ;;  %340 = vst.msk [vmem:[#allocation3 + $0x8] sm:$0xff] %vm22_vm0, %v324_v32  ;;  %v294_v47 = vadd.f32 %v684_v3, %v271_v42  ;;  %v270_v49 = vld [vmem:[#allocation2 + $0x10] sm:$0xff]  ;;  %256 = vst.msk [vmem:[#allocation2 + $0x38] sm:$0xff] %vm22_vm0, %v239_v36 }
 0x107   :  { %348 = vst.msk [vmem:[#allocation3 + $0x48] sm:$0xff] %vm22_vm0, %v332_v33  ;;  %v302_v48 = vadd.f32 %v684_v3, %v279_v43  ;;  %v278_v50 = vld [vmem:[#allocation2 + $0x50] sm:$0xff]  ;;  %264 = vst.msk [vmem:[#allocation2 + $0x78] sm:$0xff] %vm22_vm0, %v247_v37  ;;  %v293_v52 = vadd.f32 %v684_v3, %v270_v49  ;;  %p519_p3 = por %p518_p2, %p517_p1 }
 0x108   :  { %339 = vst.msk [vmem:[#allocation3] sm:$0xff] %vm22_vm0, %v323_v40  ;;  %347 = vst.msk [vmem:[#allocation3 + $0x40] sm:$0xff] %vm22_vm0, %v331_v41  ;;  %v301_v53 = vadd.f32 %v684_v3, %v278_v50  ;;  %v326_v54 = vadd.f32 %v310_v34, %v294_v47 }
 0x109   :  { %255 = vst.msk [vmem:[#allocation2 + $0x30] sm:$0xff] %vm22_vm0, %v238_v45  ;;  %263 = vst.msk [vmem:[#allocation2 + $0x70] sm:$0xff] %vm22_vm0, %v246_v46  ;;  %v334_v55 = vadd.f32 %v318_v35, %v302_v48  ;;  %v325_v58 = vadd.f32 %v309_v44, %v293_v52  ;;  %v273_v60 = vld [vmem:[#allocation2 + $0x28] sm:$0xff]  ;;  %p520_p4 = pnand %p519_p3, %p513_p0 }
 0x10a   :  { %v333_v59 = vadd.f32 %v317_v51, %v301_v53  ;;  %v281_v61 = vld [vmem:[#allocation2 + $0x68] sm:$0xff]  ;;  %342 = vst.msk [vmem:[#allocation3 + $0x18] sm:$0xff] %vm22_vm0, %v326_v54  ;;  %v296_v63 = vadd.f32 %v684_v3, %v273_v60  ;;  %v272_v1 = vld [vmem:[#allocation2 + $0x20] sm:$0xff] }
 0x10b   :  { %350 = vst.msk [vmem:[#allocation3 + $0x58] sm:$0xff] %vm22_vm0, %v334_v55  ;;  %v304_v0 = vadd.f32 %v684_v3, %v281_v61  ;;  %v280_v2 = vld [vmem:[#allocation2 + $0x60] sm:$0xff]  ;;  %341 = vst.msk [vmem:[#allocation3 + $0x10] sm:$0xff] %vm22_vm0, %v325_v58  ;;  %v295_v5 = vadd.f32 %v684_v3, %v272_v1 }
 0x10c   :  { %349 = vst.msk [vmem:[#allocation3 + $0x50] sm:$0xff] %vm22_vm0, %v333_v59  ;;  %v303_v6 = vadd.f32 %v684_v3, %v280_v2  ;;  %v328_v7 = vadd.f32 %v312_v56, %v296_v63 }
 0x10d   :  { %v336_v8 = vadd.f32 %v320_v57, %v304_v0  ;;  %v327_v11 = vadd.f32 %v311_v62, %v295_v5  ;;  %v275_v13 = vld [vmem:[#allocation2 + $0x38] sm:$0xff] }
 0x10e   :  { %v335_v12 = vadd.f32 %v319_v4, %v303_v6  ;;  %v283_v14 = vld [vmem:[#allocation2 + $0x78] sm:$0xff]  ;;  %344 = vst.msk [vmem:[#allocation3 + $0x28] sm:$0xff] %vm22_vm0, %v328_v7  ;;  %v298_v16 = vadd.f32 %v684_v3, %v275_v13 }
 0x10f   :  { %352 = vst.msk [vmem:[#allocation3 + $0x68] sm:$0xff] %vm22_vm0, %v336_v8  ;;  %v306_v17 = vadd.f32 %v684_v3, %v283_v14  ;;  %343 = vst.msk [vmem:[#allocation3 + $0x20] sm:$0xff] %vm22_vm0, %v327_v11 }
 0x110   :  { %v274_v18 = vld [vmem:[#allocation2 + $0x30] sm:$0xff]  ;;  %351 = vst.msk [vmem:[#allocation3 + $0x60] sm:$0xff] %vm22_vm0, %v335_v12  ;;  %v330_v23 = vadd.f32 %v314_v9, %v298_v16 }
 0x111   :  { %v282_v19 = vld [vmem:[#allocation2 + $0x70] sm:$0xff]  ;;  %v297_v21 = vadd.f32 %v684_v3, %v274_v18  ;;  %v338_v24 = vadd.f32 %v322_v10, %v306_v17 }
 0x112   :  { %v305_v22 = vadd.f32 %v684_v3, %v282_v19  ;;  %346 = vst.msk [vmem:[#allocation3 + $0x38] sm:$0xff] %vm22_vm0, %v330_v23 }
 0x113   :  { %v329_v25 = vadd.f32 %v313_v15, %v297_v21  ;;  %354 = vst.msk [vmem:[#allocation3 + $0x78] sm:$0xff] %vm22_vm0, %v338_v24 }
 0x114   :  { %v337_v26 = vadd.f32 %v321_v20, %v305_v22 }
 0x115   :  { %345 = vst.msk [vmem:[#allocation3 + $0x30] sm:$0xff] %vm22_vm0, %v329_v25 }
 0x116   :  { %353 = vst.msk [vmem:[#allocation3 + $0x70] sm:$0xff] %vm22_vm0, %v337_v26 }
 0x117   :  { %523 = shalt.err (!%p520_p4)
}
 0x118   :  { %s524_s6 = scalar_lea.hbm %s794_s4, 2048 }
 0x119   :  { %p525_p5 = scmp.ne.s32.totalorder %s794_s4, %s524_s6  ;;  %p528_p6 = scmp.lt.u32.totalorder %s524_s6, %s794_s4 }
 0x11b   :  { %p530_p7 = pnand %p528_p6, %p525_p5 }
 0x11d   :  { %533 = shalt.err (!%p530_p7)
}
 0x11e   :  { %s538_s11 = smov 128   ;;  %s539_s12 = smov 8  }
 0x11f   :  { %366 = dma.vmem_to_hbm [thread:$0]  %s361_s1, 2048, %s794_s4, [#allocation4], %s538_s11, %s538_s11, %s539_s12  }
 0x120   :  { %534 = dma.done.wait [#allocation4], 2048  }
 0x121   :  { %535 = vsyncadd [#allocation4], 4294965248 }
 0x122   :  { %370 = vsyncpa [#allocation4], 1 }

</bundles_post_ra>
